<compile_context>
chip_gen: v6e
topology: v6e:2x2x1
jax: 0.10.0
libtpu: 0.0.40
codegen_flags: <defaults>
</compile_context>

<pallas_src>
import functools

import jax
import jax.numpy as jnp
from jax import lax
from jax.experimental import pallas as pl
from jax.experimental.pallas import tpu as pltpu


CPAD = 128  # lane-dense channel padding for conv1/conv2 outputs


def _round_up(x, m):
    return (x + m - 1) // m * m


def _atoms_pad(num_atoms):
    return max(128, _round_up(num_atoms, 128))


def _choose_tm(m, cap=128):
    """Row tile: whole thing if small; exact 2-way split (megacore) if it fits; else cap."""
    if m <= cap:
        return m
    half = m // 2
    if m % 2 == 0 and half % 8 == 0 and half <= cap:
        return half
    return cap


# ---------------------------------------------------------------------------
# Kernel 1: single-K-block matmul + bias + ReLU (used for conv1 / conv2)
# ---------------------------------------------------------------------------
def _mm_bias_relu_kernel(a_ref, w_ref, b_ref, o_ref):
    y = jnp.dot(a_ref[...], w_ref[...], preferred_element_type=jnp.float32)
    o_ref[...] = jnp.maximum(y + b_ref[...], 0.0).astype(o_ref.dtype)


def matmul_bias_relu(a, w, b, *, out_dtype=jnp.bfloat16, tm_cap=128):
    """a: (M, K) bf16, w: (K, N) bf16 (N % 128 == 0), b: (N,) f32 -> (M, N)."""
    M, K = a.shape
    K2, N = w.shape
    assert K == K2 and b.shape == (N,)
    assert N % 128 == 0, "weights must be pre-padded to lane-dense N"

    tm = _choose_tm(M, tm_cap)
    grid = (pl.cdiv(M, tm),)
    return pl.pallas_call(
        _mm_bias_relu_kernel,
        out_shape=jax.ShapeDtypeStruct((M, N), out_dtype),
        grid_spec=pltpu.PrefetchScalarGridSpec(
            num_scalar_prefetch=0,
            grid=grid,
            in_specs=[
                pl.BlockSpec((tm, K), lambda i: (i, 0)),
                pl.BlockSpec((K, N), lambda i: (0, 0)),
                pl.BlockSpec((1, N), lambda i: (0, 0)),
            ],
            out_specs=pl.BlockSpec((tm, N), lambda i: (i, 0)),
        ),
        compiler_params=pltpu.CompilerParams(
            dimension_semantics=("parallel",)),
    )(a, w, b.reshape(1, N).astype(jnp.float32))


# ---------------------------------------------------------------------------
# Kernel 2: fused head = conv3 (position loop) + flatten + FC(512)+ReLU
#           + FC(A*atoms) [+ per-action softmax], fully VMEM-resident
# ---------------------------------------------------------------------------
def _head_kernel(p3_ref, w3_ref, b3_ref, w4_ref, b4_ref, w5_ref, b5_ref, o_ref,
                 *, n_pos, n_actions, atoms_pad, apply_softmax):
    B = p3_ref.shape[1]
    H = w4_ref.shape[2]
    acc = jnp.zeros((B, H), jnp.float32)
    # conv3 + flatten + fc1 matmul, accumulated per output position (no reshape).
    for p in range(n_pos):
        h3 = jnp.dot(p3_ref[p], w3_ref[...], preferred_element_type=jnp.float32)
        h3 = jnp.maximum(h3 + b3_ref[...], 0.0)
        acc = acc + jnp.dot(h3.astype(w4_ref.dtype), w4_ref[p],
                            preferred_element_type=jnp.float32)
    h = jnp.maximum(acc + b4_ref[...], 0.0)                     # (B, 512) f32
    logits = jnp.dot(h.astype(w5_ref.dtype), w5_ref[...],
                     preferred_element_type=jnp.float32) + b5_ref[...]
    if not apply_softmax:
        o_ref[...] = logits
    else:
        for a in range(n_actions):
            la = logits[:, a * atoms_pad:(a + 1) * atoms_pad]   # lane-aligned slice
            m = jnp.max(la, axis=-1, keepdims=True)
            e = jnp.exp(la - m)                                 # padded lanes -> 0
            o_ref[:, a * atoms_pad:(a + 1) * atoms_pad] = (
                e / jnp.sum(e, axis=-1, keepdims=True))


def fused_head(patches, w3, b3, w4p, b4, w5, b5, *, num_actions, num_atoms):
    """patches: (P, B, K3) bf16 position-major conv3 im2col; weights pre-reorganized."""
    atoms_pad = _atoms_pad(num_atoms)
    P, B, _ = patches.shape
    vm = pl.BlockSpec(memory_space=pltpu.MemorySpace.VMEM)
    return pl.pallas_call(
        functools.partial(_head_kernel, n_pos=P, n_actions=num_actions,
                          atoms_pad=atoms_pad, apply_softmax=num_atoms > 1),
        out_shape=jax.ShapeDtypeStruct((B, num_actions * atoms_pad), jnp.float32),
        in_specs=[vm] * 7,
        out_specs=vm,
    )(patches, w3, b3.reshape(1, -1).astype(jnp.float32),
      w4p, b4.reshape(1, -1).astype(jnp.float32),
      w5, b5.reshape(1, -1).astype(jnp.float32))


# ---------------------------------------------------------------------------
# Glue: NHWC im2col (lane-contiguous patch vectors)
# ---------------------------------------------------------------------------
def im2col_nhwc(x, k, s):
    """Batch-major patches: (N*OH*OW, k*k*C)."""
    n, h, w, c = x.shape
    oh = (h - k) // s + 1
    ow = (w - k) // s + 1
    cols = []
    for ky in range(k):
        for kx in range(k):
            cols.append(x[:, ky:ky + s * oh:s, kx:kx + s * ow:s, :])  # (n,oh,ow,c)
    p = jnp.stack(cols, axis=3)                 # (n, oh, ow, k*k, c)
    return p.reshape(n * oh * ow, k * k * c), oh, ow


def im2col_pos_major(x, k, s):
    """Position-major patches: (OH*OW, N, k*k*C) — for the fused conv3 head."""
    n, h, w, c = x.shape
    oh = (h - k) // s + 1
    ow = (w - k) // s + 1
    pos = []
    for i in range(oh):
        for j in range(ow):
            pos.append(x[:, i * s:i * s + k, j * s:j * s + k, :].reshape(n, k * k * c))
    return jnp.stack(pos, axis=0), oh, ow


def conv2d_nhwc(x, w_mat, b, k, s):
    n = x.shape[0]
    cout = w_mat.shape[1]
    patches, oh, ow = im2col_nhwc(x, k, s)
    y = matmul_bias_relu(patches, w_mat, b, out_dtype=jnp.bfloat16)
    return y.reshape(n, oh, ow, cout)


# ---------------------------------------------------------------------------
# Model: params (PyTorch layout), one-time conversion, forward
# ---------------------------------------------------------------------------
def _conv_out(n, k, s):
    return (n - k) // s + 1


def conv_stack_dims(input_shape):
    _, h, w = input_shape
    h1, w1 = _conv_out(h, 8, 4), _conv_out(w, 8, 4)
    h2, w2 = _conv_out(h1, 4, 2), _conv_out(w1, 4, 2)
    h3, w3 = _conv_out(h2, 3, 1), _conv_out(w2, 3, 1)
    return (h1, w1), (h2, w2), (h3, w3)


def init_params(key, input_shape, num_actions, num_atoms=1):
    """Parameters in PyTorch layout: convs OIHW, Linears (out, in)."""
    c_in = input_shape[0]
    _, _, (h3, w3) = conv_stack_dims(input_shape)
    feat = 64 * h3 * w3
    ks = jax.random.split(key, 10)
    s = 0.05
    return {
        "w1": jax.random.normal(ks[0], (32, c_in, 8, 8), jnp.float32) * s,
        "b1": jax.random.normal(ks[1], (32,), jnp.float32) * s,
        "w2": jax.random.normal(ks[2], (64, 32, 4, 4), jnp.float32) * s,
        "b2": jax.random.normal(ks[3], (64,), jnp.float32) * s,
        "w3": jax.random.normal(ks[4], (64, 64, 3, 3), jnp.float32) * s,
        "b3": jax.random.normal(ks[5], (64,), jnp.float32) * s,
        "w4": jax.random.normal(ks[6], (512, feat), jnp.float32) * s,
        "b4": jax.random.normal(ks[7], (512,), jnp.float32) * s,
        "w5": jax.random.normal(ks[8], (num_actions * num_atoms, 512), jnp.float32) * s,
        "b5": jax.random.normal(ks[9], (num_actions * num_atoms,), jnp.float32) * s,
    }


def convert_params(p, input_shape, num_actions, num_atoms=1):
    """One-time layout conversion (NHWC im2col weights, bf16, lane-dense padding)."""
    _, _, (h3, w3) = conv_stack_dims(input_shape)
    c_in = p["w1"].shape[1]

    def conv_w(w, cin_pad, cout_pad):
        # OIHW -> (KH*KW*Cin_pad, Cout_pad), zero rows/cols for padded channels.
        cout, cin, kh, kw = w.shape
        wm = jnp.transpose(w, (2, 3, 1, 0))                      # (kh, kw, cin, cout)
        wm = jnp.pad(wm, ((0, 0), (0, 0), (0, cin_pad - cin), (0, cout_pad - cout)))
        return wm.reshape(kh * kw * cin_pad, cout_pad).astype(jnp.bfloat16)

    def pad_bias(b, cout_pad):
        return jnp.pad(b, (0, cout_pad - b.shape[0])).astype(jnp.float32)

    # fc1: PyTorch flattens NCHW (index = c*(h3*w3) + p). Reorganize position-major:
    # w4_pos[p, c, :] = w4[:, c*(h3*w3) + p]   -> used as per-position (64, 512) blocks.
    w4_pos = (p["w4"].reshape(512, 64, h3, w3)
              .transpose(2, 3, 1, 0)                             # (i, j, c, 512)
              .reshape(h3 * w3, 64, 512).astype(jnp.bfloat16))

    # fc2: per-action 128-lane blocks; padded lanes get -1e30 bias when softmaxed.
    A = num_actions
    ap = _atoms_pad(num_atoms)
    w5 = p["w5"].reshape(A, num_atoms, 512)
    w5 = jnp.pad(w5, ((0, 0), (0, ap - num_atoms), (0, 0)))
    w5 = jnp.transpose(w5, (2, 0, 1)).reshape(512, A * ap).astype(jnp.bfloat16)
    pad_val = -1e30 if num_atoms > 1 else 0.0
    b5 = jnp.pad(p["b5"].reshape(A, num_atoms),
                 ((0, 0), (0, ap - num_atoms)),
                 constant_values=pad_val).reshape(A * ap).astype(jnp.float32)

    return {
        "w1": conv_w(p["w1"], c_in, CPAD), "b1": pad_bias(p["b1"], CPAD),
        "w2": conv_w(p["w2"], CPAD, CPAD), "b2": pad_bias(p["b2"], CPAD),
        "w3": conv_w(p["w3"], CPAD, 64),   "b3": p["b3"].astype(jnp.float32),
        "w4": w4_pos,                      "b4": p["b4"].astype(jnp.float32),
        "w5": w5,                          "b5": b5,
    }


def dqn_forward(pparams, x, num_actions, num_atoms=1):
    # One-time layout change + bf16 cast; everything downstream is NHWC/bf16,
    # all Pallas outputs lane-dense (channels padded to 128 / per-action 128).
    x = jnp.transpose(x, (0, 2, 3, 1)).astype(jnp.bfloat16)
    x = conv2d_nhwc(x, pparams["w1"], pparams["b1"], 8, 4)     # (B, h1, w1, 128)
    x = conv2d_nhwc(x, pparams["w2"], pparams["b2"], 4, 2)     # (B, h2, w2, 128)
    patches3, _, _ = im2col_pos_major(x, 3, 1)                 # (h3*w3, B, 9*128)
    out = fused_head(patches3, pparams["w3"], pparams["b3"],
                     pparams["w4"], pparams["b4"],
                     pparams["w5"], pparams["b5"],
                     num_actions=num_actions, num_atoms=num_atoms)
    B = out.shape[0]
    ap = _atoms_pad(num_atoms)
    out = out.reshape(B, num_actions, ap)[:, :, :num_atoms]
    if num_atoms > 1:
        return out                                             # (B, A, atoms)
    return out.reshape(B, num_actions * num_atoms)             # (B, A)


# ---------------------------------------------------------------------------
# Pure-JAX reference: exact PyTorch forward (NCHW/OIHW), with the same
# bf16-operand / f32-accumulate precision choices as the Pallas path.
# ---------------------------------------------------------------------------
def dqn_reference(params, x, num_actions, num_atoms=1):
    dn = ("NCHW", "OIHW", "NCHW")

    def conv(x, w, b, s):
        y = lax.conv_general_dilated(
            x.astype(jnp.bfloat16), w.astype(jnp.bfloat16), (s, s), "VALID",
            dimension_numbers=dn, preferred_element_type=jnp.float32)
        return jax.nn.relu(y + b.reshape(1, -1, 1, 1)).astype(jnp.bfloat16)

    x = conv(x, params["w1"], params["b1"], 4)
    x = conv(x, params["w2"], params["b2"], 2)
    x = conv(x, params["w3"], params["b3"], 1)
    x = x.reshape(x.shape[0], -1)              # NCHW flatten (torch order)
    h = jnp.dot(x, params["w4"].T.astype(jnp.bfloat16),
                preferred_element_type=jnp.float32) + params["b4"]
    h = jax.nn.relu(h).astype(jnp.bfloat16)
    y = jnp.dot(h, params["w5"].T.astype(jnp.bfloat16),
                preferred_element_type=jnp.float32) + params["b5"]
    if num_atoms > 1:
        y = jax.nn.softmax(y.reshape(-1, num_atoms), axis=1)
        y = y.reshape(-1, num_actions, num_atoms)
    return y


# ---------------------------------------------------------------------------
if __name__ == "__main__":
    # 44x52 input -> 10x12 -> 4x5 -> 2x3 after the conv stack, feature_size = 384.
    input_shape = (4, 44, 52)     # (C, H, W), PyTorch convention
    num_actions = 6
    batch = 2

    key = jax.random.PRNGKey(0)
    pkey, xkey = jax.random.split(key)
    x = jax.random.normal(xkey, (batch,) + input_shape, jnp.float32)

    for num_atoms in (1, 51):     # plain DQN head and distributional (softmax) head
        params = init_params(pkey, input_shape, num_actions, num_atoms)
        pparams = convert_params(params, input_shape, num_actions, num_atoms)

        fwd = jax.jit(functools.partial(
            dqn_forward, num_actions=num_actions, num_atoms=num_atoms))
        ref_fn = jax.jit(functools.partial(
            dqn_reference, num_actions=num_actions, num_atoms=num_atoms))

        out = jax.block_until_ready(fwd(pparams, x))
        ref = jax.block_until_ready(ref_fn(params, x))

        expect = ((batch, num_actions * num_atoms) if num_atoms == 1
                  else (batch, num_actions, num_atoms))
        assert out.shape == expect, (out.shape, expect)
        err = float(jnp.max(jnp.abs(out - ref)))
        assert jnp.allclose(out, ref, rtol=2e-3, atol=2e-3), (
            f"mismatch vs reference (num_atoms={num_atoms}): max abs err = {err:e}")

    print("KERNEL_OK")
</pallas_src>

<mosaic_0001>
module attributes {stable_mosaic.version = 11 : i64} {
  func.func @_mm_bias_relu_kernel(%arg0: i32, %arg1: memref<120x256xbf16, #tpu.memory_space<vmem>>, %arg2: memref<256x128xbf16, #tpu.memory_space<vmem>>, %arg3: memref<1x128xf32, #tpu.memory_space<vmem>>, %arg4: memref<120x128xbf16, #tpu.memory_space<vmem>>) attributes {dimension_semantics = [#tpu.dimension_semantics<parallel>], iteration_bounds = array<i64: 2>, scalar_prefetch = 0 : i64, scratch_operands = 0 : i64, tpu.core_type = #tpu.core_type<tc>, window_params = [{transform_indices = @transform_0, window_bounds = array<i64: 120, 256>}, {pipeline_mode = #tpu.pipeline_mode<synchronous>, transform_indices = @transform_1, window_bounds = array<i64: 256, 128>}, {pipeline_mode = #tpu.pipeline_mode<synchronous>, transform_indices = @transform_2, window_bounds = array<i64: 1, 128>}, {transform_indices = @transform_3, window_bounds = array<i64: 120, 128>}]} {
    %c0 = arith.constant 0 : index
    %c0_0 = arith.constant 0 : index
    %0 = vector.load %arg1[%c0, %c0_0] : memref<120x256xbf16, #tpu.memory_space<vmem>>, vector<120x256xbf16>
    %c0_1 = arith.constant 0 : index
    %c0_2 = arith.constant 0 : index
    %1 = vector.load %arg2[%c0_1, %c0_2] : memref<256x128xbf16, #tpu.memory_space<vmem>>, vector<256x128xbf16>
    %cst = arith.constant dense<0.000000e+00> : vector<120x128xf32>
    %2 = tpu.matmul %0, %1, %cst {dimension_numbers = #tpu.dot_dimension_numbers<[1], [0], [0], [1], [0, 0, 1, 1], [], []>} : vector<120x256xbf16>, vector<256x128xbf16>, vector<120x128xf32> -> vector<120x128xf32>
    %c0_3 = arith.constant 0 : index
    %c0_4 = arith.constant 0 : index
    %3 = vector.load %arg3[%c0_3, %c0_4] : memref<1x128xf32, #tpu.memory_space<vmem>>, vector<1x128xf32>
    %4 = vector.broadcast %3 : vector<1x128xf32> to vector<120x128xf32>
    %5 = arith.addf %2, %4 : vector<120x128xf32>
    %cst_5 = arith.constant 0.000000e+00 : f32
    %6 = vector.broadcast %cst_5 : f32 to vector<120x128xf32>
    %7 = arith.maximumf %5, %6 : vector<120x128xf32>
    %8 = arith.truncf %7 : vector<120x128xf32> to vector<120x128xbf16>
    %c0_6 = arith.constant 0 : index
    %c0_7 = arith.constant 0 : index
    %9 = vector.load %arg4[%c0_6, %c0_7] : memref<120x128xbf16, #tpu.memory_space<vmem>>, vector<120x128xbf16>
    tpu.vector_store %arg4[%c0_6, %c0_7], %8 {strides = array<i32>} : memref<120x128xbf16, #tpu.memory_space<vmem>>, vector<120x128xbf16>,
    return
  }
  func.func @transform_0(%arg0: i32) -> (i32, i32) {
    %c0_i32 = arith.constant 0 : i32
    %c0_i32_0 = arith.constant 0 : i32
    return %arg0, %c0_i32 : i32, i32
  }
  func.func @transform_1(%arg0: i32) -> (i32, i32) {
    %c0_i32 = arith.constant 0 : i32
    %c0_i32_0 = arith.constant 0 : i32
    %c0_i32_1 = arith.constant 0 : i32
    return %c0_i32, %c0_i32_0 : i32, i32
  }
  func.func @transform_2(%arg0: i32) -> (i32, i32) {
    %c0_i32 = arith.constant 0 : i32
    %c0_i32_0 = arith.constant 0 : i32
    %c0_i32_1 = arith.constant 0 : i32
    return %c0_i32, %c0_i32_0 : i32, i32
  }
  func.func @transform_3(%arg0: i32) -> (i32, i32) {
    %c0_i32 = arith.constant 0 : i32
    %c0_i32_0 = arith.constant 0 : i32
    return %arg0, %c0_i32 : i32, i32
  }
}

module attributes {stable_mosaic.version = 11 : i64} {
  func.func @_mm_bias_relu_kernel(%arg0: i32, %arg1: memref<40x2048xbf16, #tpu.memory_space<vmem>>, %arg2: memref<2048x128xbf16, #tpu.memory_space<vmem>>, %arg3: memref<1x128xf32, #tpu.memory_space<vmem>>, %arg4: memref<40x128xbf16, #tpu.memory_space<vmem>>) attributes {dimension_semantics = [#tpu.dimension_semantics<parallel>], iteration_bounds = array<i64: 1>, scalar_prefetch = 0 : i64, scratch_operands = 0 : i64, tpu.core_type = #tpu.core_type<tc>, window_params = [{transform_indices = @transform_0, window_bounds = array<i64: 40, 2048>}, {pipeline_mode = #tpu.pipeline_mode<synchronous>, transform_indices = @transform_1, window_bounds = array<i64: 2048, 128>}, {pipeline_mode = #tpu.pipeline_mode<synchronous>, transform_indices = @transform_2, window_bounds = array<i64: 1, 128>}, {transform_indices = @transform_3, window_bounds = array<i64: 40, 128>}]} {
    %c0 = arith.constant 0 : index
    %c0_0 = arith.constant 0 : index
    %0 = vector.load %arg1[%c0, %c0_0] : memref<40x2048xbf16, #tpu.memory_space<vmem>>, vector<40x2048xbf16>
    %c0_1 = arith.constant 0 : index
    %c0_2 = arith.constant 0 : index
    %1 = vector.load %arg2[%c0_1, %c0_2] : memref<2048x128xbf16, #tpu.memory_space<vmem>>, vector<2048x128xbf16>
    %cst = arith.constant dense<0.000000e+00> : vector<40x128xf32>
    %2 = tpu.matmul %0, %1, %cst {dimension_numbers = #tpu.dot_dimension_numbers<[1], [0], [0], [1], [0, 0, 1, 1], [], []>} : vector<40x2048xbf16>, vector<2048x128xbf16>, vector<40x128xf32> -> vector<40x128xf32>
    %c0_3 = arith.constant 0 : index
    %c0_4 = arith.constant 0 : index
    %3 = vector.load %arg3[%c0_3, %c0_4] : memref<1x128xf32, #tpu.memory_space<vmem>>, vector<1x128xf32>
    %4 = vector.broadcast %3 : vector<1x128xf32> to vector<40x128xf32>
    %5 = arith.addf %2, %4 : vector<40x128xf32>
    %cst_5 = arith.constant 0.000000e+00 : f32
    %6 = vector.broadcast %cst_5 : f32 to vector<40x128xf32>
    %7 = arith.maximumf %5, %6 : vector<40x128xf32>
    %8 = arith.truncf %7 : vector<40x128xf32> to vector<40x128xbf16>
    %c0_6 = arith.constant 0 : index
    %c0_7 = arith.constant 0 : index
    %9 = vector.load %arg4[%c0_6, %c0_7] : memref<40x128xbf16, #tpu.memory_space<vmem>>, vector<40x128xbf16>
    tpu.vector_store %arg4[%c0_6, %c0_7], %8 {strides = array<i32>} : memref<40x128xbf16, #tpu.memory_space<vmem>>, vector<40x128xbf16>,
    return
  }
  func.func @transform_0(%arg0: i32) -> (i32, i32) {
    %c0_i32 = arith.constant 0 : i32
    %c0_i32_0 = arith.constant 0 : i32
    return %arg0, %c0_i32 : i32, i32
  }
  func.func @transform_1(%arg0: i32) -> (i32, i32) {
    %c0_i32 = arith.constant 0 : i32
    %c0_i32_0 = arith.constant 0 : i32
    %c0_i32_1 = arith.constant 0 : i32
    return %c0_i32, %c0_i32_0 : i32, i32
  }
  func.func @transform_2(%arg0: i32) -> (i32, i32) {
    %c0_i32 = arith.constant 0 : i32
    %c0_i32_0 = arith.constant 0 : i32
    %c0_i32_1 = arith.constant 0 : i32
    return %c0_i32, %c0_i32_0 : i32, i32
  }
  func.func @transform_3(%arg0: i32) -> (i32, i32) {
    %c0_i32 = arith.constant 0 : i32
    %c0_i32_0 = arith.constant 0 : i32
    return %arg0, %c0_i32 : i32, i32
  }
}

module attributes {stable_mosaic.version = 11 : i64} {
  func.func @_head_kernel(%arg0: memref<6x2x1152xbf16, #tpu.memory_space<vmem>>, %arg1: memref<1152x64xbf16, #tpu.memory_space<vmem>>, %arg2: memref<1x64xf32, #tpu.memory_space<vmem>>, %arg3: memref<6x64x512xbf16, #tpu.memory_space<vmem>>, %arg4: memref<1x512xf32, #tpu.memory_space<vmem>>, %arg5: memref<512x768xbf16, #tpu.memory_space<vmem>>, %arg6: memref<1x768xf32, #tpu.memory_space<vmem>>, %arg7: memref<2x768xf32, #tpu.memory_space<vmem>>) attributes {dimension_semantics = [], scalar_prefetch = 0 : i64, scratch_operands = 0 : i64, tpu.core_type = #tpu.core_type<tc>} {
    %cst = arith.constant 0.000000e+00 : f32
    %0 = vector.broadcast %cst : f32 to vector<2x512xf32>
    %c0 = arith.constant 0 : index
    %c0_0 = arith.constant 0 : index
    %c0_1 = arith.constant 0 : index
    %1 = vector.load %arg0[%c0, %c0_0, %c0_1] : memref<6x2x1152xbf16, #tpu.memory_space<vmem>>, vector<1x2x1152xbf16>
    %2 = vector.shape_cast %1 : vector<1x2x1152xbf16> to vector<2x1152xbf16>
    %c0_2 = arith.constant 0 : index
    %c0_3 = arith.constant 0 : index
    %3 = vector.load %arg1[%c0_2, %c0_3] : memref<1152x64xbf16, #tpu.memory_space<vmem>>, vector<1152x64xbf16>
    %cst_4 = arith.constant dense<0.000000e+00> : vector<2x64xf32>
    %4 = tpu.matmul %2, %3, %cst_4 {dimension_numbers = #tpu.dot_dimension_numbers<[1], [0], [0], [1], [0, 0, 1, 1], [], []>} : vector<2x1152xbf16>, vector<1152x64xbf16>, vector<2x64xf32> -> vector<2x64xf32>
    %c0_5 = arith.constant 0 : index
    %c0_6 = arith.constant 0 : index
    %5 = vector.load %arg2[%c0_5, %c0_6] : memref<1x64xf32, #tpu.memory_space<vmem>>, vector<1x64xf32>
    %6 = vector.broadcast %5 : vector<1x64xf32> to vector<2x64xf32>
    %7 = arith.addf %4, %6 : vector<2x64xf32>
    %cst_7 = arith.constant 0.000000e+00 : f32
    %8 = vector.broadcast %cst_7 : f32 to vector<2x64xf32>
    %9 = arith.maximumf %7, %8 : vector<2x64xf32>
    %10 = arith.truncf %9 : vector<2x64xf32> to vector<2x64xbf16>
    %c0_8 = arith.constant 0 : index
    %c0_9 = arith.constant 0 : index
    %c0_10 = arith.constant 0 : index
    %11 = vector.load %arg3[%c0_8, %c0_9, %c0_10] : memref<6x64x512xbf16, #tpu.memory_space<vmem>>, vector<1x64x512xbf16>
    %12 = vector.shape_cast %11 : vector<1x64x512xbf16> to vector<64x512xbf16>
    %cst_11 = arith.constant dense<0.000000e+00> : vector<2x512xf32>
    %13 = tpu.matmul %10, %12, %cst_11 {dimension_numbers = #tpu.dot_dimension_numbers<[1], [0], [0], [1], [0, 0, 1, 1], [], []>} : vector<2x64xbf16>, vector<64x512xbf16>, vector<2x512xf32> -> vector<2x512xf32>
    %14 = arith.addf %0, %13 : vector<2x512xf32>
    %c1 = arith.constant 1 : index
    %c0_12 = arith.constant 0 : index
    %c0_13 = arith.constant 0 : index
    %15 = vector.load %arg0[%c1, %c0_12, %c0_13] : memref<6x2x1152xbf16, #tpu.memory_space<vmem>>, vector<1x2x1152xbf16>
    %16 = vector.shape_cast %15 : vector<1x2x1152xbf16> to vector<2x1152xbf16>
    %c0_14 = arith.constant 0 : index
    %c0_15 = arith.constant 0 : index
    %17 = vector.load %arg1[%c0_14, %c0_15] : memref<1152x64xbf16, #tpu.memory_space<vmem>>, vector<1152x64xbf16>
    %cst_16 = arith.constant dense<0.000000e+00> : vector<2x64xf32>
    %18 = tpu.matmul %16, %17, %cst_16 {dimension_numbers = #tpu.dot_dimension_numbers<[1], [0], [0], [1], [0, 0, 1, 1], [], []>} : vector<2x1152xbf16>, vector<1152x64xbf16>, vector<2x64xf32> -> vector<2x64xf32>
    %c0_17 = arith.constant 0 : index
    %c0_18 = arith.constant 0 : index
    %19 = vector.load %arg2[%c0_17, %c0_18] : memref<1x64xf32, #tpu.memory_space<vmem>>, vector<1x64xf32>
    %20 = vector.broadcast %19 : vector<1x64xf32> to vector<2x64xf32>
    %21 = arith.addf %18, %20 : vector<2x64xf32>
    %cst_19 = arith.constant 0.000000e+00 : f32
    %22 = vector.broadcast %cst_19 : f32 to vector<2x64xf32>
    %23 = arith.maximumf %21, %22 : vector<2x64xf32>
    %24 = arith.truncf %23 : vector<2x64xf32> to vector<2x64xbf16>
    %c1_20 = arith.constant 1 : index
    %c0_21 = arith.constant 0 : index
    %c0_22 = arith.constant 0 : index
    %25 = vector.load %arg3[%c1_20, %c0_21, %c0_22] : memref<6x64x512xbf16, #tpu.memory_space<vmem>>, vector<1x64x512xbf16>
    %26 = vector.shape_cast %25 : vector<1x64x512xbf16> to vector<64x512xbf16>
    %cst_23 = arith.constant dense<0.000000e+00> : vector<2x512xf32>
    %27 = tpu.matmul %24, %26, %cst_23 {dimension_numbers = #tpu.dot_dimension_numbers<[1], [0], [0], [1], [0, 0, 1, 1], [], []>} : vector<2x64xbf16>, vector<64x512xbf16>, vector<2x512xf32> -> vector<2x512xf32>
    %28 = arith.addf %14, %27 : vector<2x512xf32>
    %c2 = arith.constant 2 : index
    %c0_24 = arith.constant 0 : index
    %c0_25 = arith.constant 0 : index
    %29 = vector.load %arg0[%c2, %c0_24, %c0_25] : memref<6x2x1152xbf16, #tpu.memory_space<vmem>>, vector<1x2x1152xbf16>
    %30 = vector.shape_cast %29 : vector<1x2x1152xbf16> to vector<2x1152xbf16>
    %c0_26 = arith.constant 0 : index
    %c0_27 = arith.constant 0 : index
    %31 = vector.load %arg1[%c0_26, %c0_27] : memref<1152x64xbf16, #tpu.memory_space<vmem>>, vector<1152x64xbf16>
    %cst_28 = arith.constant dense<0.000000e+00> : vector<2x64xf32>
    %32 = tpu.matmul %30, %31, %cst_28 {dimension_numbers = #tpu.dot_dimension_numbers<[1], [0], [0], [1], [0, 0, 1, 1], [], []>} : vector<2x1152xbf16>, vector<1152x64xbf16>, vector<2x64xf32> -> vector<2x64xf32>
    %c0_29 = arith.constant 0 : index
    %c0_30 = arith.constant 0 : index
    %33 = vector.load %arg2[%c0_29, %c0_30] : memref<1x64xf32, #tpu.memory_space<vmem>>, vector<1x64xf32>
    %34 = vector.broadcast %33 : vector<1x64xf32> to vector<2x64xf32>
    %35 = arith.addf %32, %34 : vector<2x64xf32>
    %cst_31 = arith.constant 0.000000e+00 : f32
    %36 = vector.broadcast %cst_31 : f32 to vector<2x64xf32>
    %37 = arith.maximumf %35, %36 : vector<2x64xf32>
    %38 = arith.truncf %37 : vector<2x64xf32> to vector<2x64xbf16>
    %c2_32 = arith.constant 2 : index
    %c0_33 = arith.constant 0 : index
    %c0_34 = arith.constant 0 : index
    %39 = vector.load %arg3[%c2_32, %c0_33, %c0_34] : memref<6x64x512xbf16, #tpu.memory_space<vmem>>, vector<1x64x512xbf16>
    %40 = vector.shape_cast %39 : vector<1x64x512xbf16> to vector<64x512xbf16>
    %cst_35 = arith.constant dense<0.000000e+00> : vector<2x512xf32>
    %41 = tpu.matmul %38, %40, %cst_35 {dimension_numbers = #tpu.dot_dimension_numbers<[1], [0], [0], [1], [0, 0, 1, 1], [], []>} : vector<2x64xbf16>, vector<64x512xbf16>, vector<2x512xf32> -> vector<2x512xf32>
    %42 = arith.addf %28, %41 : vector<2x512xf32>
    %c3 = arith.constant 3 : index
    %c0_36 = arith.constant 0 : index
    %c0_37 = arith.constant 0 : index
    %43 = vector.load %arg0[%c3, %c0_36, %c0_37] : memref<6x2x1152xbf16, #tpu.memory_space<vmem>>, vector<1x2x1152xbf16>
    %44 = vector.shape_cast %43 : vector<1x2x1152xbf16> to vector<2x1152xbf16>
    %c0_38 = arith.constant 0 : index
    %c0_39 = arith.constant 0 : index
    %45 = vector.load %arg1[%c0_38, %c0_39] : memref<1152x64xbf16, #tpu.memory_space<vmem>>, vector<1152x64xbf16>
    %cst_40 = arith.constant dense<0.000000e+00> : vector<2x64xf32>
    %46 = tpu.matmul %44, %45, %cst_40 {dimension_numbers = #tpu.dot_dimension_numbers<[1], [0], [0], [1], [0, 0, 1, 1], [], []>} : vector<2x1152xbf16>, vector<1152x64xbf16>, vector<2x64xf32> -> vector<2x64xf32>
    %c0_41 = arith.constant 0 : index
    %c0_42 = arith.constant 0 : index
    %47 = vector.load %arg2[%c0_41, %c0_42] : memref<1x64xf32, #tpu.memory_space<vmem>>, vector<1x64xf32>
    %48 = vector.broadcast %47 : vector<1x64xf32> to vector<2x64xf32>
    %49 = arith.addf %46, %48 : vector<2x64xf32>
    %cst_43 = arith.constant 0.000000e+00 : f32
    %50 = vector.broadcast %cst_43 : f32 to vector<2x64xf32>
    %51 = arith.maximumf %49, %50 : vector<2x64xf32>
    %52 = arith.truncf %51 : vector<2x64xf32> to vector<2x64xbf16>
    %c3_44 = arith.constant 3 : index
    %c0_45 = arith.constant 0 : index
    %c0_46 = arith.constant 0 : index
    %53 = vector.load %arg3[%c3_44, %c0_45, %c0_46] : memref<6x64x512xbf16, #tpu.memory_space<vmem>>, vector<1x64x512xbf16>
    %54 = vector.shape_cast %53 : vector<1x64x512xbf16> to vector<64x512xbf16>
    %cst_47 = arith.constant dense<0.000000e+00> : vector<2x512xf32>
    %55 = tpu.matmul %52, %54, %cst_47 {dimension_numbers = #tpu.dot_dimension_numbers<[1], [0], [0], [1], [0, 0, 1, 1], [], []>} : vector<2x64xbf16>, vector<64x512xbf16>, vector<2x512xf32> -> vector<2x512xf32>
    %56 = arith.addf %42, %55 : vector<2x512xf32>
    %c4 = arith.constant 4 : index
    %c0_48 = arith.constant 0 : index
    %c0_49 = arith.constant 0 : index
    %57 = vector.load %arg0[%c4, %c0_48, %c0_49] : memref<6x2x1152xbf16, #tpu.memory_space<vmem>>, vector<1x2x1152xbf16>
    %58 = vector.shape_cast %57 : vector<1x2x1152xbf16> to vector<2x1152xbf16>
    %c0_50 = arith.constant 0 : index
    %c0_51 = arith.constant 0 : index
    %59 = vector.load %arg1[%c0_50, %c0_51] : memref<1152x64xbf16, #tpu.memory_space<vmem>>, vector<1152x64xbf16>
    %cst_52 = arith.constant dense<0.000000e+00> : vector<2x64xf32>
    %60 = tpu.matmul %58, %59, %cst_52 {dimension_numbers = #tpu.dot_dimension_numbers<[1], [0], [0], [1], [0, 0, 1, 1], [], []>} : vector<2x1152xbf16>, vector<1152x64xbf16>, vector<2x64xf32> -> vector<2x64xf32>
    %c0_53 = arith.constant 0 : index
    %c0_54 = arith.constant 0 : index
    %61 = vector.load %arg2[%c0_53, %c0_54] : memref<1x64xf32, #tpu.memory_space<vmem>>, vector<1x64xf32>
    %62 = vector.broadcast %61 : vector<1x64xf32> to vector<2x64xf32>
    %63 = arith.addf %60, %62 : vector<2x64xf32>
    %cst_55 = arith.constant 0.000000e+00 : f32
    %64 = vector.broadcast %cst_55 : f32 to vector<2x64xf32>
    %65 = arith.maximumf %63, %64 : vector<2x64xf32>
    %66 = arith.truncf %65 : vector<2x64xf32> to vector<2x64xbf16>
    %c4_56 = arith.constant 4 : index
    %c0_57 = arith.constant 0 : index
    %c0_58 = arith.constant 0 : index
    %67 = vector.load %arg3[%c4_56, %c0_57, %c0_58] : memref<6x64x512xbf16, #tpu.memory_space<vmem>>, vector<1x64x512xbf16>
    %68 = vector.shape_cast %67 : vector<1x64x512xbf16> to vector<64x512xbf16>
    %cst_59 = arith.constant dense<0.000000e+00> : vector<2x512xf32>
    %69 = tpu.matmul %66, %68, %cst_59 {dimension_numbers = #tpu.dot_dimension_numbers<[1], [0], [0], [1], [0, 0, 1, 1], [], []>} : vector<2x64xbf16>, vector<64x512xbf16>, vector<2x512xf32> -> vector<2x512xf32>
    %70 = arith.addf %56, %69 : vector<2x512xf32>
    %c5 = arith.constant 5 : index
    %c0_60 = arith.constant 0 : index
    %c0_61 = arith.constant 0 : index
    %71 = vector.load %arg0[%c5, %c0_60, %c0_61] : memref<6x2x1152xbf16, #tpu.memory_space<vmem>>, vector<1x2x1152xbf16>
    %72 = vector.shape_cast %71 : vector<1x2x1152xbf16> to vector<2x1152xbf16>
    %c0_62 = arith.constant 0 : index
    %c0_63 = arith.constant 0 : index
    %73 = vector.load %arg1[%c0_62, %c0_63] : memref<1152x64xbf16, #tpu.memory_space<vmem>>, vector<1152x64xbf16>
    %cst_64 = arith.constant dense<0.000000e+00> : vector<2x64xf32>
    %74 = tpu.matmul %72, %73, %cst_64 {dimension_numbers = #tpu.dot_dimension_numbers<[1], [0], [0], [1], [0, 0, 1, 1], [], []>} : vector<2x1152xbf16>, vector<1152x64xbf16>, vector<2x64xf32> -> vector<2x64xf32>
    %c0_65 = arith.constant 0 : index
    %c0_66 = arith.constant 0 : index
    %75 = vector.load %arg2[%c0_65, %c0_66] : memref<1x64xf32, #tpu.memory_space<vmem>>, vector<1x64xf32>
    %76 = vector.broadcast %75 : vector<1x64xf32> to vector<2x64xf32>
    %77 = arith.addf %74, %76 : vector<2x64xf32>
    %cst_67 = arith.constant 0.000000e+00 : f32
    %78 = vector.broadcast %cst_67 : f32 to vector<2x64xf32>
    %79 = arith.maximumf %77, %78 : vector<2x64xf32>
    %80 = arith.truncf %79 : vector<2x64xf32> to vector<2x64xbf16>
    %c5_68 = arith.constant 5 : index
    %c0_69 = arith.constant 0 : index
    %c0_70 = arith.constant 0 : index
    %81 = vector.load %arg3[%c5_68, %c0_69, %c0_70] : memref<6x64x512xbf16, #tpu.memory_space<vmem>>, vector<1x64x512xbf16>
    %82 = vector.shape_cast %81 : vector<1x64x512xbf16> to vector<64x512xbf16>
    %cst_71 = arith.constant dense<0.000000e+00> : vector<2x512xf32>
    %83 = tpu.matmul %80, %82, %cst_71 {dimension_numbers = #tpu.dot_dimension_numbers<[1], [0], [0], [1], [0, 0, 1, 1], [], []>} : vector<2x64xbf16>, vector<64x512xbf16>, vector<2x512xf32> -> vector<2x512xf32>
    %84 = arith.addf %70, %83 : vector<2x512xf32>
    %c0_72 = arith.constant 0 : index
    %c0_73 = arith.constant 0 : index
    %85 = vector.load %arg4[%c0_72, %c0_73] : memref<1x512xf32, #tpu.memory_space<vmem>>, vector<1x512xf32>
    %86 = vector.broadcast %85 : vector<1x512xf32> to vector<2x512xf32>
    %87 = arith.addf %84, %86 : vector<2x512xf32>
    %cst_74 = arith.constant 0.000000e+00 : f32
    %88 = vector.broadcast %cst_74 : f32 to vector<2x512xf32>
    %89 = arith.maximumf %87, %88 : vector<2x512xf32>
    %90 = arith.truncf %89 : vector<2x512xf32> to vector<2x512xbf16>
    %c0_75 = arith.constant 0 : index
    %c0_76 = arith.constant 0 : index
    %91 = vector.load %arg5[%c0_75, %c0_76] : memref<512x768xbf16, #tpu.memory_space<vmem>>, vector<512x768xbf16>
    %cst_77 = arith.constant dense<0.000000e+00> : vector<2x768xf32>
    %92 = tpu.matmul %90, %91, %cst_77 {dimension_numbers = #tpu.dot_dimension_numbers<[1], [0], [0], [1], [0, 0, 1, 1], [], []>} : vector<2x512xbf16>, vector<512x768xbf16>, vector<2x768xf32> -> vector<2x768xf32>
    %c0_78 = arith.constant 0 : index
    %c0_79 = arith.constant 0 : index
    %93 = vector.load %arg6[%c0_78, %c0_79] : memref<1x768xf32, #tpu.memory_space<vmem>>, vector<1x768xf32>
    %94 = vector.broadcast %93 : vector<1x768xf32> to vector<2x768xf32>
    %95 = arith.addf %92, %94 : vector<2x768xf32>
    %c0_80 = arith.constant 0 : index
    %c0_81 = arith.constant 0 : index
    %96 = vector.load %arg7[%c0_80, %c0_81] : memref<2x768xf32, #tpu.memory_space<vmem>>, vector<2x768xf32>
    tpu.vector_store %arg7[%c0_80, %c0_81], %95 {strides = array<i32>} : memref<2x768xf32, #tpu.memory_space<vmem>>, vector<2x768xf32>,
    return
  }
}

</mosaic_0001>

<bundles_post_ra>
// kernel: dqn_forward.3
= control target key start
LH: loop header
LB: loop body
LE: loop exit
PB: predicated region body
PF: predicated region fallthrough
CT: control target
= control target key end

     0   :  { %s918_s12 = smov 0   ;;  %s1034_s0 = inlined_call_operand.vmem [shape: bf16[240,256], index: 0, kind: input, shape index: {}]   ;;  %s1035_s1 = inlined_call_operand.vmem [shape: bf16[256,128], index: 1, kind: input, shape index: {}]   ;;  %s1036_s2 = inlined_call_operand.vmem [shape: f32[1,128], index: 2, kind: input, shape index: {}]   ;;  %s1037_s3 = inlined_call_operand.vmem [shape: bf16[240,128], index: 3, kind: output, shape index: {}]  }
   0x1 LB: > { %s648_s13 = sadd.s32 4294967295, %s896_s12   ;;  %p652_p0 = scmp.ge.s32.totalorder %s896_s12, 1  ;;  %s896_s12 = sphi %s918_s12, %s13_s12  }
   0x2   : > { %p139_p1 = scmp.lt.s32.totalorder %s896_s12, 3 }
   0x4   : > { %p140_p2 = pnand %p652_p0, %p139_p1 }
   0x5   : > { %s164_s16 = smul.u32 (!%p140_p2), 15, %s648_s13 }
   0x6   : > { %143 = sbr.rel (%p140_p2) target bundleno = 276 (0x114), region = 32 }
   0x7   : > { %p165_p3 = scmp.lt.s32.totalorder (!%p140_p2), %s164_s16, 29 }
   0xb   : > { %v851_v0 = vld [vmem:[%s1035_s1 + $0x78] sm:$0xff]   ;;  %v853_v2 = vld [vmem:[%s1035_s1 + $0x70] sm:$0xff]   ;;  %v855_v4 = vld [vmem:[%s1035_s1 + $0x68] sm:$0xff]   ;;  %s1039_s16 = smov (!%p165_p3, %s164_s16), 29 }
   0xc   : > { %v852_v1 = vld [vmem:[%s1035_s1 + $0x38] sm:$0xff]   ;;  %763 = vmatprep.subr.bf16.mxu0 %v851_v0  ;;  %827 = vmatprep.subr.bf16.mxu1 %v851_v0  ;;  %v854_v3 = vld [vmem:[%s1035_s1 + $0x30] sm:$0xff]   ;;  %v856_v5 = vld [vmem:[%s1035_s1 + $0x28] sm:$0xff]   ;;  %s706_s4 = sshll.u32 %s1039_s16, 3  ;;  %s655_s28 = sshll.u32 %s1039_s16, 2 }
   0xd   : > { %764 = vmatpush3.bf16.msra.mxu0 %v852_v1  ;;  %835 = vmatpush3.bf16.msra.mxu1 %v852_v1  ;;  %v857_v6 = vld [vmem:[%s1035_s1 + $0x60] sm:$0xff]   ;;  %v859_v8 = vld [vmem:[%s1035_s1 + $0x58] sm:$0xff]   ;;  %s959_s9 = scalar_lea.vmem %s1034_s0, %s706_s4  ;;  %v861_v10 = vld [vmem:[%s1035_s1 + $0x50] sm:$0xff]   ;;  %s1010_s4 = scalar_lea.vmem %s1037_s3, %s655_s28 }
   0xe   : > { %765 = vmatprep.subr.bf16.mxu0 %v853_v2  ;;  %828 = vmatprep.subr.bf16.mxu1 %v853_v2  ;;  %v858_v7 = vld [vmem:[%s1035_s1 + $0x20] sm:$0xff]   ;;  %v860_v9 = vld [vmem:[%s1035_s1 + $0x18] sm:$0xff]   ;;  %v862_v13 = vld [vmem:[%s1035_s1 + $0x10] sm:$0xff]  }
   0xf   : > { %v869_v11 = vld [vmem:[%s959_s9 + $0x4] ss:$8 sps:$4 sm:$0xff]   ;;  %v867_v18 = vld [vmem:[%s959_s9] ss:$8 sps:$4 sm:$0xff]   ;;  %v873_v20 = vld [vmem:[%s959_s9 + $0x14] ss:$8 sps:$4 sm:$0xff]  }
  0x10   : > { %v872_v12 = vld [vmem:[%s959_s9 + $0x44] ss:$8 sps:$4 sm:$0xff]   ;;  %437 = vmatprep.mubr.bf16.mxu0 %v869_v11  ;;  %v870_v19 = vld [vmem:[%s959_s9 + $0x40] ss:$8 sps:$4 sm:$0xff]   ;;  %v875_v21 = vld [vmem:[%s959_s9 + $0x54] ss:$8 sps:$4 sm:$0xff]  }
  0x11   : > { %766 = vmatpush3.bf16.msra.mxu0 %v854_v3  ;;  %836 = vmatpush3.bf16.msra.mxu1 %v854_v3  ;;  %v863_v14 = vld [vmem:[%s1035_s1 + $0x48] sm:$0xff]   ;;  %v865_v16 = vld [vmem:[%s1035_s1 + $0x40] sm:$0xff]   ;;  %v877_v22 = vld [vmem:[%s959_s9 + $0x10] ss:$8 sps:$4 sm:$0xff]  }
  0x12   : > { %767 = vmatprep.subr.bf16.mxu0 %v855_v4  ;;  %829 = vmatprep.subr.bf16.mxu1 %v855_v4  ;;  %v864_v15 = vld [vmem:[%s1035_s1 + $0x8] sm:$0xff]   ;;  %v866_v17 = vld [vmem:[%s1035_s1] sm:$0xff]   ;;  %v878_v23 = vld [vmem:[%s959_s9 + $0x50] ss:$8 sps:$4 sm:$0xff]  }
  0x13   : > { %469 = vmatprep.mubr.bf16.mxu1 %v872_v12  ;;  %v879_v24 = vld [vmem:[%s959_s9 + $0x24] ss:$8 sps:$4 sm:$0xff]   ;;  %v192_v26 = vld [vmem:[%s959_s9 + $0x70] sm:$0xff]  ;;  %v883_v27 = vld [vmem:[%s959_s9 + $0x20] ss:$8 sps:$4 sm:$0xff]  }
  0x14   : > { %v881_v25 = vld [vmem:[%s959_s9 + $0x64] ss:$8 sps:$4 sm:$0xff]   ;;  %v884_v28 = vld [vmem:[%s959_s9 + $0x60] ss:$8 sps:$4 sm:$0xff]   ;;  %v885_v29 = vld [vmem:[%s959_s9 + $0x34] ss:$8 sps:$4 sm:$0xff]   ;;  %v672_v30 = vcombine.high %v192_v26, %v192_v26  ;;  %v671_v32 = vcombine.low %v192_v26, %v192_v26 }
  0x15   : > { %768 = vmatpush3.bf16.msra.mxu0 %v856_v5  ;;  %837 = vmatpush3.bf16.msra.mxu1 %v856_v5  ;;  %v888_v31 = vld [vmem:[%s959_s9 + $0x30] ss:$8 sps:$4 sm:$0xff]   ;;  %v1000_v37 = vld [vmem:[%s1036_s2] ss:$0 sm:$0xff] }
  0x16   : > { %769 = vmatprep.subr.bf16.mxu0 %v857_v6  ;;  %830 = vmatprep.subr.bf16.mxu1 %v857_v6 }
  0x19   : > { %770 = vmatpush3.bf16.msra.mxu0 %v858_v7  ;;  %838 = vmatpush3.bf16.msra.mxu1 %v858_v7 }
  0x1a   : > { %771 = vmatprep.subr.bf16.mxu0 %v859_v8  ;;  %831 = vmatprep.subr.bf16.mxu1 %v859_v8 }
  0x1d   : > { %772 = vmatpush3.bf16.msra.mxu0 %v860_v9  ;;  %839 = vmatpush3.bf16.msra.mxu1 %v860_v9 }
  0x1e   : > { %773 = vmatprep.subr.bf16.mxu0 %v861_v10  ;;  %832 = vmatprep.subr.bf16.mxu1 %v861_v10 }
  0x21   : > { %774 = vmatpush3.bf16.msra.mxu0 %v862_v13  ;;  %840 = vmatpush3.bf16.msra.mxu1 %v862_v13 }
  0x22   : > { %775 = vmatprep.subr.bf16.mxu0 %v863_v14  ;;  %833 = vmatprep.subr.bf16.mxu1 %v863_v14 }
  0x25   : > { %776 = vmatpush3.bf16.msra.mxu0 %v864_v15  ;;  %841 = vmatpush3.bf16.msra.mxu1 %v864_v15 }
  0x26   : > { %777 = vmatprep.subr.bf16.mxu0 %v865_v16  ;;  %834 = vmatprep.subr.bf16.mxu1 %v865_v16 }
  0x29   : > { %778 = vmatpush3.bf16.msra.mxu0 %v866_v17  ;;  %842 = vmatpush3.bf16.msra.mxu1 %v866_v17 }
  0x2c   : > { %438 = vmatmul.mubr.bf16.vlgmr.msra.gmra.mxu0 %v867_v18  ;;  %470 = vmatmul.mubr.bf16.vlgmr.msra.gmra.mxu1 %v870_v19 }
  0x2d   : > { %445 = vmatprep.mubr.bf16.mxu0 %v873_v20  ;;  %477 = vmatprep.mubr.bf16.mxu1 %v875_v21 }
  0x34   : > { %446 = vmatmul.mubr.bf16.gmra.mxu0 %v877_v22  ;;  %478 = vmatmul.mubr.bf16.gmra.mxu1 %v878_v23 }
  0x35   : > { %453 = vmatprep.mubr.bf16.mxu0 %v879_v24  ;;  %485 = vmatprep.mubr.bf16.mxu1 %v881_v25 }
  0x3c   : > { %454 = vmatmul.mubr.bf16.gmra.mxu0 %v883_v27  ;;  %486 = vmatmul.mubr.bf16.gmra.mxu1 %v884_v28 }
  0x3d   : > { %461 = vmatprep.mubr.bf16.mxu0 %v885_v29  ;;  %493 = vmatprep.mubr.bf16.mxu1 %v672_v30 }
  0x44   : > { %462 = vmatmul.mubr.bf16.gmra.mxu0 %v888_v31  ;;  %494 = vmatmul.mubr.bf16.gmra.mxu1 %v671_v32 }
  0xec   : > { %v779_v33 = vpop.f32.mrf.mxu0  ;;  %v803_v34 = vpop.f32.mrf.mxu1 }
  0xee   : > { %v780_v35 = vpop.f32.mrf.mxu0  ;;  %v804_v36 = vpop.f32.mrf.mxu1 }
  0xef   : > { %v781_v38 = vadd.f32 %v780_v35, %v779_v33  ;;  %v805_v39 = vadd.f32 %v804_v36, %v803_v34 }
  0xf0   : > { %v782_v40 = vpop.f32.mrf.mxu0  ;;  %v806_v41 = vpop.f32.mrf.mxu1 }
  0xf1   : > { %v440_v42 = vadd.f32 %v781_v38, %v1000_v37  ;;  %v472_v43 = vadd.f32 %v805_v39, %v1000_v37 }
  0xf2   : > { %v783_v44 = vpop.f32.mrf.mxu0  ;;  %v807_v45 = vpop.f32.mrf.mxu1 }
  0xf3   : > { %v784_v46 = vadd.f32 %v783_v44, %v782_v40  ;;  %v808_v47 = vadd.f32 %v807_v45, %v806_v41  ;;  %v501_v52 = vmax.f32 %v440_v42, 0.0  ;;  %v509_v53 = vmax.f32 %v472_v43, 0.0 }
  0xf4   : > { %v785_v48 = vpop.f32.mrf.mxu0  ;;  %v809_v49 = vpop.f32.mrf.mxu1 }
  0xf5   : > { %v443_v50 = vadd.f32 %v784_v46, %v1000_v37  ;;  %v475_v51 = vadd.f32 %v808_v47, %v1000_v37 }
  0xf6   : > { %v786_v54 = vpop.f32.mrf.mxu0  ;;  %v810_v55 = vpop.f32.mrf.mxu1 }
  0xf7   : > { %v502_v56 = vmax.f32 %v443_v50, 0.0  ;;  %v510_v57 = vmax.f32 %v475_v51, 0.0  ;;  %v787_v58 = vadd.f32 %v786_v54, %v785_v48  ;;  %v811_v59 = vadd.f32 %v810_v55, %v809_v49 }
  0xf8   : > { %v788_v60 = vpop.f32.mrf.mxu0  ;;  %v812_v61 = vpop.f32.mrf.mxu1 }
  0xf9   : > { %v725_v62 = vpack.c.bf16 %v502_v56, %v501_v52  ;;  %v745_v63 = vpack.c.bf16 %v510_v57, %v509_v53  ;;  %v448_v0 = vadd.f32 %v787_v58, %v1000_v37  ;;  %v480_v1 = vadd.f32 %v811_v59, %v1000_v37 }
  0xfa   : > { %v789_v2 = vpop.f32.mrf.mxu0  ;;  %v813_v3 = vpop.f32.mrf.mxu1 }
  0xfb   : > { %726 = vst [vmem:[%s1010_s4] sm:$0xff] %v725_v62   ;;  %760 = vst [vmem:[%s1010_s4 + $0x20] sm:$0xff] %v745_v63   ;;  %v790_v4 = vadd.f32 %v789_v2, %v788_v60  ;;  %v814_v5 = vadd.f32 %v813_v3, %v812_v61  ;;  %v503_v10 = vmax.f32 %v448_v0, 0.0  ;;  %v511_v11 = vmax.f32 %v480_v1, 0.0 }
  0xfc   : > { %v791_v6 = vpop.f32.mrf.mxu0  ;;  %v815_v7 = vpop.f32.mrf.mxu1 }
  0xfd   : > { %v451_v8 = vadd.f32 %v790_v4, %v1000_v37  ;;  %v483_v9 = vadd.f32 %v814_v5, %v1000_v37 }
  0xfe   : > { %v792_v12 = vpop.f32.mrf.mxu0  ;;  %v816_v13 = vpop.f32.mrf.mxu1 }
  0xff   : > { %v504_v14 = vmax.f32 %v451_v8, 0.0  ;;  %v512_v15 = vmax.f32 %v483_v9, 0.0  ;;  %v793_v16 = vadd.f32 %v792_v12, %v791_v6  ;;  %v817_v17 = vadd.f32 %v816_v13, %v815_v7 }
 0x100   : > { %v794_v18 = vpop.f32.mrf.mxu0  ;;  %v818_v19 = vpop.f32.mrf.mxu1 }
 0x101   : > { %v730_v20 = vpack.c.bf16 %v504_v14, %v503_v10  ;;  %v750_v21 = vpack.c.bf16 %v512_v15, %v511_v11  ;;  %v456_v22 = vadd.f32 %v793_v16, %v1000_v37  ;;  %v488_v23 = vadd.f32 %v817_v17, %v1000_v37 }
 0x102   : > { %v795_v24 = vpop.f32.mrf.mxu0  ;;  %v819_v25 = vpop.f32.mrf.mxu1 }
 0x103   : > { %757 = vst [vmem:[%s1010_s4 + $0x8] sm:$0xff] %v730_v20   ;;  %761 = vst [vmem:[%s1010_s4 + $0x28] sm:$0xff] %v750_v21   ;;  %v796_v26 = vadd.f32 %v795_v24, %v794_v18  ;;  %v820_v27 = vadd.f32 %v819_v25, %v818_v19  ;;  %v505_v32 = vmax.f32 %v456_v22, 0.0  ;;  %v513_v33 = vmax.f32 %v488_v23, 0.0 }
 0x104   : > { %v797_v28 = vpop.f32.mrf.mxu0  ;;  %v821_v29 = vpop.f32.mrf.mxu1 }
 0x105   : > { %v459_v30 = vadd.f32 %v796_v26, %v1000_v37  ;;  %v491_v31 = vadd.f32 %v820_v27, %v1000_v37 }
 0x106   : > { %v798_v34 = vpop.f32.mrf.mxu0  ;;  %v822_v35 = vpop.f32.mrf.mxu1 }
 0x107   : > { %v506_v36 = vmax.f32 %v459_v30, 0.0  ;;  %v514_v38 = vmax.f32 %v491_v31, 0.0  ;;  %v799_v39 = vadd.f32 %v798_v34, %v797_v28  ;;  %v823_v40 = vadd.f32 %v822_v35, %v821_v29 }
 0x108   : > { %v800_v41 = vpop.f32.mrf.mxu0  ;;  %v824_v42 = vpop.f32.mrf.mxu1 }
 0x109   : > { %v735_v43 = vpack.c.bf16 %v506_v36, %v505_v32  ;;  %v755_v44 = vpack.c.bf16 %v514_v38, %v513_v33  ;;  %v496_v45 = vadd.f32 %v823_v40, %v1000_v37  ;;  %v464_v48 = vadd.f32 %v799_v39, %v1000_v37 }
 0x10a   : > { %v801_v46 = vpop.f32.mrf.mxu0  ;;  %v825_v47 = vpop.f32.mrf.mxu1 }
 0x10b   : > { %758 = vst [vmem:[%s1010_s4 + $0x10] sm:$0xff] %v735_v43   ;;  %762 = vst [vmem:[%s1010_s4 + $0x30] sm:$0xff] %v755_v44   ;;  %v515_v49 = vmax.f32 %v496_v45, 0.0  ;;  %v802_v50 = vadd.f32 %v801_v46, %v800_v41  ;;  %v507_v53 = vmax.f32 %v464_v48, 0.0 }
 0x10d   : > { %v721_v51 = vpack.c.bf16 %v515_v49, %v515_v49  ;;  %v467_v52 = vadd.f32 %v802_v50, %v1000_v37 }
 0x10f   : > { %591 = vst [vmem:[%s1010_s4 + $0x38] sm:$0xf] %v721_v51  ;;  %v508_v54 = vmax.f32 %v467_v52, 0.0 }
 0x111   : > { %v740_v55 = vpack.c.bf16 %v508_v54, %v507_v53 }
 0x113   : > { %759 = vst [vmem:[%s1010_s4 + $0x18] sm:$0xff] %v740_v55  }
 0x114 PF: > { %s13_s12 = sadd.s32 1, %s896_s12  }
 0x115   : > { %p10_p4 = scmp.ge.s32.totalorder %s13_s12, 4  }
 0x117   :  { %12 = sbr.rel (!%p10_p4) target bundleno = 1 (0x1), region = 62 }

// kernel: dqn_forward.4
= control target key start
LH: loop header
LB: loop body
LE: loop exit
PB: predicated region body
PF: predicated region fallthrough
CT: control target
= control target key end

     0   :  { %s2950_s1 = inlined_call_operand.vmem [shape: bf16[2048,128], index: 1, kind: input, shape index: {}]   ;;  %s2951_s0 = inlined_call_operand.vmem [shape: bf16[40,2048], index: 0, kind: input, shape index: {}]   ;;  %s2952_s2 = inlined_call_operand.vmem [shape: f32[1,128], index: 2, kind: input, shape index: {}]   ;;  %s2953_s3 = inlined_call_operand.vmem [shape: bf16[40,128], index: 3, kind: output, shape index: {}]  }
   0x1   :  { %v2255_v0 = vld [vmem:[%s2950_s1 + $0x78] sm:$0xff]   ;;  %v2259_v4 = vld [vmem:[%s2950_s1 + $0x70] sm:$0xff]   ;;  %v2263_v8 = vld [vmem:[%s2950_s1 + $0x68] sm:$0xff]  }
   0x2   :  { %v2256_v1 = vld [vmem:[%s2950_s1 + $0xf8] sm:$0xff]   ;;  %1983 = vmatprep.subr.bf16.mxu0 %v2255_v0  ;;  %v2260_v5 = vld [vmem:[%s2950_s1 + $0xf0] sm:$0xff]   ;;  %v2264_v9 = vld [vmem:[%s2950_s1 + $0xe8] sm:$0xff]  }
   0x3   :  { %v2257_v2 = vld [vmem:[%s2950_s1 + $0x38] sm:$0xff]   ;;  %2017 = vmatprep.subr.bf16.mxu1 %v2256_v1  ;;  %v2261_v6 = vld [vmem:[%s2950_s1 + $0x30] sm:$0xff]   ;;  %v2265_v10 = vld [vmem:[%s2950_s1 + $0x28] sm:$0xff]  }
   0x4   :  { %v2258_v3 = vld [vmem:[%s2950_s1 + $0xb8] sm:$0xff]   ;;  %1984 = vmatpush3.bf16.msra.mxu0 %v2257_v2  ;;  %v2262_v7 = vld [vmem:[%s2950_s1 + $0xb0] sm:$0xff]   ;;  %v2266_v11 = vld [vmem:[%s2950_s1 + $0xa8] sm:$0xff]  }
   0x5   :  { %2018 = vmatpush3.bf16.msra.mxu1 %v2258_v3  ;;  %1985 = vmatprep.subr.bf16.mxu0 %v2259_v4  ;;  %v2267_v12 = vld [vmem:[%s2950_s1 + $0x60] sm:$0xff]   ;;  %v2271_v16 = vld [vmem:[%s2950_s1 + $0x58] sm:$0xff]   ;;  %v2275_v20 = vld [vmem:[%s2950_s1 + $0x50] sm:$0xff]  }
   0x6   :  { %2019 = vmatprep.subr.bf16.mxu1 %v2260_v5  ;;  %v2268_v13 = vld [vmem:[%s2950_s1 + $0xe0] sm:$0xff]   ;;  %v2272_v17 = vld [vmem:[%s2950_s1 + $0xd8] sm:$0xff]   ;;  %v2276_v21 = vld [vmem:[%s2950_s1 + $0xd0] sm:$0xff]  }
   0x7   :  { %v2269_v14 = vld [vmem:[%s2950_s1 + $0x20] sm:$0xff]   ;;  %v2273_v18 = vld [vmem:[%s2950_s1 + $0x18] sm:$0xff]   ;;  %v2277_v22 = vld [vmem:[%s2950_s1 + $0x10] sm:$0xff]  }
   0x8   :  { %1986 = vmatpush3.bf16.msra.mxu0 %v2261_v6  ;;  %v2270_v15 = vld [vmem:[%s2950_s1 + $0xa0] sm:$0xff]   ;;  %v2274_v19 = vld [vmem:[%s2950_s1 + $0x98] sm:$0xff]   ;;  %v2278_v23 = vld [vmem:[%s2950_s1 + $0x90] sm:$0xff]  }
   0x9   :  { %2020 = vmatpush3.bf16.msra.mxu1 %v2262_v7  ;;  %1987 = vmatprep.subr.bf16.mxu0 %v2263_v8  ;;  %v2279_v24 = vld [vmem:[%s2950_s1 + $0x48] sm:$0xff]   ;;  %v2283_v28 = vld [vmem:[%s2950_s1 + $0x40] sm:$0xff]   ;;  %v2287_v40 = vld [vmem:[%s2950_s1 + $0x178] sm:$0xff]  }
   0xa   :  { %2021 = vmatprep.subr.bf16.mxu1 %v2264_v9  ;;  %v2280_v25 = vld [vmem:[%s2950_s1 + $0xc8] sm:$0xff]   ;;  %v2284_v29 = vld [vmem:[%s2950_s1 + $0xc0] sm:$0xff]   ;;  %v2288_v41 = vld [vmem:[%s2950_s1 + $0x1f8] sm:$0xff]  }
   0xb   :  { %v2281_v26 = vld [vmem:[%s2950_s1 + $0x8] sm:$0xff]   ;;  %v2285_v30 = vld [vmem:[%s2950_s1] sm:$0xff]   ;;  %v2289_v42 = vld [vmem:[%s2950_s1 + $0x138] sm:$0xff]  }
   0xc   :  { %1988 = vmatpush3.bf16.msra.mxu0 %v2265_v10  ;;  %v2282_v27 = vld [vmem:[%s2950_s1 + $0x88] sm:$0xff]   ;;  %v2286_v31 = vld [vmem:[%s2950_s1 + $0x80] sm:$0xff]   ;;  %v2290_v43 = vld [vmem:[%s2950_s1 + $0x1b8] sm:$0xff]  }
   0xd   :  { %2022 = vmatpush3.bf16.msra.mxu1 %v2266_v11  ;;  %1989 = vmatprep.subr.bf16.mxu0 %v2267_v12  ;;  %v15_v32 = vld [vmem:[%s2951_s0] sm:$0xff]  ;;  %v16_v34 = vld [vmem:[%s2951_s0 + $0x8] sm:$0xff]  ;;  %v2291_v44 = vld [vmem:[%s2950_s1 + $0x170] sm:$0xff]  }
   0xe   :  { %2023 = vmatprep.subr.bf16.mxu1 %v2268_v13  ;;  %v23_v33 = vld [vmem:[%s2951_s0 + $0x40] sm:$0xff]  ;;  %v24_v37 = vld [vmem:[%s2951_s0 + $0x48] sm:$0xff]  ;;  %v2292_v45 = vld [vmem:[%s2950_s1 + $0x1f0] sm:$0xff]  }
   0xf   :  { %v1786_v35 = vcombine.low %v15_v32, %v23_v33  ;;  %v1787_v36 = vcombine.high %v15_v32, %v23_v33  ;;  %v1788_v38 = vcombine.low %v16_v34, %v24_v37  ;;  %v1789_v39 = vcombine.high %v16_v34, %v24_v37  ;;  %v2293_v46 = vld [vmem:[%s2950_s1 + $0x130] sm:$0xff]   ;;  %v2295_v48 = vld [vmem:[%s2950_s1 + $0x168] sm:$0xff]   ;;  %v31_v52 = vld [vmem:[%s2951_s0 + $0x80] sm:$0xff] }
  0x10   :  { %1990 = vmatpush3.bf16.msra.mxu0 %v2269_v14  ;;  %v2294_v47 = vld [vmem:[%s2950_s1 + $0x1b0] sm:$0xff]   ;;  %v2296_v49 = vld [vmem:[%s2950_s1 + $0x1e8] sm:$0xff]   ;;  %v39_v53 = vld [vmem:[%s2951_s0 + $0xc0] sm:$0xff] }
  0x11   :  { %2024 = vmatpush3.bf16.msra.mxu1 %v2270_v15  ;;  %1991 = vmatprep.subr.bf16.mxu0 %v2271_v16  ;;  %v2297_v50 = vld [vmem:[%s2950_s1 + $0x128] sm:$0xff]   ;;  %v1803_v54 = vcombine.high %v31_v52, %v39_v53  ;;  %v1802_v55 = vcombine.low %v31_v52, %v39_v53  ;;  %v2299_v59 = vld [vmem:[%s2950_s1 + $0x160] sm:$0xff]   ;;  %v2303_v0 = vld [vmem:[%s2950_s1 + $0x158] sm:$0xff]  }
  0x12   :  { %2025 = vmatprep.subr.bf16.mxu1 %v2272_v17  ;;  %1334 = vmatprep.mubr.bf16.mxu0 %v1787_v36  ;;  %v2298_v51 = vld [vmem:[%s2950_s1 + $0x1a8] sm:$0xff]   ;;  %v2300_v61 = vld [vmem:[%s2950_s1 + $0x1e0] sm:$0xff]   ;;  %v2304_v1 = vld [vmem:[%s2950_s1 + $0x1d8] sm:$0xff]  }
  0x13   :  { %1390 = vmatprep.mubr.bf16.mxu1 %v1789_v39  ;;  %v32_v56 = vld [vmem:[%s2951_s0 + $0x88] sm:$0xff]  ;;  %v2301_v62 = vld [vmem:[%s2950_s1 + $0x120] sm:$0xff]   ;;  %v2305_v2 = vld [vmem:[%s2950_s1 + $0x118] sm:$0xff]  }
  0x14   :  { %1992 = vmatpush3.bf16.msra.mxu0 %v2273_v18  ;;  %v40_v57 = vld [vmem:[%s2951_s0 + $0xc8] sm:$0xff]  ;;  %v2302_v63 = vld [vmem:[%s2950_s1 + $0x1a0] sm:$0xff]   ;;  %v2306_v3 = vld [vmem:[%s2950_s1 + $0x198] sm:$0xff]  }
  0x15   :  { %2026 = vmatpush3.bf16.msra.mxu1 %v2274_v19  ;;  %1993 = vmatprep.subr.bf16.mxu0 %v2275_v20  ;;  %v1805_v58 = vcombine.high %v32_v56, %v40_v57  ;;  %v1804_v60 = vcombine.low %v32_v56, %v40_v57  ;;  %v47_v4 = vld [vmem:[%s2951_s0 + $0x100] sm:$0xff]  ;;  %v48_v7 = vld [vmem:[%s2951_s0 + $0x108] sm:$0xff]  ;;  %v2310_v9 = vld [vmem:[%s2950_s1 + $0x150] sm:$0xff]  }
  0x16   :  { %2027 = vmatprep.subr.bf16.mxu1 %v2276_v21  ;;  %v1819_v5 = vcombine.high %v47_v4, %v47_v4  ;;  %v1818_v6 = vcombine.low %v47_v4, %v47_v4  ;;  %v1821_v8 = vcombine.high %v48_v7, %v48_v7  ;;  %v1820_v10 = vcombine.low %v48_v7, %v48_v7  ;;  %v2311_v11 = vld [vmem:[%s2950_s1 + $0x1d0] sm:$0xff]   ;;  %v2315_v14 = vld [vmem:[%s2950_s1 + $0x148] sm:$0xff]   ;;  %v2319_v18 = vld [vmem:[%s2950_s1 + $0x140] sm:$0xff]  }
  0x17   :  { %v2313_v12 = vld [vmem:[%s2950_s1 + $0x110] sm:$0xff]   ;;  %v2316_v15 = vld [vmem:[%s2950_s1 + $0x1c8] sm:$0xff]   ;;  %v2320_v19 = vld [vmem:[%s2950_s1 + $0x1c0] sm:$0xff]  }
  0x18   :  { %1994 = vmatpush3.bf16.msra.mxu0 %v2277_v22  ;;  %v2314_v13 = vld [vmem:[%s2950_s1 + $0x190] sm:$0xff]   ;;  %v2317_v16 = vld [vmem:[%s2950_s1 + $0x108] sm:$0xff]   ;;  %v2321_v20 = vld [vmem:[%s2950_s1 + $0x100] sm:$0xff]  }
  0x19   :  { %2028 = vmatpush3.bf16.msra.mxu1 %v2278_v23  ;;  %1995 = vmatprep.subr.bf16.mxu0 %v2279_v24  ;;  %v2318_v17 = vld [vmem:[%s2950_s1 + $0x188] sm:$0xff]   ;;  %v2322_v21 = vld [vmem:[%s2950_s1 + $0x180] sm:$0xff]   ;;  %v17_v22 = vld [vmem:[%s2951_s0 + $0x10] sm:$0xff] }
  0x1a   :  { %2029 = vmatprep.subr.bf16.mxu1 %v2280_v25  ;;  %v25_v23 = vld [vmem:[%s2951_s0 + $0x50] sm:$0xff]  ;;  %v2325_v32 = vld [vmem:[%s2950_s1 + $0x238] sm:$0xff]   ;;  %v2337_v52 = vld [vmem:[%s2950_s1 + $0x220] sm:$0xff]  }
  0x1b   :  { %v1790_v24 = vcombine.low %v17_v22, %v25_v23  ;;  %v1791_v25 = vcombine.high %v17_v22, %v25_v23  ;;  %v2326_v33 = vld [vmem:[%s2950_s1 + $0x2b8] sm:$0xff]   ;;  %v2327_v34 = vld [vmem:[%s2950_s1 + $0x270] sm:$0xff]   ;;  %v2338_v53 = vld [vmem:[%s2950_s1 + $0x2a0] sm:$0xff]  }
  0x1c   :  { %1996 = vmatpush3.bf16.msra.mxu0 %v2281_v26  ;;  %v18_v26 = vld [vmem:[%s2951_s0 + $0x18] sm:$0xff]  ;;  %v2329_v36 = vld [vmem:[%s2950_s1 + $0x230] sm:$0xff]   ;;  %v2351_v4 = vld [vmem:[%s2950_s1 + $0x248] sm:$0xff]  }
  0x1d   :  { %2030 = vmatpush3.bf16.msra.mxu1 %v2282_v27  ;;  %1997 = vmatprep.subr.bf16.mxu0 %v2283_v28  ;;  %v26_v27 = vld [vmem:[%s2951_s0 + $0x58] sm:$0xff]  ;;  %v2330_v37 = vld [vmem:[%s2950_s1 + $0x2b0] sm:$0xff]   ;;  %v2354_v7 = vld [vmem:[%s2950_s1 + $0x288] sm:$0xff]  }
  0x1e   :  { %2031 = vmatprep.subr.bf16.mxu1 %v2284_v29  ;;  %v1792_v28 = vcombine.low %v18_v26, %v26_v27  ;;  %v1793_v29 = vcombine.high %v18_v26, %v26_v27  ;;  %v41_v39 = vld [vmem:[%s2951_s0 + $0xd0] sm:$0xff]  ;;  %v2341_v57 = vld [vmem:[%s2950_s1 + $0x258] sm:$0xff]  }
  0x1f   :  { %v2361_v22 = vld [vmem:[%s2950_s1 + $0x338] sm:$0xff]   ;;  %v2365_v26 = vld [vmem:[%s2950_s1 + $0x330] sm:$0xff]  }
  0x20   :  { %1998 = vmatpush3.bf16.msra.mxu0 %v2285_v30  ;;  %v2323_v30 = vld [vmem:[%s2950_s1 + $0x278] sm:$0xff]   ;;  %v2366_v27 = vld [vmem:[%s2950_s1 + $0x3b0] sm:$0xff]  }
  0x21   :  { %2032 = vmatpush3.bf16.msra.mxu1 %v2286_v31  ;;  %2051 = vmatprep.subr.bf16.mxu0 %v2287_v40  ;;  %v2324_v31 = vld [vmem:[%s2950_s1 + $0x2f8] sm:$0xff]  }
  0x22   :  { %2085 = vmatprep.subr.bf16.mxu1 %v2288_v41  ;;  %v2362_v23 = vld [vmem:[%s2950_s1 + $0x3b8] sm:$0xff]  }
  0x23   :  { %1335 = vmatmul.mubr.bf16.vlgmr.msra.gmra.mxu0 %v1786_v35  ;;  %v2328_v35 = vld [vmem:[%s2950_s1 + $0x2f0] sm:$0xff]  }
  0x24   :  { %1391 = vmatmul.mubr.bf16.vlgmr.msra.gmra.mxu1 %v1788_v38  ;;  %2052 = vmatpush3.bf16.msra.mxu0 %v2289_v42  ;;  %v33_v38 = vld [vmem:[%s2951_s0 + $0x90] sm:$0xff]  ;;  %v2331_v42 = vld [vmem:[%s2950_s1 + $0x268] sm:$0xff]  }
  0x25   :  { %2086 = vmatpush3.bf16.msra.mxu1 %v2290_v43  ;;  %2053 = vmatprep.subr.bf16.mxu0 %v2291_v44  ;;  %v1807_v40 = vcombine.high %v33_v38, %v41_v39  ;;  %v1806_v41 = vcombine.low %v33_v38, %v41_v39  ;;  %v2332_v43 = vld [vmem:[%s2950_s1 + $0x2e8] sm:$0xff]   ;;  %v34_v44 = vld [vmem:[%s2951_s0 + $0x98] sm:$0xff] }
  0x26   :  { %2087 = vmatprep.subr.bf16.mxu1 %v2292_v45  ;;  %1342 = vmatprep.mubr.bf16.mxu0 %v1803_v54  ;;  %v42_v45 = vld [vmem:[%s2951_s0 + $0xd8] sm:$0xff]  ;;  %v49_v54 = vld [vmem:[%s2951_s0 + $0x110] sm:$0xff]  ;;  %v2370_v39 = vld [vmem:[%s2950_s1 + $0x3a8] sm:$0xff]  }
  0x27   :  { %1398 = vmatprep.mubr.bf16.mxu1 %v1805_v58  ;;  %v1822_v56 = vcombine.low %v49_v54, %v49_v54  ;;  %v2342_v58 = vld [vmem:[%s2950_s1 + $0x2d8] sm:$0xff]  }
  0x28   :  { %2054 = vmatpush3.bf16.msra.mxu0 %v2293_v46  ;;  %v1809_v46 = vcombine.high %v34_v44, %v42_v45 }
  0x29   :  { %2088 = vmatpush3.bf16.msra.mxu1 %v2294_v47  ;;  %2055 = vmatprep.subr.bf16.mxu0 %v2295_v48  ;;  %v2333_v47 = vld [vmem:[%s2950_s1 + $0x228] sm:$0xff]   ;;  %v1808_v48 = vcombine.low %v34_v44, %v42_v45  ;;  %v51_v44 = vld [vmem:[%s2951_s0 + $0x120] sm:$0xff] }
  0x2a   :  { %2089 = vmatprep.subr.bf16.mxu1 %v2296_v49  ;;  %v2334_v49 = vld [vmem:[%s2950_s1 + $0x2a8] sm:$0xff]   ;;  %v1827_v45 = vcombine.high %v51_v44, %v51_v44 }
  0x2b   :  { %1343 = vmatmul.mubr.bf16.gmra.mxu0 %v1802_v55  ;;  %v1823_v55 = vcombine.high %v49_v54, %v49_v54  ;;  %v2383_v54 = vld [vmem:[%s2950_s1 + $0x350] sm:$0xff]  }
  0x2c   :  { %2056 = vmatpush3.bf16.msra.mxu0 %v2297_v50  ;;  %1399 = vmatmul.mubr.bf16.gmra.mxu1 %v1804_v60  ;;  %v2335_v50 = vld [vmem:[%s2950_s1 + $0x260] sm:$0xff]  }
  0x2d   :  { %2090 = vmatpush3.bf16.msra.mxu1 %v2298_v51  ;;  %2057 = vmatprep.subr.bf16.mxu0 %v2299_v59  ;;  %v2336_v51 = vld [vmem:[%s2950_s1 + $0x2e0] sm:$0xff]   ;;  %v50_v59 = vld [vmem:[%s2951_s0 + $0x118] sm:$0xff] }
  0x2e   :  { %2091 = vmatprep.subr.bf16.mxu1 %v2300_v61  ;;  %1350 = vmatprep.mubr.bf16.mxu0 %v1819_v5  ;;  %v1825_v60 = vcombine.high %v50_v59, %v50_v59  ;;  %v2344_v61 = vld [vmem:[%s2950_s1 + $0x218] sm:$0xff]   ;;  %v2352_v5 = vld [vmem:[%s2950_s1 + $0x2c8] sm:$0xff]  }
  0x2f   :  { %1406 = vmatprep.mubr.bf16.mxu1 %v1821_v8  ;;  %v2355_v8 = vld [vmem:[%s2950_s1 + $0x240] sm:$0xff]  }
  0x30   :  { %2058 = vmatpush3.bf16.msra.mxu0 %v2301_v62  ;;  %v1824_v62 = vcombine.low %v50_v59, %v50_v59  ;;  %v2388_v59 = vld [vmem:[%s2950_s1 + $0x3c8] sm:$0xff]  }
  0x31   :  { %2092 = vmatpush3.bf16.msra.mxu1 %v2302_v63  ;;  %2059 = vmatprep.subr.bf16.mxu0 %v2303_v0  ;;  %v2345_v63 = vld [vmem:[%s2950_s1 + $0x298] sm:$0xff]   ;;  %v2347_v0 = vld [vmem:[%s2950_s1 + $0x250] sm:$0xff]  }
  0x32   :  { %2093 = vmatprep.subr.bf16.mxu1 %v2304_v1  ;;  %v2348_v1 = vld [vmem:[%s2950_s1 + $0x2d0] sm:$0xff]  }
  0x33   :  { %1351 = vmatmul.mubr.bf16.gmra.mxu0 %v1818_v6  ;;  %v2353_v6 = vld [vmem:[%s2950_s1 + $0x208] sm:$0xff]  }
  0x34   :  { %2060 = vmatpush3.bf16.msra.mxu0 %v2305_v2  ;;  %1407 = vmatmul.mubr.bf16.gmra.mxu1 %v1820_v10  ;;  %v2349_v2 = vld [vmem:[%s2950_s1 + $0x210] sm:$0xff]   ;;  %v2357_v10 = vld [vmem:[%s2950_s1 + $0x200] sm:$0xff]  }
  0x35   :  { %2094 = vmatpush3.bf16.msra.mxu1 %v2306_v3  ;;  %2061 = vmatprep.subr.bf16.mxu0 %v2310_v9  ;;  %v2350_v3 = vld [vmem:[%s2950_s1 + $0x290] sm:$0xff]   ;;  %v2356_v9 = vld [vmem:[%s2950_s1 + $0x2c0] sm:$0xff]  }
  0x36   :  { %2095 = vmatprep.subr.bf16.mxu1 %v2311_v11  ;;  %1446 = vmatprep.mubr.bf16.mxu0 %v1791_v25  ;;  %v2358_v11 = vld [vmem:[%s2950_s1 + $0x280] sm:$0xff]   ;;  %v2364_v25 = vld [vmem:[%s2950_s1 + $0x3f0] sm:$0xff]  }
  0x37   :  { %1502 = vmatprep.mubr.bf16.mxu1 %v1793_v29  ;;  %v43_v29 = vld [vmem:[%s2951_s0 + $0xe0] sm:$0xff] }
  0x38   :  { %2062 = vmatpush3.bf16.msra.mxu0 %v2313_v12  ;;  %v19_v12 = vld [vmem:[%s2951_s0 + $0x20] sm:$0xff] }
  0x39   :  { %2096 = vmatpush3.bf16.msra.mxu1 %v2314_v13  ;;  %2063 = vmatprep.subr.bf16.mxu0 %v2315_v14  ;;  %v27_v13 = vld [vmem:[%s2951_s0 + $0x60] sm:$0xff]  ;;  %v20_v14 = vld [vmem:[%s2951_s0 + $0x28] sm:$0xff] }
  0x3a   :  { %2097 = vmatprep.subr.bf16.mxu1 %v2316_v15  ;;  %v28_v15 = vld [vmem:[%s2951_s0 + $0x68] sm:$0xff] }
  0x3c   :  { %2064 = vmatpush3.bf16.msra.mxu0 %v2317_v16  ;;  %v1794_v16 = vcombine.low %v19_v12, %v27_v13 }
  0x3d   :  { %2098 = vmatpush3.bf16.msra.mxu1 %v2318_v17  ;;  %2065 = vmatprep.subr.bf16.mxu0 %v2319_v18  ;;  %v1795_v17 = vcombine.high %v19_v12, %v27_v13  ;;  %v1796_v18 = vcombine.low %v20_v14, %v28_v15  ;;  %v38_v13 = vld [vmem:[%s2951_s0 + $0xb8] sm:$0xff] }
  0x3e   :  { %2099 = vmatprep.subr.bf16.mxu1 %v2320_v19  ;;  %v1797_v19 = vcombine.high %v20_v14, %v28_v15  ;;  %v46_v14 = vld [vmem:[%s2951_s0 + $0xf8] sm:$0xff] }
  0x3f   :  { %v1817_v15 = vcombine.high %v38_v13, %v46_v14 }
  0x40   :  { %2066 = vmatpush3.bf16.msra.mxu0 %v2321_v20  ;;  %v2359_v20 = vld [vmem:[%s2950_s1 + $0x378] sm:$0xff]  }
  0x41   :  { %2100 = vmatpush3.bf16.msra.mxu1 %v2322_v21  ;;  %2119 = vmatprep.subr.bf16.mxu0 %v2323_v30  ;;  %v2360_v21 = vld [vmem:[%s2950_s1 + $0x3f8] sm:$0xff]  }
  0x42   :  { %2153 = vmatprep.subr.bf16.mxu1 %v2324_v31 }
  0x43   :  { %1447 = vmatmul.mubr.bf16.vlgmr.msra.gmra.mxu0 %v1790_v24  ;;  %v2363_v24 = vld [vmem:[%s2950_s1 + $0x370] sm:$0xff]  }
  0x44   :  { %1503 = vmatmul.mubr.bf16.vlgmr.msra.gmra.mxu1 %v1792_v28  ;;  %2120 = vmatpush3.bf16.msra.mxu0 %v2325_v32  ;;  %v35_v28 = vld [vmem:[%s2951_s0 + $0xa0] sm:$0xff]  ;;  %v2367_v32 = vld [vmem:[%s2950_s1 + $0x368] sm:$0xff]  }
  0x45   :  { %2154 = vmatpush3.bf16.msra.mxu1 %v2326_v33  ;;  %2121 = vmatprep.subr.bf16.mxu0 %v2327_v34  ;;  %v1811_v30 = vcombine.high %v35_v28, %v43_v29  ;;  %v1810_v31 = vcombine.low %v35_v28, %v43_v29  ;;  %v2368_v33 = vld [vmem:[%s2950_s1 + $0x3e8] sm:$0xff]  }
  0x46   :  { %2155 = vmatprep.subr.bf16.mxu1 %v2328_v35  ;;  %1454 = vmatprep.mubr.bf16.mxu0 %v1807_v40  ;;  %v36_v34 = vld [vmem:[%s2951_s0 + $0xa8] sm:$0xff]  ;;  %v2371_v40 = vld [vmem:[%s2950_s1 + $0x360] sm:$0xff]  }
  0x47   :  { %1510 = vmatprep.mubr.bf16.mxu1 %v1809_v46  ;;  %v44_v35 = vld [vmem:[%s2951_s0 + $0xe8] sm:$0xff]  ;;  %v1826_v46 = vcombine.low %v51_v44, %v51_v44 }
  0x48   :  { %2122 = vmatpush3.bf16.msra.mxu0 %v2329_v36  ;;  %v1813_v36 = vcombine.high %v36_v34, %v44_v35  ;;  %v1812_v38 = vcombine.low %v36_v34, %v44_v35 }
  0x49   :  { %2156 = vmatpush3.bf16.msra.mxu1 %v2330_v37  ;;  %2123 = vmatprep.subr.bf16.mxu0 %v2331_v42  ;;  %v2369_v37 = vld [vmem:[%s2950_s1 + $0x328] sm:$0xff]   ;;  %v2373_v42 = vld [vmem:[%s2950_s1 + $0x320] sm:$0xff]  }
  0x4a   :  { %2157 = vmatprep.subr.bf16.mxu1 %v2332_v43  ;;  %v2374_v43 = vld [vmem:[%s2950_s1 + $0x3a0] sm:$0xff]  }
  0x4b   :  { %1455 = vmatmul.mubr.bf16.gmra.mxu0 %v1806_v41  ;;  %v2372_v41 = vld [vmem:[%s2950_s1 + $0x3e0] sm:$0xff]  }
  0x4c   :  { %2124 = vmatpush3.bf16.msra.mxu0 %v2333_v47  ;;  %1511 = vmatmul.mubr.bf16.gmra.mxu1 %v1808_v48  ;;  %v2377_v47 = vld [vmem:[%s2950_s1 + $0x358] sm:$0xff]  }
  0x4d   :  { %2158 = vmatpush3.bf16.msra.mxu1 %v2334_v49  ;;  %2125 = vmatprep.subr.bf16.mxu0 %v2335_v50  ;;  %v2378_v48 = vld [vmem:[%s2950_s1 + $0x3d8] sm:$0xff]   ;;  %v52_v49 = vld [vmem:[%s2951_s0 + $0x128] sm:$0xff] }
  0x4e   :  { %2159 = vmatprep.subr.bf16.mxu1 %v2336_v51  ;;  %1462 = vmatprep.mubr.bf16.mxu0 %v1823_v55  ;;  %v1829_v50 = vcombine.high %v52_v49, %v52_v49  ;;  %v2380_v51 = vld [vmem:[%s2950_s1 + $0x318] sm:$0xff]   ;;  %v2384_v55 = vld [vmem:[%s2950_s1 + $0x3d0] sm:$0xff]  }
  0x4f   :  { %1518 = vmatprep.mubr.bf16.mxu1 %v1825_v60  ;;  %v2389_v60 = vld [vmem:[%s2950_s1 + $0x308] sm:$0xff]  }
  0x50   :  { %2126 = vmatpush3.bf16.msra.mxu0 %v2337_v52  ;;  %v1828_v52 = vcombine.low %v52_v49, %v52_v49 }
  0x51   :  { %2160 = vmatpush3.bf16.msra.mxu1 %v2338_v53  ;;  %2127 = vmatprep.subr.bf16.mxu0 %v2341_v57  ;;  %v2381_v53 = vld [vmem:[%s2950_s1 + $0x398] sm:$0xff]   ;;  %v2386_v57 = vld [vmem:[%s2950_s1 + $0x390] sm:$0xff]  }
  0x52   :  { %2161 = vmatprep.subr.bf16.mxu1 %v2342_v58  ;;  %v2387_v58 = vld [vmem:[%s2950_s1 + $0x348] sm:$0xff]  }
  0x53   :  { %1463 = vmatmul.mubr.bf16.gmra.mxu0 %v1822_v56  ;;  %v2385_v56 = vld [vmem:[%s2950_s1 + $0x310] sm:$0xff]  }
  0x54   :  { %2128 = vmatpush3.bf16.msra.mxu0 %v2344_v61  ;;  %1519 = vmatmul.mubr.bf16.gmra.mxu1 %v1824_v62  ;;  %v2390_v61 = vld [vmem:[%s2950_s1 + $0x388] sm:$0xff]   ;;  %v2391_v62 = vld [vmem:[%s2950_s1 + $0x340] sm:$0xff]  }
  0x55   :  { %2162 = vmatpush3.bf16.msra.mxu1 %v2345_v63  ;;  %2129 = vmatprep.subr.bf16.mxu0 %v2347_v0  ;;  %v2392_v63 = vld [vmem:[%s2950_s1 + $0x3c0] sm:$0xff]  }
  0x56   :  { %2163 = vmatprep.subr.bf16.mxu1 %v2348_v1  ;;  %1558 = vmatprep.mubr.bf16.mxu0 %v1795_v17  ;;  %v2393_v0 = vld [vmem:[%s2950_s1 + $0x300] sm:$0xff]   ;;  %v54_v17 = vld [vmem:[%s2951_s0 + $0x138] sm:$0xff] }
  0x57   :  { %1614 = vmatprep.mubr.bf16.mxu1 %v1797_v19  ;;  %v2394_v1 = vld [vmem:[%s2950_s1 + $0x380] sm:$0xff]   ;;  %v1816_v19 = vcombine.low %v38_v13, %v46_v14 }
  0x58   :  { %2130 = vmatpush3.bf16.msra.mxu0 %v2349_v2  ;;  %v21_v2 = vld [vmem:[%s2951_s0 + $0x30] sm:$0xff] }
  0x59   :  { %2164 = vmatpush3.bf16.msra.mxu1 %v2350_v3  ;;  %2131 = vmatprep.subr.bf16.mxu0 %v2351_v4  ;;  %v29_v3 = vld [vmem:[%s2951_s0 + $0x70] sm:$0xff]  ;;  %v22_v4 = vld [vmem:[%s2951_s0 + $0x38] sm:$0xff] }
  0x5a   :  { %2165 = vmatprep.subr.bf16.mxu1 %v2352_v5  ;;  %v1798_v5 = vcombine.low %v21_v2, %v29_v3 }
  0x5c   :  { %2132 = vmatpush3.bf16.msra.mxu0 %v2353_v6  ;;  %v1799_v6 = vcombine.high %v21_v2, %v29_v3 }
  0x5d   :  { %2166 = vmatpush3.bf16.msra.mxu1 %v2354_v7  ;;  %2133 = vmatprep.subr.bf16.mxu0 %v2355_v8  ;;  %v30_v7 = vld [vmem:[%s2951_s0 + $0x78] sm:$0xff]  ;;  %v37_v8 = vld [vmem:[%s2951_s0 + $0xb0] sm:$0xff] }
  0x5e   :  { %2167 = vmatprep.subr.bf16.mxu1 %v2356_v9  ;;  %v45_v9 = vld [vmem:[%s2951_s0 + $0xf0] sm:$0xff] }
  0x5f   :  { %v1815_v12 = vcombine.high %v37_v8, %v45_v9 }
  0x60   :  { %2134 = vmatpush3.bf16.msra.mxu0 %v2357_v10  ;;  %v1800_v10 = vcombine.low %v22_v4, %v30_v7 }
  0x61   :  { %2168 = vmatpush3.bf16.msra.mxu1 %v2358_v11  ;;  %2187 = vmatprep.subr.bf16.mxu0 %v2359_v20  ;;  %v1801_v11 = vcombine.high %v22_v4, %v30_v7 }
  0x62   :  { %2221 = vmatprep.subr.bf16.mxu1 %v2360_v21  ;;  %v1833_v21 = vcombine.high %v54_v17, %v54_v17 }
  0x63   :  { %1559 = vmatmul.mubr.bf16.vlgmr.msra.gmra.mxu0 %v1794_v16  ;;  %v53_v16 = vld [vmem:[%s2951_s0 + $0x130] sm:$0xff] }
  0x64   :  { %1615 = vmatmul.mubr.bf16.vlgmr.msra.gmra.mxu1 %v1796_v18  ;;  %2188 = vmatpush3.bf16.msra.mxu0 %v2361_v22  ;;  %v1814_v18 = vcombine.low %v37_v8, %v45_v9  ;;  %v1831_v20 = vcombine.high %v53_v16, %v53_v16  ;;  %v1830_v22 = vcombine.low %v53_v16, %v53_v16 }
  0x65   :  { %2222 = vmatpush3.bf16.msra.mxu1 %v2362_v23  ;;  %2189 = vmatprep.subr.bf16.mxu0 %v2363_v24  ;;  %v1832_v23 = vcombine.low %v54_v17, %v54_v17 }
  0x66   :  { %2223 = vmatprep.subr.bf16.mxu1 %v2364_v25  ;;  %1566 = vmatprep.mubr.bf16.mxu0 %v1811_v30 }
  0x67   :  { %1622 = vmatprep.mubr.bf16.mxu1 %v1813_v36 }
  0x68   :  { %2190 = vmatpush3.bf16.msra.mxu0 %v2365_v26  ;;  %v1785_v26 = vld [vmem:[%s2952_s2] ss:$0 sm:$0xff] }
  0x69   :  { %2224 = vmatpush3.bf16.msra.mxu1 %v2366_v27  ;;  %2191 = vmatprep.subr.bf16.mxu0 %v2367_v32 }
  0x6a   :  { %2225 = vmatprep.subr.bf16.mxu1 %v2368_v33 }
  0x6b   :  { %1567 = vmatmul.mubr.bf16.gmra.mxu0 %v1810_v31 }
  0x6c   :  { %2192 = vmatpush3.bf16.msra.mxu0 %v2369_v37  ;;  %1623 = vmatmul.mubr.bf16.gmra.mxu1 %v1812_v38 }
  0x6d   :  { %2226 = vmatpush3.bf16.msra.mxu1 %v2370_v39  ;;  %2193 = vmatprep.subr.bf16.mxu0 %v2371_v40 }
  0x6e   :  { %2227 = vmatprep.subr.bf16.mxu1 %v2372_v41  ;;  %1574 = vmatprep.mubr.bf16.mxu0 %v1827_v45 }
  0x6f   :  { %1630 = vmatprep.mubr.bf16.mxu1 %v1829_v50 }
  0x70   :  { %2194 = vmatpush3.bf16.msra.mxu0 %v2373_v42 }
  0x71   :  { %2228 = vmatpush3.bf16.msra.mxu1 %v2374_v43  ;;  %2195 = vmatprep.subr.bf16.mxu0 %v2377_v47 }
  0x72   :  { %2229 = vmatprep.subr.bf16.mxu1 %v2378_v48 }
  0x73   :  { %1575 = vmatmul.mubr.bf16.gmra.mxu0 %v1826_v46 }
  0x74   :  { %2196 = vmatpush3.bf16.msra.mxu0 %v2380_v51  ;;  %1631 = vmatmul.mubr.bf16.gmra.mxu1 %v1828_v52 }
  0x75   :  { %2230 = vmatpush3.bf16.msra.mxu1 %v2381_v53  ;;  %2197 = vmatprep.subr.bf16.mxu0 %v2383_v54 }
  0x76   :  { %2231 = vmatprep.subr.bf16.mxu1 %v2384_v55  ;;  %1670 = vmatprep.mubr.bf16.mxu0 %v1799_v6 }
  0x77   :  { %1726 = vmatprep.mubr.bf16.mxu1 %v1801_v11 }
  0x78   :  { %2198 = vmatpush3.bf16.msra.mxu0 %v2385_v56 }
  0x79   :  { %2232 = vmatpush3.bf16.msra.mxu1 %v2386_v57  ;;  %2199 = vmatprep.subr.bf16.mxu0 %v2387_v58 }
  0x7a   :  { %2233 = vmatprep.subr.bf16.mxu1 %v2388_v59 }
  0x7c   :  { %2200 = vmatpush3.bf16.msra.mxu0 %v2389_v60 }
  0x7d   :  { %2234 = vmatpush3.bf16.msra.mxu1 %v2390_v61  ;;  %2201 = vmatprep.subr.bf16.mxu0 %v2391_v62 }
  0x7e   :  { %2235 = vmatprep.subr.bf16.mxu1 %v2392_v63 }
  0x80   :  { %2202 = vmatpush3.bf16.msra.mxu0 %v2393_v0 }
  0x81   :  { %2236 = vmatpush3.bf16.msra.mxu1 %v2394_v1 }
  0x83   :  { %1671 = vmatmul.mubr.bf16.vlgmr.msra.gmra.mxu0 %v1798_v5 }
  0x84   :  { %1727 = vmatmul.mubr.bf16.vlgmr.msra.gmra.mxu1 %v1800_v10  ;;  %1678 = vmatprep.mubr.bf16.mxu0 %v1815_v12 }
  0x85   :  { %1734 = vmatprep.mubr.bf16.mxu1 %v1817_v15 }
  0x8b   :  { %1679 = vmatmul.mubr.bf16.gmra.mxu0 %v1814_v18 }
  0x8c   :  { %1735 = vmatmul.mubr.bf16.gmra.mxu1 %v1816_v19  ;;  %1686 = vmatprep.mubr.bf16.mxu0 %v1831_v20 }
  0x8d   :  { %1742 = vmatprep.mubr.bf16.mxu1 %v1833_v21 }
  0x93   :  { %1687 = vmatmul.mubr.bf16.gmra.mxu0 %v1830_v22 }
  0x94   :  { %1743 = vmatmul.mubr.bf16.gmra.mxu1 %v1832_v23 }
  0xe3   :  { %v1999_v24 = vpop.f32.mrf.mxu0 }
  0xe4   :  { %v2033_v25 = vpop.f32.mrf.mxu1 }
  0xe5   :  { %v2000_v27 = vpop.f32.mrf.mxu0 }
  0xe6   :  { %v2001_v28 = vadd.f32 %v2000_v27, %v1999_v24  ;;  %v2034_v29 = vpop.f32.mrf.mxu1 }
  0xe7   :  { %v2035_v30 = vadd.f32 %v2034_v29, %v2033_v25  ;;  %v2002_v31 = vpop.f32.mrf.mxu0 }
  0xe8   :  { %v1337_v32 = vadd.f32 %v2001_v28, %v1785_v26  ;;  %v2036_v33 = vpop.f32.mrf.mxu1 }
  0xe9   :  { %v2003_v34 = vpop.f32.mrf.mxu0 }
  0xea   :  { %v1393_v35 = vadd.f32 %v2035_v30, %v1337_v32  ;;  %v2004_v36 = vadd.f32 %v2003_v34, %v2002_v31  ;;  %v2037_v37 = vpop.f32.mrf.mxu1 }
  0xeb   :  { %v2038_v38 = vadd.f32 %v2037_v37, %v2036_v33  ;;  %v2005_v41 = vpop.f32.mrf.mxu0 }
  0xec   :  { %v1340_v39 = vadd.f32 %v2004_v36, %v1785_v26  ;;  %v2039_v43 = vpop.f32.mrf.mxu1 }
  0xed   :  { %v2006_v42 = vpop.f32.mrf.mxu0 }
  0xee   :  { %v2926_v40 = vadd.f32 %v2038_v38, %v1340_v39  ;;  %v2007_v44 = vadd.f32 %v2006_v42, %v2005_v41  ;;  %v2040_v46 = vpop.f32.mrf.mxu1 }
  0xef   :  { %v2008_v45 = vpop.f32.mrf.mxu0  ;;  %v2041_v48 = vadd.f32 %v2040_v46, %v2039_v43 }
  0xf0   :  { %v1345_v47 = vadd.f32 %v2007_v44, %v1785_v26  ;;  %v2042_v50 = vpop.f32.mrf.mxu1 }
  0xf1   :  { %v2009_v49 = vpop.f32.mrf.mxu0 }
  0xf2   :  { %v1401_v51 = vadd.f32 %v2041_v48, %v1345_v47  ;;  %v2010_v52 = vadd.f32 %v2009_v49, %v2008_v45  ;;  %v2043_v53 = vpop.f32.mrf.mxu1 }
  0xf3   :  { %v2011_v55 = vpop.f32.mrf.mxu0  ;;  %v2044_v56 = vadd.f32 %v2043_v53, %v2042_v50 }
  0xf4   :  { %v1348_v54 = vadd.f32 %v2010_v52, %v1785_v26  ;;  %v2045_v59 = vpop.f32.mrf.mxu1 }
  0xf5   :  { %v2012_v58 = vpop.f32.mrf.mxu0 }
  0xf6   :  { %v2928_v57 = vadd.f32 %v2044_v56, %v1348_v54  ;;  %v2013_v60 = vadd.f32 %v2012_v58, %v2011_v55  ;;  %v2046_v62 = vpop.f32.mrf.mxu1 }
  0xf7   :  { %v2014_v61 = vpop.f32.mrf.mxu0  ;;  %v2047_v0 = vadd.f32 %v2046_v62, %v2045_v59 }
  0xf8   :  { %v1353_v63 = vadd.f32 %v2013_v60, %v1785_v26  ;;  %v2048_v2 = vpop.f32.mrf.mxu1 }
  0xf9   :  { %v2015_v1 = vpop.f32.mrf.mxu0 }
  0xfa   :  { %v2930_v3 = vadd.f32 %v2047_v0, %v1353_v63  ;;  %v2049_v4 = vpop.f32.mrf.mxu1 }
 0x103   :  { %v2067_v5 = vpop.f32.mrf.mxu0 }
 0x104   :  { %v2101_v6 = vpop.f32.mrf.mxu1 }
 0x105   :  { %v2068_v7 = vpop.f32.mrf.mxu0 }
 0x106   :  { %v2069_v8 = vadd.f32 %v2068_v7, %v2067_v5  ;;  %v2102_v9 = vpop.f32.mrf.mxu1 }
 0x107   :  { %v2103_v10 = vadd.f32 %v2102_v9, %v2101_v6  ;;  %v2070_v11 = vpop.f32.mrf.mxu0 }
 0x108   :  { %v1449_v12 = vadd.f32 %v2069_v8, %v1393_v35  ;;  %v2104_v15 = vpop.f32.mrf.mxu1 }
 0x109   :  { %v2071_v13 = vpop.f32.mrf.mxu0 }
 0x10a   :  { %v1505_v14 = vadd.f32 %v2103_v10, %v1449_v12  ;;  %v2105_v17 = vpop.f32.mrf.mxu1  ;;  %v2072_v62 = vadd.f32 %v2071_v13, %v2070_v11 }
 0x10b   :  { %v2073_v16 = vpop.f32.mrf.mxu0  ;;  %v2106_v2 = vadd.f32 %v2105_v17, %v2104_v15 }
 0x10c   :  { %v2107_v20 = vpop.f32.mrf.mxu1  ;;  %v1452_v1 = vadd.f32 %v2072_v62, %v2926_v40 }
 0x10d   :  { %v2074_v18 = vpop.f32.mrf.mxu0 }
 0x10e   :  { %v2075_v19 = vadd.f32 %v2074_v18, %v2073_v16  ;;  %v2108_v23 = vpop.f32.mrf.mxu1  ;;  %v1508_v7 = vadd.f32 %v2106_v2, %v1452_v1 }
 0x10f   :  { %v2076_v21 = vpop.f32.mrf.mxu0  ;;  %v2109_v24 = vadd.f32 %v2108_v23, %v2107_v20 }
 0x110   :  { %v1457_v22 = vadd.f32 %v2075_v19, %v1401_v51  ;;  %v2110_v26 = vpop.f32.mrf.mxu1 }
 0x111   :  { %v2077_v25 = vpop.f32.mrf.mxu0 }
 0x112   :  { %v1513_v27 = vadd.f32 %v2109_v24, %v1457_v22  ;;  %v2111_v29 = vpop.f32.mrf.mxu1  ;;  %v2078_v8 = vadd.f32 %v2077_v25, %v2076_v21 }
 0x113   :  { %v2079_v28 = vpop.f32.mrf.mxu0  ;;  %v2112_v13 = vadd.f32 %v2111_v29, %v2110_v26 }
 0x114   :  { %v2932_v31 = vpop.f32.mrf.mxu1  ;;  %v1460_v11 = vadd.f32 %v2078_v8, %v2928_v57 }
 0x115   :  { %v2080_v30 = vpop.f32.mrf.mxu0 }
 0x116   :  { %v2114_v33 = vpop.f32.mrf.mxu1  ;;  %v2081_v23 = vadd.f32 %v2080_v30, %v2079_v28 }
 0x117   :  { %v2082_v32 = vpop.f32.mrf.mxu0 }
 0x118   :  { %v2116_v35 = vpop.f32.mrf.mxu1 }
 0x119   :  { %v2083_v34 = vpop.f32.mrf.mxu0 }
 0x11a   :  { %v2117_v36 = vpop.f32.mrf.mxu1 }
 0x123   :  { %v2135_v37 = vpop.f32.mrf.mxu0 }
 0x124   :  { %v2169_v38 = vpop.f32.mrf.mxu1 }
 0x125   :  { %v2136_v39 = vpop.f32.mrf.mxu0 }
 0x126   :  { %v2170_v41 = vpop.f32.mrf.mxu1  ;;  %v2137_v0 = vadd.f32 %v2136_v39, %v2135_v37  ;;  %v1465_v39 = vadd.f32 %v2081_v23, %v2930_v3 }
 0x127   :  { %v2138_v42 = vpop.f32.mrf.mxu0  ;;  %v2171_v6 = vadd.f32 %v2170_v41, %v2169_v38  ;;  %v1516_v38 = vadd.f32 %v2112_v13, %v1460_v11  ;;  %v2115_v41 = vadd.f32 %v2114_v33, %v2932_v31 }
 0x128   :  { %v2172_v44 = vpop.f32.mrf.mxu1  ;;  %v1561_v5 = vadd.f32 %v2137_v0, %v1505_v14 }
 0x129   :  { %v2139_v43 = vpop.f32.mrf.mxu0 }
 0x12a   :  { %v2173_v46 = vpop.f32.mrf.mxu1  ;;  %v2140_v4 = vadd.f32 %v2139_v43, %v2138_v42  ;;  %v1617_v18 = vadd.f32 %v2171_v6, %v1561_v5 }
 0x12b   :  { %v2141_v45 = vpop.f32.mrf.mxu0  ;;  %v2174_v24 = vadd.f32 %v2173_v46, %v2172_v44 }
 0x12c   :  { %v2175_v48 = vpop.f32.mrf.mxu1  ;;  %v1564_v12 = vadd.f32 %v2140_v4, %v1508_v7 }
 0x12d   :  { %v2142_v47 = vpop.f32.mrf.mxu0 }
 0x12e   :  { %v2176_v50 = vpop.f32.mrf.mxu1  ;;  %v2143_v19 = vadd.f32 %v2142_v47, %v2141_v45  ;;  %v1620_v14 = vadd.f32 %v2174_v24, %v1564_v12 }
 0x12f   :  { %v2144_v49 = vpop.f32.mrf.mxu0  ;;  %v2177_v25 = vadd.f32 %v2176_v50, %v2175_v48 }
 0x130   :  { %v2178_v52 = vpop.f32.mrf.mxu1  ;;  %v1569_v21 = vadd.f32 %v2143_v19, %v1513_v27 }
 0x131   :  { %v2145_v51 = vpop.f32.mrf.mxu0 }
 0x132   :  { %v2179_v54 = vpop.f32.mrf.mxu1  ;;  %v2146_v32 = vadd.f32 %v2145_v51, %v2144_v49  ;;  %v1625_v46 = vadd.f32 %v2177_v25, %v1569_v21  ;;  %v1521_v49 = vadd.f32 %v2115_v41, %v1465_v39 }
 0x133   :  { %v2147_v53 = vpop.f32.mrf.mxu0  ;;  %v2180_v43 = vadd.f32 %v2179_v54, %v2178_v52 }
 0x134   :  { %v2934_v56 = vpop.f32.mrf.mxu1  ;;  %v1572_v42 = vadd.f32 %v2146_v32, %v1516_v38 }
 0x135   :  { %v2148_v55 = vpop.f32.mrf.mxu0 }
 0x136   :  { %v2182_v59 = vpop.f32.mrf.mxu1  ;;  %v2149_v44 = vadd.f32 %v2148_v55, %v2147_v53  ;;  %v1628_v31 = vadd.f32 %v2180_v43, %v1572_v42 }
 0x137   :  { %v2150_v58 = vpop.f32.mrf.mxu0  ;;  %v2183_v62 = vadd.f32 %v2182_v59, %v2934_v56 }
 0x138   :  { %v2184_v61 = vpop.f32.mrf.mxu1  ;;  %v1577_v33 = vadd.f32 %v2149_v44, %v1521_v49 }
 0x139   :  { %v2151_v60 = vpop.f32.mrf.mxu0 }
 0x13a   :  { %v2185_v63 = vpop.f32.mrf.mxu1  ;;  %v1633_v6 = vadd.f32 %v2183_v62, %v1577_v33 }
 0x143   :  { %v2203_v9 = vpop.f32.mrf.mxu0 }
 0x144   :  { %v2237_v10 = vpop.f32.mrf.mxu1 }
 0x145   :  { %v2204_v16 = vpop.f32.mrf.mxu0 }
 0x146   :  { %v2205_v20 = vadd.f32 %v2204_v16, %v2203_v9  ;;  %v2238_v22 = vpop.f32.mrf.mxu1 }
 0x147   :  { %v2206_v40 = vpop.f32.mrf.mxu0  ;;  %v2239_v35 = vadd.f32 %v2238_v22, %v2237_v10 }
 0x148   :  { %v1673_v15 = vadd.f32 %v2205_v20, %v1617_v18  ;;  %v2240_v17 = vpop.f32.mrf.mxu1 }
 0x149   :  { %v2207_v34 = vpop.f32.mrf.mxu0 }
 0x14a   :  { %v2208_v36 = vadd.f32 %v2207_v34, %v2206_v40  ;;  %v2241_v37 = vpop.f32.mrf.mxu1  ;;  %v1729_v26 = vadd.f32 %v2239_v35, %v1673_v15 }
 0x14b   :  { %v2209_v57 = vpop.f32.mrf.mxu0  ;;  %v2242_v29 = vadd.f32 %v2241_v37, %v2240_v17 }
 0x14c   :  { %v1676_v28 = vadd.f32 %v2208_v36, %v1620_v14  ;;  %v2243_v30 = vpop.f32.mrf.mxu1  ;;  %v1750_v51 = vmax.f32 %v1729_v26, 0.0 }
 0x14d   :  { %v2210_v45 = vpop.f32.mrf.mxu0 }
 0x14e   :  { %v1732_v27 = vadd.f32 %v2242_v29, %v1676_v28  ;;  %v2211_v47 = vadd.f32 %v2210_v45, %v2209_v57  ;;  %v2244_v48 = vpop.f32.mrf.mxu1 }
 0x14f   :  { %v2212_v50 = vpop.f32.mrf.mxu0  ;;  %v2245_v0 = vadd.f32 %v2244_v48, %v2243_v30 }
 0x150   :  { %v1751_v58 = vmax.f32 %v1732_v27, 0.0  ;;  %v1681_v3 = vadd.f32 %v2211_v47, %v1625_v46  ;;  %v2246_v60 = vpop.f32.mrf.mxu1 }
 0x151   :  { %v2213_v61 = vpop.f32.mrf.mxu0 }
 0x152   :  { %v1975_v63 = vpack.c.bf16 %v1751_v58, %v1750_v51  ;;  %v2214_v52 = vadd.f32 %v2213_v61, %v2212_v50  ;;  %v2247_v53 = vpop.f32.mrf.mxu1  ;;  %v1737_v55 = vadd.f32 %v2245_v0, %v1681_v3 }
 0x153   :  { %v2215_v54 = vpop.f32.mrf.mxu0  ;;  %v2248_v2 = vadd.f32 %v2247_v53, %v2246_v60 }
 0x154   :  { %1976 = vst [vmem:[%s2953_s3] sm:$0xff] %v1975_v63   ;;  %v1684_v1 = vadd.f32 %v2214_v52, %v1628_v31  ;;  %v2249_v4 = vpop.f32.mrf.mxu1  ;;  %v1752_v56 = vmax.f32 %v1737_v55, 0.0 }
 0x155   :  { %v2216_v5 = vpop.f32.mrf.mxu0 }
 0x156   :  { %v1740_v7 = vadd.f32 %v2248_v2, %v1684_v1  ;;  %v2217_v8 = vadd.f32 %v2216_v5, %v2215_v54  ;;  %v2250_v9 = vpop.f32.mrf.mxu1 }
 0x157   :  { %v2218_v10 = vpop.f32.mrf.mxu0  ;;  %v2251_v16 = vadd.f32 %v2250_v9, %v2249_v4 }
 0x158   :  { %v1753_v59 = vmax.f32 %v1740_v7, 0.0  ;;  %v1689_v12 = vadd.f32 %v2217_v8, %v1633_v6  ;;  %v2252_v18 = vpop.f32.mrf.mxu1 }
 0x159   :  { %v2219_v19 = vpop.f32.mrf.mxu0 }
 0x15a   :  { %v1980_v20 = vpack.c.bf16 %v1753_v59, %v1752_v56  ;;  %v1745_v22 = vadd.f32 %v2251_v16, %v1689_v12  ;;  %v2253_v11 = vpop.f32.mrf.mxu1 }
 0x15c   :  { %1982 = vst [vmem:[%s2953_s3 + $0x8] sm:$0xff] %v1980_v20   ;;  %v1754_v13 = vmax.f32 %v1745_v22, 0.0 }
 0x15e   :  { %v1971_v23 = vpack.c.bf16 %v1754_v13, %v1754_v13 }
 0x160   :  { %1780 = vst [vmem:[%s2953_s3 + $0x10] sm:$0xf] %v1971_v23 }

// kernel: dqn_forward.5
= control target key start
LH: loop header
LB: loop body
LE: loop exit
PB: predicated region body
PF: predicated region fallthrough
CT: control target
= control target key end

     0   :  { %v6680_v22 = vmov 1966171168   ;;  %v186_v24 = vlaneseq  ;;  %vm6682_vm0 = vmmov 0   ;;  %vm1280_vm1 = vcmask 523264   ;;  %s9189_s1 = inlined_call_operand.vmem [shape: bf16[1152,64], index: 1, kind: input, shape index: {}]   ;;  %s9190_s0 = inlined_call_operand.vmem [shape: bf16[6,2,1152], index: 0, kind: input, shape index: {}]   ;;  %s9191_s3 = inlined_call_operand.vmem [shape: bf16[6,64,512], index: 3, kind: input, shape index: {}]   ;;  %s9192_s2 = inlined_call_operand.vmem [shape: f32[1,64], index: 2, kind: input, shape index: {}]   ;;  %s9193_s5 = inlined_call_operand.vmem [shape: bf16[512,768], index: 5, kind: input, shape index: {}]   ;;  %s9194_s4 = inlined_call_operand.vmem [shape: f32[1,512], index: 4, kind: input, shape index: {}]   ;;  %s9195_s6 = inlined_call_operand.vmem [shape: f32[1,768], index: 6, kind: input, shape index: {}]   ;;  %s9196_s7 = inlined_call_operand.vmem [shape: f32[2,768], index: 7, kind: output, shape index: {}]  }
   0x1   :  { %v6728_v0 = vld [vmem:[%s9189_s1 + $0x78] sm:$0xff]   ;;  %v6751_v4 = vld [vmem:[%s9189_s1 + $0x70] sm:$0xff]   ;;  %v6775_v8 = vld [vmem:[%s9189_s1 + $0x68] sm:$0xff]   ;;  %v184_v23 = vunpack.c.l.s4 %v6680_v22 }
   0x2   :  { %v6733_v1 = vld [vmem:[%s9189_s1 + $0xf8] sm:$0xff]   ;;  %5364 = vmatprep.subr.bf16.mxu0 %v6728_v0  ;;  %v6757_v5 = vld [vmem:[%s9189_s1 + $0xf0] sm:$0xff]   ;;  %v6781_v9 = vld [vmem:[%s9189_s1 + $0xe8] sm:$0xff]   ;;  %v6879_v30 = vshrl.u32 %v186_v24, 7 }
   0x3   :  { %v6739_v2 = vld [vmem:[%s9189_s1 + $0x38] sm:$0xff]   ;;  %5386 = vmatprep.subr.bf16.mxu1 %v6733_v1  ;;  %v6763_v6 = vld [vmem:[%s9189_s1 + $0x30] sm:$0xff]   ;;  %v6787_v10 = vld [vmem:[%s9189_s1 + $0x28] sm:$0xff]   ;;  %v185_v29 = vunpack.c.0.s8 %v184_v23 }
   0x4   :  { %v6745_v3 = vld [vmem:[%s9189_s1 + $0xb8] sm:$0xff]   ;;  %5365 = vmatpush3.bf16.msra.mxu0 %v6739_v2  ;;  %v6769_v7 = vld [vmem:[%s9189_s1 + $0xb0] sm:$0xff]   ;;  %v6793_v11 = vld [vmem:[%s9189_s1 + $0xa8] sm:$0xff]   ;;  %9290 = vst [vmem:[#allocation2_spill] sm:$0xff] %v6879_v30 }
   0x5   :  { %5387 = vmatpush3.bf16.msra.mxu1 %v6745_v3  ;;  %5366 = vmatprep.subr.bf16.mxu0 %v6751_v4  ;;  %v6799_v12 = vld [vmem:[%s9189_s1 + $0x60] sm:$0xff]   ;;  %v6823_v16 = vld [vmem:[%s9189_s1 + $0x58] sm:$0xff]   ;;  %v6847_v20 = vld [vmem:[%s9189_s1 + $0x50] sm:$0xff]   ;;  %v6906_v35 = vsub.s32 %v185_v29, %v6879_v30 }
   0x6   :  { %5388 = vmatprep.subr.bf16.mxu1 %v6757_v5  ;;  %v6805_v13 = vld [vmem:[%s9189_s1 + $0xe0] sm:$0xff]   ;;  %v6829_v17 = vld [vmem:[%s9189_s1 + $0xd8] sm:$0xff]   ;;  %v6853_v21 = vld [vmem:[%s9189_s1 + $0xd0] sm:$0xff]  }
   0x7   :  { %v6811_v14 = vld [vmem:[%s9189_s1 + $0x20] sm:$0xff]   ;;  %v6835_v18 = vld [vmem:[%s9189_s1 + $0x18] sm:$0xff]   ;;  %v6859_v25 = vld [vmem:[%s9189_s1 + $0x10] sm:$0xff]  }
   0x8   :  { %5367 = vmatpush3.bf16.msra.mxu0 %v6763_v6  ;;  %v6817_v15 = vld [vmem:[%s9189_s1 + $0xa0] sm:$0xff]   ;;  %v6841_v19 = vld [vmem:[%s9189_s1 + $0x98] sm:$0xff]   ;;  %v6865_v26 = vld [vmem:[%s9189_s1 + $0x90] sm:$0xff]  }
   0x9   :  { %5389 = vmatpush3.bf16.msra.mxu1 %v6769_v7  ;;  %5368 = vmatprep.subr.bf16.mxu0 %v6775_v8  ;;  %v6871_v27 = vld [vmem:[%s9189_s1 + $0x48] sm:$0xff]   ;;  %v6897_v33 = vld [vmem:[%s9189_s1 + $0x40] sm:$0xff]   ;;  %v6929_v41 = vld [vmem:[%s9189_s1 + $0x178] sm:$0xff]  }
   0xa   :  { %5390 = vmatprep.subr.bf16.mxu1 %v6781_v9  ;;  %v6877_v28 = vld [vmem:[%s9189_s1 + $0xc8] sm:$0xff]   ;;  %v6903_v34 = vld [vmem:[%s9189_s1 + $0xc0] sm:$0xff]   ;;  %v6934_v42 = vld [vmem:[%s9189_s1 + $0x1f8] sm:$0xff]  }
   0xb   :  { %v6885_v31 = vld [vmem:[%s9189_s1 + $0x8] sm:$0xff]   ;;  %v6912_v36 = vld [vmem:[%s9189_s1] sm:$0xff]   ;;  %v6946_v47 = vld [vmem:[%s9189_s1 + $0x138] sm:$0xff]  }
   0xc   :  { %5369 = vmatpush3.bf16.msra.mxu0 %v6787_v10  ;;  %v6891_v32 = vld [vmem:[%s9189_s1 + $0x88] sm:$0xff]   ;;  %v6918_v37 = vld [vmem:[%s9189_s1 + $0x80] sm:$0xff]   ;;  %v6953_v50 = vld [vmem:[%s9189_s1 + $0x170] sm:$0xff]  }
   0xd   :  { %5391 = vmatpush3.bf16.msra.mxu1 %v6793_v11  ;;  %5370 = vmatprep.subr.bf16.mxu0 %v6799_v12  ;;  %v27_v38 = vld [vmem:[%s9190_s0] sm:$0xff]  ;;  %v6958_v52 = vld [vmem:[%s9189_s1 + $0x1b8] sm:$0xff]   ;;  %v6964_v54 = vld [vmem:[%s9189_s1 + $0x1f0] sm:$0xff]  }
   0xe   :  { %5392 = vmatprep.subr.bf16.mxu1 %v6805_v13  ;;  %v182_v39 = vcombine.high %v27_v38, %v27_v38  ;;  %v189_v40 = vrot.slane %v27_v38, %v6906_v35  ;;  %v6970_v55 = vld [vmem:[%s9189_s1 + $0x130] sm:$0xff]   ;;  %v6976_v57 = vld [vmem:[%s9189_s1 + $0x168] sm:$0xff]   ;;  %v7000_v61 = vld [vmem:[%s9189_s1 + $0x160] sm:$0xff]  }
   0xf   :  { %v6982_v58 = vld [vmem:[%s9189_s1 + $0x1b0] sm:$0xff]   ;;  %v6988_v59 = vld [vmem:[%s9189_s1 + $0x1e8] sm:$0xff]   ;;  %v7012_v63 = vld [vmem:[%s9189_s1 + $0x1e0] sm:$0xff]  }
  0x10   :  { %5371 = vmatpush3.bf16.msra.mxu0 %v6811_v14  ;;  %v197_v43 = vcombine.high %v189_v40, %v189_v40  ;;  %v205_v44 = vrot.slane %v189_v40, %v6906_v35  ;;  %v6939_v45 = vrot.slane %v182_v39, %v6906_v35  ;;  %v6994_v60 = vld [vmem:[%s9189_s1 + $0x128] sm:$0xff]   ;;  %v7018_v22 = vld [vmem:[%s9189_s1 + $0x120] sm:$0xff]   ;;  %v7024_v23 = vld [vmem:[%s9189_s1 + $0x158] sm:$0xff]  }
  0x11   :  { %5393 = vmatpush3.bf16.msra.mxu1 %v6817_v15  ;;  %5372 = vmatprep.subr.bf16.mxu0 %v6823_v16  ;;  %v7006_v62 = vld [vmem:[%s9189_s1 + $0x1a8] sm:$0xff]   ;;  %v7030_v24 = vld [vmem:[%s9189_s1 + $0x1a0] sm:$0xff]   ;;  %v7036_v29 = vld [vmem:[%s9189_s1 + $0x1d8] sm:$0xff]  }
  0x12   :  { %5394 = vmatprep.subr.bf16.mxu1 %v6829_v17  ;;  %v219_v46 = vrot.slane %v197_v43, %v6906_v35  ;;  %v198_v48 = vcombine.high %v6939_v45, %v6939_v45  ;;  %v227_v49 = vcombine.high %v205_v44, %v205_v44  ;;  %9291 = vst [vmem:[#allocation3_spill] sm:$0xff] %v7030_v24  ;;  %9292 = vst [vmem:[#allocation4_spill] sm:$0xff] %v7036_v29  ;;  %v7042_v38 = vld [vmem:[%s9189_s1 + $0x118] sm:$0xff]   ;;  %v7048_v39 = vld [vmem:[%s9189_s1 + $0x150] sm:$0xff]  }
  0x13   :  { %v7054_v40 = vld [vmem:[%s9189_s1 + $0x198] sm:$0xff]   ;;  %v7060_v43 = vld [vmem:[%s9189_s1 + $0x1d0] sm:$0xff]   ;;  %v7108_v30 = vld [vmem:[%s9189_s1 + $0x1c0] sm:$0xff]  }
  0x14   :  { %5373 = vmatpush3.bf16.msra.mxu0 %v6835_v18  ;;  %718 = vmatprep.mubr.bf16.mxu0 %v219_v46  ;;  %v229_v51 = vcombine.high %v219_v46, %v219_v46  ;;  %v226_v53 = vrot.slane %v198_v48, %v6906_v35  ;;  %9293 = vst [vmem:[#allocation5_spill] sm:$0xff] %v7054_v40  ;;  %9294 = vst [vmem:[#allocation6_spill] sm:$0xff] %v7060_v43  ;;  %v7072_v46 = vld [vmem:[%s9189_s1 + $0x148] sm:$0xff]   ;;  %v7078_v48 = vld [vmem:[%s9189_s1 + $0x190] sm:$0xff]  }
  0x15   :  { %5395 = vmatpush3.bf16.msra.mxu1 %v6841_v19  ;;  %5374 = vmatprep.subr.bf16.mxu0 %v6847_v20  ;;  %9295 = vst [vmem:[#allocation7_spill] sm:$0xff] %v7078_v48  ;;  %9298 = vst [vmem:[#allocation10_spill] sm:$0xff] %v7108_v30 }
  0x16   :  { %5396 = vmatprep.subr.bf16.mxu1 %v6853_v21  ;;  %758 = vmatprep.mubr.bf16.mxu1 %v229_v51  ;;  %v230_v56 = vcombine.high %v226_v53, %v226_v53  ;;  %v7090_v51 = vld [vmem:[%s9189_s1 + $0x108] sm:$0xff]  }
  0x18   :  { %5375 = vmatpush3.bf16.msra.mxu0 %v6859_v25 }
  0x19   :  { %5397 = vmatpush3.bf16.msra.mxu1 %v6865_v26  ;;  %5376 = vmatprep.subr.bf16.mxu0 %v6871_v27 }
  0x1a   :  { %5398 = vmatprep.subr.bf16.mxu1 %v6877_v28 }
  0x1c   :  { %5377 = vmatpush3.bf16.msra.mxu0 %v6885_v31 }
  0x1d   :  { %5399 = vmatpush3.bf16.msra.mxu1 %v6891_v32  ;;  %5378 = vmatprep.subr.bf16.mxu0 %v6897_v33 }
  0x1e   :  { %5400 = vmatprep.subr.bf16.mxu1 %v6903_v34 }
  0x20   :  { %5379 = vmatpush3.bf16.msra.mxu0 %v6912_v36 }
  0x21   :  { %5401 = vmatpush3.bf16.msra.mxu1 %v6918_v37  ;;  %5408 = vmatprep.subr.bf16.mxu0 %v6929_v41 }
  0x22   :  { %5430 = vmatprep.subr.bf16.mxu1 %v6934_v42 }
  0x23   :  { %719 = vmatmul.mubr.bf16.vlgmr.msra.gmra.mxu0 %v205_v44  ;;  %v7066_v44 = vld [vmem:[%s9189_s1 + $0x110] sm:$0xff]  }
  0x24   :  { %5409 = vmatpush3.bf16.msra.mxu0 %v6946_v47  ;;  %759 = vmatmul.mubr.bf16.vlgmr.msra.gmra.mxu1 %v227_v49  ;;  %v7084_v49 = vld [vmem:[%s9189_s1 + $0x1c8] sm:$0xff]  }
  0x25   :  { %5410 = vmatprep.subr.bf16.mxu0 %v6953_v50  ;;  %5431 = vmatpush3.bf16.msra.mxu1 %v6958_v52  ;;  %9296 = vst [vmem:[#allocation8_spill] sm:$0xff] %v7084_v49 }
  0x26   :  { %798 = vmatprep.mubr.bf16.mxu0 %v226_v53  ;;  %5432 = vmatprep.subr.bf16.mxu1 %v6964_v54  ;;  %v7096_v53 = vld [vmem:[%s9189_s1 + $0x140] sm:$0xff]  }
  0x27   :  { %838 = vmatprep.mubr.bf16.mxu1 %v230_v56  ;;  %v7102_v56 = vld [vmem:[%s9189_s1 + $0x188] sm:$0xff]  }
  0x28   :  { %5411 = vmatpush3.bf16.msra.mxu0 %v6970_v55  ;;  %9297 = vst [vmem:[#allocation9_spill] sm:$0xff] %v7102_v56 }
  0x29   :  { %5412 = vmatprep.subr.bf16.mxu0 %v6976_v57  ;;  %5433 = vmatpush3.bf16.msra.mxu1 %v6982_v58 }
  0x2a   :  { %5434 = vmatprep.subr.bf16.mxu1 %v6988_v59 }
  0x2c   :  { %5413 = vmatpush3.bf16.msra.mxu0 %v6994_v60 }
  0x2d   :  { %5414 = vmatprep.subr.bf16.mxu0 %v7000_v61  ;;  %5435 = vmatpush3.bf16.msra.mxu1 %v7006_v62 }
  0x2e   :  { %5436 = vmatprep.subr.bf16.mxu1 %v7012_v63 }
  0x30   :  { %5415 = vmatpush3.bf16.msra.mxu0 %v7018_v22 }
  0x31   :  { %5416 = vmatprep.subr.bf16.mxu0 %v7024_v23  ;;  %5437 = vmatpush3.bf16.msra.mxu1 %v7030_v24 }
  0x32   :  { %5438 = vmatprep.subr.bf16.mxu1 %v7036_v29  ;;  %v9217_v29 = vmov 0.0  }
  0x34   :  { %5417 = vmatpush3.bf16.msra.mxu0 %v7042_v38 }
  0x35   :  { %5418 = vmatprep.subr.bf16.mxu0 %v7048_v39  ;;  %5439 = vmatpush3.bf16.msra.mxu1 %v7054_v40  ;;  %v7130_v40 = vld [vmem:[%s9189_s1 + $0x238] sm:$0xff]  }
  0x36   :  { %5440 = vmatprep.subr.bf16.mxu1 %v7060_v43  ;;  %v7114_v43 = vld [vmem:[%s9189_s1 + $0x100] sm:$0xff]  }
  0x38   :  { %5419 = vmatpush3.bf16.msra.mxu0 %v7066_v44 }
  0x39   :  { %5420 = vmatprep.subr.bf16.mxu0 %v7072_v46  ;;  %5441 = vmatpush3.bf16.msra.mxu1 %v7078_v48  ;;  %v212_v48 = vrot.slane %v6939_v45, %v6906_v35 }
  0x3a   :  { %5442 = vmatprep.subr.bf16.mxu1 %v7084_v49  ;;  %v7123_v49 = vld [vmem:[%s9189_s1 + $0x180] sm:$0xff]  }
  0x3b   :  { %9299 = vst [vmem:[#allocation11_spill] sm:$0xff] %v7123_v49  ;;  %v228_v45 = vcombine.high %v212_v48, %v212_v48 }
  0x3c   :  { %5421 = vmatpush3.bf16.msra.mxu0 %v7090_v51 }
  0x3d   :  { %5422 = vmatprep.subr.bf16.mxu0 %v7096_v53  ;;  %5443 = vmatpush3.bf16.msra.mxu1 %v7102_v56  ;;  %v7142_v56 = vld [vmem:[%s9189_s1 + $0x230] sm:$0xff]  }
  0x3e   :  { %5444 = vmatprep.subr.bf16.mxu1 %v7108_v30  ;;  %v4968_v30 = vld [vmem:[%s9190_s0 + $0x9] sm:$0xff] }
  0x40   :  { %5423 = vmatpush3.bf16.msra.mxu0 %v7114_v43 }
  0x41   :  { %5946 = vmatprep.subr.bf16.mxu0 %v9217_v29  ;;  %5445 = vmatpush3.bf16.msra.mxu1 %v7123_v49  ;;  %v916_v49 = vrot.slane %v4968_v30, %v6906_v35 }
  0x42   :  { %5461 = vmatprep.subr.bf16.mxu1 %v6728_v0 }
  0x43   :  { %799 = vmatmul.mubr.bf16.vlgmr.msra.gmra.mxu0 %v212_v48  ;;  %v924_v0 = vcombine.high %v916_v49, %v916_v49  ;;  %v7154_v48 = vld [vmem:[%s9189_s1 + $0x228] sm:$0xff]  }
  0x44   :  { %5947 = vmatpush3.bf16.msra.mxu0 %v7130_v40  ;;  %5962 = vmatprep.mubr.msk.bf16.mxu0 %vm6682_vm0, %v9217_v29 }
  0x45   :  { %839 = vmatmul.mubr.bf16.vlgmr.msra.gmra.mxu1 %v228_v45  ;;  %5948 = vmatprep.subr.bf16.mxu0 %v9217_v29  ;;  %v946_v24 = vrot.slane %v924_v0, %v6906_v35 }
  0x46   :  { %5462 = vmatpush3.bf16.msra.mxu1 %v6739_v2  ;;  %v7164_v2 = vld [vmem:[%s9189_s1 + $0x220] sm:$0xff]  }
  0x47   :  { %5463 = vmatprep.subr.bf16.mxu1 %v6751_v4  ;;  %1013 = vmatprep.mubr.bf16.mxu1 %v946_v24  ;;  %v7173_v4 = vld [vmem:[%s9189_s1 + $0x218] sm:$0xff]  }
  0x48   :  { %5949 = vmatpush3.bf16.msra.mxu0 %v7142_v56 }
  0x49   :  { %5950 = vmatprep.subr.bf16.mxu0 %v9217_v29 }
  0x4a   :  { %5464 = vmatpush3.bf16.msra.mxu1 %v6763_v6  ;;  %v7182_v6 = vld [vmem:[%s9189_s1 + $0x210] sm:$0xff]  }
  0x4b   :  { %5465 = vmatprep.subr.bf16.mxu1 %v6775_v8  ;;  %v909_v8 = vcombine.high %v4968_v30, %v4968_v30 }
  0x4c   :  { %5951 = vmatpush3.bf16.msra.mxu0 %v7154_v48 }
  0x4d   :  { %5952 = vmatprep.subr.bf16.mxu0 %v9217_v29 }
  0x4e   :  { %5466 = vmatpush3.bf16.msra.mxu1 %v6787_v10  ;;  %v7191_v10 = vld [vmem:[%s9189_s1 + $0x208] sm:$0xff]  }
  0x4f   :  { %5467 = vmatprep.subr.bf16.mxu1 %v6799_v12  ;;  %v923_v12 = vrot.slane %v909_v8, %v6906_v35  ;;  %v6165_v8 = vld [vmem:[%s9191_s3 + $0x84] ss:$16 sps:$4 sm:$0xff]  }
  0x50   :  { %5953 = vmatpush3.bf16.msra.mxu0 %v7164_v2 }
  0x51   :  { %5954 = vmatprep.subr.bf16.mxu0 %v9217_v29 }
  0x52   :  { %5468 = vmatpush3.bf16.msra.mxu1 %v6811_v14  ;;  %v7201_v14 = vld [vmem:[%s9189_s1 + $0x200] sm:$0xff]  }
  0x53   :  { %5469 = vmatprep.subr.bf16.mxu1 %v6823_v16  ;;  %v4895_v16 = vld.sshfl [vmem:[%s9190_s0 + $0x8] sm:$0x1 pattern:$0x75316420] }
  0x54   :  { %5955 = vmatpush3.bf16.msra.mxu0 %v7173_v4 }
  0x55   :  { %5956 = vmatprep.subr.bf16.mxu0 %v9217_v29 }
  0x56   :  { %5470 = vmatpush3.bf16.msra.mxu1 %v6835_v18  ;;  %v925_v18 = vcombine.high %v923_v12, %v923_v12 }
  0x57   :  { %5471 = vmatprep.subr.bf16.mxu1 %v6847_v20  ;;  %v244_v20 = vrot.slane %v4895_v16, %v6906_v35  ;;  %v6163_v16 = vld [vmem:[%s9191_s3 + $0x80] ss:$16 sps:$4 sm:$0xff]  }
  0x58   :  { %5957 = vmatpush3.bf16.msra.mxu0 %v7182_v6  ;;  %v953_v30 = vrot.slane %v925_v18, %v6906_v35  ;;  %v6166_v18 = vld [vmem:[%s9191_s3 + $0x88] ss:$16 sps:$4 sm:$0xff]  }
  0x59   :  { %5958 = vmatprep.subr.bf16.mxu0 %v9217_v29 }
  0x5a   :  { %5472 = vmatpush3.bf16.msra.mxu1 %v6859_v25  ;;  %v956_v25 = vcombine.high %v946_v24, %v946_v24  ;;  %v6160_v24 = vld [vmem:[%s9191_s3 + $0xa8] ss:$16 sps:$4 sm:$0xff]  }
  0x5b   :  { %5473 = vmatprep.subr.bf16.mxu1 %v6871_v27  ;;  %v932_v27 = vrot.slane %v916_v49, %v6906_v35 }
  0x5c   :  { %5959 = vmatpush3.bf16.msra.mxu0 %v7191_v10 }
  0x5d   :  { %5960 = vmatprep.subr.bf16.mxu0 %v9217_v29 }
  0x5e   :  { %5474 = vmatpush3.bf16.msra.mxu1 %v6885_v31  ;;  %v9308_v31 = vld [vmem:[#allocation11_spill] sm:$0xff] }
  0x5f   :  { %5475 = vmatprep.subr.bf16.mxu1 %v6897_v33  ;;  %v6145_v33 = vld [vmem:[%s9191_s3 + $0xe0] ss:$16 sps:$4 sm:$0xff]  }
  0x60   :  { %5961 = vmatpush3.bf16.msra.mxu0 %v7201_v14 }
  0x61   :  { %5483 = vmatprep.subr.bf16.mxu0 %v6733_v1  ;;  %v954_v1 = vcombine.high %v932_v27, %v932_v27 }
  0x62   :  { %5476 = vmatpush3.bf16.msra.mxu1 %v6912_v36  ;;  %v6148_v36 = vld [vmem:[%s9191_s3 + $0xe8] ss:$16 sps:$4 sm:$0xff]  }
  0x63   :  { %5963 = vmatmul.mubr.bf16.vlgmr.msra.gmra.mxu0 %v244_v20  ;;  %5505 = vmatprep.subr.bf16.mxu1 %v6929_v41  ;;  %v6171_v20 = vld [vmem:[%s9191_s3 + $0x64] ss:$16 sps:$4 sm:$0xff]  }
  0x64   :  { %5484 = vmatpush3.bf16.msra.mxu0 %v6745_v3  ;;  %1053 = vmatprep.mubr.bf16.mxu0 %v956_v25  ;;  %v957_v3 = vcombine.high %v953_v30, %v953_v30  ;;  %v9215_v25 = vmov 0  }
  0x65   :  { %1014 = vmatmul.mubr.bf16.vlgmr.msra.gmra.mxu1 %v932_v27  ;;  %5485 = vmatprep.subr.bf16.mxu0 %v6757_v5  ;;  %v939_v5 = vrot.slane %v923_v12, %v6906_v35  ;;  %v6168_v12 = vld [vmem:[%s9191_s3 + $0x8c] ss:$16 sps:$4 sm:$0xff]  }
  0x66   :  { %5506 = vmatpush3.bf16.msra.mxu1 %v6946_v47  ;;  %1093 = vmatprep.mubr.bf16.mxu1 %v953_v30  ;;  %v6153_v47 = vld [vmem:[%s9191_s3 + $0xc4] ss:$16 sps:$4 sm:$0xff]   ;;  %v6174_v27 = vld [vmem:[%s9191_s3 + $0x6c] ss:$16 sps:$4 sm:$0xff]  }
  0x67   :  { %5507 = vmatprep.subr.bf16.mxu1 %v6953_v50  ;;  %v6156_v50 = vld [vmem:[%s9191_s3 + $0xcc] ss:$16 sps:$4 sm:$0xff]  }
  0x68   :  { %5486 = vmatpush3.bf16.msra.mxu0 %v6769_v7  ;;  %v9300_v7 = vld [vmem:[#allocation3_spill] sm:$0xff] }
  0x69   :  { %5487 = vmatprep.subr.bf16.mxu0 %v6781_v9  ;;  %v9301_v9 = vld [vmem:[#allocation4_spill] sm:$0xff] }
  0x6a   :  { %5508 = vmatpush3.bf16.msra.mxu1 %v6970_v55 }
  0x6b   :  { %5509 = vmatprep.subr.bf16.mxu1 %v6976_v57 }
  0x6c   :  { %5488 = vmatpush3.bf16.msra.mxu0 %v6793_v11  ;;  %v9302_v11 = vld [vmem:[#allocation5_spill] sm:$0xff] }
  0x6d   :  { %5489 = vmatprep.subr.bf16.mxu0 %v6805_v13  ;;  %v9303_v13 = vld [vmem:[#allocation6_spill] sm:$0xff] }
  0x6e   :  { %5510 = vmatpush3.bf16.msra.mxu1 %v6994_v60 }
  0x6f   :  { %5511 = vmatprep.subr.bf16.mxu1 %v7000_v61  ;;  %v6159_v61 = vld [vmem:[%s9191_s3 + $0xa4] ss:$16 sps:$4 sm:$0xff]  }
  0x70   :  { %5490 = vmatpush3.bf16.msra.mxu0 %v6817_v15  ;;  %v9304_v15 = vld [vmem:[#allocation7_spill] sm:$0xff] }
  0x71   :  { %5491 = vmatprep.subr.bf16.mxu0 %v6829_v17  ;;  %v9305_v17 = vld [vmem:[#allocation8_spill] sm:$0xff] }
  0x72   :  { %5512 = vmatpush3.bf16.msra.mxu1 %v7018_v22 }
  0x73   :  { %5513 = vmatprep.subr.bf16.mxu1 %v7024_v23  ;;  %v6157_v23 = vld [vmem:[%s9191_s3 + $0xa0] ss:$16 sps:$4 sm:$0xff]  }
  0x74   :  { %5492 = vmatpush3.bf16.msra.mxu0 %v6841_v19  ;;  %v9306_v19 = vld [vmem:[#allocation9_spill] sm:$0xff] }
  0x75   :  { %5493 = vmatprep.subr.bf16.mxu0 %v6853_v21  ;;  %v9307_v21 = vld [vmem:[#allocation10_spill] sm:$0xff] }
  0x76   :  { %5514 = vmatpush3.bf16.msra.mxu1 %v7042_v38 }
  0x77   :  { %5515 = vmatprep.subr.bf16.mxu1 %v7048_v39 }
  0x78   :  { %5494 = vmatpush3.bf16.msra.mxu0 %v6865_v26  ;;  %v4970_v26 = vld.sshfl [vmem:[%s9190_s0 + $0x11] sm:$0x1 pattern:$0x75316420] }
  0x79   :  { %5495 = vmatprep.subr.bf16.mxu0 %v6877_v28  ;;  %v955_v28 = vcombine.high %v939_v5, %v939_v5 }
  0x7a   :  { %5516 = vmatpush3.bf16.msra.mxu1 %v7066_v44 }
  0x7b   :  { %5517 = vmatprep.subr.bf16.mxu1 %v7072_v46 }
  0x7c   :  { %5496 = vmatpush3.bf16.msra.mxu0 %v6891_v32  ;;  %v971_v32 = vrot.slane %v4970_v26, %v6906_v35 }
  0x7d   :  { %5497 = vmatprep.subr.bf16.mxu0 %v6903_v34  ;;  %v6147_v34 = vld [vmem:[%s9191_s3 + $0xe4] ss:$16 sps:$4 sm:$0xff]  }
  0x7e   :  { %5518 = vmatpush3.bf16.msra.mxu1 %v7090_v51 }
  0x7f   :  { %5519 = vmatprep.subr.bf16.mxu1 %v7096_v53 }
  0x80   :  { %5498 = vmatpush3.bf16.msra.mxu0 %v6918_v37  ;;  %v6150_v37 = vld [vmem:[%s9191_s3 + $0xec] ss:$16 sps:$4 sm:$0xff]  }
  0x81   :  { %5527 = vmatprep.subr.bf16.mxu0 %v6934_v42  ;;  %v7300_v42 = vld [vmem:[%s9192_s2] ss:$0 sm:$0xff] }
  0x82   :  { %5520 = vmatpush3.bf16.msra.mxu1 %v7114_v43 }
  0x83   :  { %1054 = vmatmul.mubr.bf16.vlgmr.msra.gmra.mxu0 %v954_v1  ;;  %5966 = vmatprep.subr.bf16.mxu1 %v9217_v29 }
  0x84   :  { %5528 = vmatpush3.bf16.msra.mxu0 %v6958_v52  ;;  %1133 = vmatprep.mubr.bf16.mxu0 %v957_v3  ;;  %v6151_v52 = vld [vmem:[%s9191_s3 + $0xc0] ss:$16 sps:$4 sm:$0xff]  }
  0x85   :  { %1094 = vmatmul.mubr.bf16.vlgmr.msra.gmra.mxu1 %v939_v5  ;;  %5529 = vmatprep.subr.bf16.mxu0 %v6964_v54  ;;  %v6154_v54 = vld [vmem:[%s9191_s3 + $0xc8] ss:$16 sps:$4 sm:$0xff]  }
  0x86   :  { %5967 = vmatpush3.bf16.msra.mxu1 %v7130_v40  ;;  %5982 = vmatprep.mubr.msk.bf16.mxu1 %vm6682_vm0, %v9217_v29 }
  0x87   :  { %5968 = vmatprep.subr.bf16.mxu1 %v9217_v29 }
  0x88   :  { %5530 = vmatpush3.bf16.msra.mxu0 %v6982_v58 }
  0x89   :  { %5531 = vmatprep.subr.bf16.mxu0 %v6988_v59 }
  0x8a   :  { %5969 = vmatpush3.bf16.msra.mxu1 %v7142_v56 }
  0x8b   :  { %5970 = vmatprep.subr.bf16.mxu1 %v9217_v29 }
  0x8c   :  { %5532 = vmatpush3.bf16.msra.mxu0 %v7006_v62  ;;  %v6162_v62 = vld [vmem:[%s9191_s3 + $0xac] ss:$16 sps:$4 sm:$0xff]  }
  0x8d   :  { %5533 = vmatprep.subr.bf16.mxu0 %v7012_v63 }
  0x8e   :  { %5971 = vmatpush3.bf16.msra.mxu1 %v7154_v48 }
  0x8f   :  { %5972 = vmatprep.subr.bf16.mxu1 %v9217_v29 }
  0x90   :  { %5534 = vmatpush3.bf16.msra.mxu0 %v9300_v7 }
  0x91   :  { %5535 = vmatprep.subr.bf16.mxu0 %v9301_v9 }
  0x92   :  { %5973 = vmatpush3.bf16.msra.mxu1 %v7164_v2 }
  0x93   :  { %5974 = vmatprep.subr.bf16.mxu1 %v9217_v29 }
  0x94   :  { %5536 = vmatpush3.bf16.msra.mxu0 %v9302_v11 }
  0x95   :  { %5537 = vmatprep.subr.bf16.mxu0 %v9303_v13 }
  0x96   :  { %5975 = vmatpush3.bf16.msra.mxu1 %v7173_v4 }
  0x97   :  { %5976 = vmatprep.subr.bf16.mxu1 %v9217_v29 }
  0x98   :  { %5538 = vmatpush3.bf16.msra.mxu0 %v9304_v15 }
  0x99   :  { %5539 = vmatprep.subr.bf16.mxu0 %v9305_v17 }
  0x9a   :  { %5977 = vmatpush3.bf16.msra.mxu1 %v7182_v6 }
  0x9b   :  { %5978 = vmatprep.subr.bf16.mxu1 %v9217_v29 }
  0x9c   :  { %5540 = vmatpush3.bf16.msra.mxu0 %v9306_v19 }
  0x9d   :  { %5541 = vmatprep.subr.bf16.mxu0 %v9307_v21 }
  0x9e   :  { %5979 = vmatpush3.bf16.msra.mxu1 %v7191_v10 }
  0x9f   :  { %5980 = vmatprep.subr.bf16.mxu1 %v9217_v29  ;;  %v7634_v29 = vld [vmem:[%s9189_s1 + $0x1b8] sm:$0xff]  }
  0xa0   :  { %5542 = vmatpush3.bf16.msra.mxu0 %v9308_v31  ;;  %9323 = vst [vmem:[#allocation17_spill] sm:$0xff] %v7634_v29 }
  0xa1   :  { %1292 = vmatprep.subr.bf16.mxu0 %v6147_v34 }
  0xa2   :  { %5981 = vmatpush3.bf16.msra.mxu1 %v7201_v14 }
  0xa3   :  { %1134 = vmatmul.mubr.bf16.vlgmr.msra.gmra.mxu0 %v955_v28  ;;  %1333 = vmatprep.subr.bf16.mxu1 %v6150_v37 }
  0xa4   :  { %1293 = vmatpush1.bf16.msra.mxu0 %v6145_v33  ;;  %1316 = vmatprep.mubr.bf16.mxu0 %v9215_v25 }
  0xa5   :  { %5983 = vmatmul.mubr.bf16.vlgmr.msra.gmra.mxu1 %v971_v32  ;;  %1294 = vmatprep.subr.bf16.mxu0 %v6153_v47 }
  0xa6   :  { %1334 = vmatpush1.bf16.msra.mxu1 %v6148_v36  ;;  %1357 = vmatprep.mubr.bf16.mxu1 %v9215_v25 }
  0xa7   :  { %1335 = vmatprep.subr.bf16.mxu1 %v6156_v50 }
  0xa8   :  { %1295 = vmatpush1.bf16.msra.mxu0 %v6151_v52 }
  0xa9   :  { %1296 = vmatprep.subr.bf16.mxu0 %v6159_v61 }
  0xaa   :  { %1336 = vmatpush1.bf16.msra.mxu1 %v6154_v54 }
  0xab   :  { %1337 = vmatprep.subr.bf16.mxu1 %v6162_v62 }
  0xac   :  { %1297 = vmatpush1.bf16.msra.mxu0 %v6157_v23 }
  0xad   :  { %1298 = vmatprep.subr.bf16.mxu0 %v6165_v8 }
  0xae   :  { %1338 = vmatpush1.bf16.msra.mxu1 %v6160_v24 }
  0xaf   :  { %1339 = vmatprep.subr.bf16.mxu1 %v6168_v12 }
  0xb0   :  { %1299 = vmatpush1.bf16.msra.mxu0 %v6163_v16 }
  0xb1   :  { %1457 = vmatprep.subr.bf16.mxu0 %v6171_v20 }
  0xb2   :  { %1340 = vmatpush1.bf16.msra.mxu1 %v6166_v18 }
  0xb3   :  { %1498 = vmatprep.subr.bf16.mxu1 %v6174_v27 }
  0xe3   :  { %v5380_v41 = vpop.f32.mrf.mxu0 }
  0xe4   :  { %v5402_v55 = vpop.f32.mrf.mxu1 }
  0xe5   :  { %v5381_v57 = vpop.f32.mrf.mxu0 }
  0xe6   :  { %v5382_v58 = vadd.f32 %v5381_v57, %v5380_v41  ;;  %v5403_v59 = vpop.f32.mrf.mxu1 }
  0xe7   :  { %v5383_v60 = vpop.f32.mrf.mxu0  ;;  %v5404_v22 = vadd.f32 %v5403_v59, %v5402_v55 }
  0xe8   :  { %v721_v63 = vadd.f32 %v5382_v58, %v7300_v42  ;;  %v5405_v38 = vpop.f32.mrf.mxu1 }
  0xe9   :  { %v5384_v49 = vpop.f32.mrf.mxu0 }
  0xea   :  { %v761_v45 = vadd.f32 %v5404_v22, %v721_v63  ;;  %v5406_v0 = vpop.f32.mrf.mxu1 }
 0x103   :  { %v5424_v30 = vpop.f32.mrf.mxu0 }
 0x105   :  { %v5446_v1 = vpop.f32.mrf.mxu1  ;;  %v5425_v3 = vpop.f32.mrf.mxu0 }
 0x106   :  { %v5426_v5 = vadd.f32 %v5425_v3, %v5424_v30 }
 0x107   :  { %v5447_v7 = vpop.f32.mrf.mxu1  ;;  %v5427_v9 = vpop.f32.mrf.mxu0 }
 0x108   :  { %v801_v26 = vadd.f32 %v5426_v5, %v761_v45  ;;  %v5448_v28 = vadd.f32 %v5447_v7, %v5446_v1 }
 0x109   :  { %v5449_v32 = vpop.f32.mrf.mxu1  ;;  %v5428_v33 = vpop.f32.mrf.mxu0 }
 0x10a   :  { %v841_v34 = vadd.f32 %v5448_v28, %v801_v26  ;;  %v6169_v32 = vld [vmem:[%s9191_s3 + $0x60] ss:$16 sps:$4 sm:$0xff]   ;;  %v6172_v33 = vld [vmem:[%s9191_s3 + $0x68] ss:$16 sps:$4 sm:$0xff]  }
 0x10b   :  { %v5450_v36 = vpop.f32.mrf.mxu1 }
 0x10c   :  { %v6177_v36 = vld [vmem:[%s9191_s3 + $0x44] ss:$16 sps:$4 sm:$0xff]  }
 0x123   :  { %v880_v37 = vpop.f32.mrf.mxu0 }
 0x124   :  { %v7347_v41 = vadd.f32 %v880_v37, %v841_v34  ;;  %v6180_v37 = vld [vmem:[%s9191_s3 + $0x4c] ss:$16 sps:$4 sm:$0xff]  }
 0x125   :  { %v5477_v47 = vpop.f32.mrf.mxu1  ;;  %v5964_v50 = vpop.f32.mrf.mxu0 }
 0x126   :  { %v6175_v50 = vld [vmem:[%s9191_s3 + $0x40] ss:$16 sps:$4 sm:$0xff]  }
 0x127   :  { %v5478_v52 = vpop.f32.mrf.mxu1  ;;  %v883_v54 = vpop.f32.mrf.mxu0 }
 0x128   :  { %v5479_v38 = vadd.f32 %v5478_v52, %v5477_v47  ;;  %v7367_v47 = vld [vmem:[%s9190_s0 + $0x12] sm:$0xff] }
 0x129   :  { %v5480_v55 = vpop.f32.mrf.mxu1  ;;  %v5965_v57 = vpop.f32.mrf.mxu0  ;;  %v6178_v52 = vld [vmem:[%s9191_s3 + $0x48] ss:$16 sps:$4 sm:$0xff]   ;;  %v6183_v54 = vld [vmem:[%s9191_s3 + $0x24] ss:$16 sps:$4 sm:$0xff]  }
 0x12a   :  { %v1016_v45 = vadd.f32 %v5479_v38, %v7300_v42  ;;  %v6186_v55 = vld [vmem:[%s9191_s3 + $0x2c] ss:$16 sps:$4 sm:$0xff]   ;;  %v7385_v57 = vrot.slane %v7367_v47, %v6906_v35 }
 0x12b   :  { %v5481_v58 = vpop.f32.mrf.mxu1 }
 0x12c   :  { %v6181_v58 = vld [vmem:[%s9191_s3 + $0x20] ss:$16 sps:$4 sm:$0xff]  }
 0x143   :  { %v5499_v59 = vpop.f32.mrf.mxu0 }
 0x145   :  { %v5521_v60 = vpop.f32.mrf.mxu1  ;;  %v5500_v61 = vpop.f32.mrf.mxu0 }
 0x146   :  { %v5501_v49 = vadd.f32 %v5500_v61, %v5499_v59  ;;  %v6184_v59 = vld [vmem:[%s9191_s3 + $0x28] ss:$16 sps:$4 sm:$0xff]   ;;  %v6192_v61 = vld [vmem:[%s9191_s3 + $0xc] ss:$16 sps:$4 sm:$0xff]  }
 0x147   :  { %v5522_v62 = vpop.f32.mrf.mxu1  ;;  %v5502_v63 = vpop.f32.mrf.mxu0 }
 0x148   :  { %v1056_v0 = vadd.f32 %v5501_v49, %v1016_v45  ;;  %v5523_v8 = vadd.f32 %v5522_v62, %v5521_v60  ;;  %v6189_v60 = vld [vmem:[%s9191_s3 + $0x4] ss:$16 sps:$4 sm:$0xff]   ;;  %v1551_v62 = vcombine.high %v7385_v57, %v7385_v57  ;;  %v6187_v63 = vld [vmem:[%s9191_s3] ss:$16 sps:$4 sm:$0xff]   ;;  %v7412_v49 = vld [vmem:[%s9189_s1 + $0x78] sm:$0xff]  }
 0x149   :  { %v5524_v22 = vpop.f32.mrf.mxu1  ;;  %v5503_v23 = vpop.f32.mrf.mxu0  ;;  %v7418_v45 = vld [vmem:[%s9189_s1 + $0xf8] sm:$0xff]  }
 0x14a   :  { %v1096_v20 = vadd.f32 %v5523_v8, %v1056_v0  ;;  %v6190_v22 = vld [vmem:[%s9191_s3 + $0x8] ss:$16 sps:$4 sm:$0xff]   ;;  %v886_v23 = vmax.f32 %v7347_v41, 0.0 }
 0x14b   :  { %v5525_v24 = vpop.f32.mrf.mxu1  ;;  %v7426_v0 = vld [vmem:[%s9189_s1 + $0x38] sm:$0xff]  }
 0x14c   :  { %v1573_v24 = vrot.slane %v1551_v62, %v6906_v35  ;;  %v887_v38 = vpack.c.bf16 %v886_v23, %v886_v23  ;;  %9309 = vst [vmem:[#allocation3_spill] sm:$0xff] %v7426_v0  ;;  %v7432_v8 = vld [vmem:[%s9189_s1 + $0xb8] sm:$0xff]   ;;  %v7585_v62 = vld [vmem:[%s9189_s1 + $0x88] sm:$0xff]  }
 0x14d   :  { %9318 = vst [vmem:[#allocation12_spill] sm:$0xff] %v7585_v62 }
 0x14e   :  { %v1583_v41 = vcombine.high %v1573_v24, %v1573_v24 }
 0x163   :  { %v5543_v12 = vpop.f32.mrf.mxu0 }
 0x165   :  { %v1175_v16 = vpop.f32.mrf.mxu1  ;;  %v5544_v18 = vpop.f32.mrf.mxu0 }
 0x166   :  { %v5545_v27 = vadd.f32 %v5544_v18, %v5543_v12  ;;  %v7438_v12 = vld [vmem:[%s9189_s1 + $0x70] sm:$0xff]  }
 0x167   :  { %v5984_v30 = vpop.f32.mrf.mxu1  ;;  %v5546_v1 = vpop.f32.mrf.mxu0  ;;  %v7450_v18 = vld [vmem:[%s9189_s1 + $0x30] sm:$0xff]  }
 0x168   :  { %v1136_v3 = vadd.f32 %v5545_v27, %v1096_v20  ;;  %v7456_v20 = vld [vmem:[%s9189_s1 + $0xb0] sm:$0xff]   ;;  %v7462_v27 = vld [vmem:[%s9189_s1 + $0x68] sm:$0xff]  }
 0x169   :  { %v1178_v5 = vpop.f32.mrf.mxu1  ;;  %v5547_v7 = vpop.f32.mrf.mxu0  ;;  %v7468_v30 = vld [vmem:[%s9189_s1 + $0xe8] sm:$0xff]  }
 0x16a   :  { %v1176_v9 = vadd.f32 %v1175_v16, %v1136_v3  ;;  %v7444_v16 = vld [vmem:[%s9189_s1 + $0xf0] sm:$0xff]   ;;  %v7474_v1 = vld [vmem:[%s9189_s1 + $0x28] sm:$0xff]   ;;  %v7486_v5 = vld [vmem:[%s9189_s1 + $0x60] sm:$0xff]  }
 0x16b   :  { %v5985_v26 = vpop.f32.mrf.mxu1  ;;  %9310 = vst [vmem:[#allocation4_spill] sm:$0xff] %v7474_v1  ;;  %v7480_v3 = vld [vmem:[%s9189_s1 + $0xa8] sm:$0xff]   ;;  %v7492_v7 = vld [vmem:[%s9189_s1 + $0xe0] sm:$0xff]  }
 0x16c   :  { %v1181_v28 = vmax.f32 %v1176_v9, 0.0  ;;  %v7498_v9 = vld [vmem:[%s9189_s1 + $0x20] sm:$0xff]  }
 0x16d   :  { %9311 = vst [vmem:[#allocation5_spill] sm:$0xff] %v7498_v9  ;;  %v7504_v26 = vld [vmem:[%s9189_s1 + $0xa0] sm:$0xff]  }
 0x16e   :  { %v1182_v34 = vpack.c.bf16 %v1181_v28, %v1181_v28  ;;  %v7510_v28 = vld [vmem:[%s9189_s1 + $0x58] sm:$0xff]  }
 0x16f   :  { %9312 = vst [vmem:[#allocation6_spill] sm:$0xff] %v7510_v28 }
 0x170   :  { %5003 = vmatmul.mubr.msk.bf16.vlgmr.msra.gmra.mxu0 %vm1280_vm1, %v1182_v34  ;;  %5004 = vmatmul.mubr.msk.bf16.vlgmr.msra.gmra.mxu1 %vm1280_vm1, %v1182_v34  ;;  %v7524_v34 = vld [vmem:[%s9189_s1 + $0x18] sm:$0xff]  }
 0x171   :  { %1458 = vmatpush1.bf16.msra.mxu0 %v6169_v32  ;;  %1499 = vmatpush1.bf16.msra.mxu1 %v6172_v33  ;;  %v7516_v32 = vld [vmem:[%s9189_s1 + $0xd8] sm:$0xff]   ;;  %v1536_v33 = vcombine.high %v7367_v47, %v7367_v47  ;;  %9313 = vst [vmem:[#allocation7_spill] sm:$0xff] %v7524_v34  ;;  %v7542_v47 = vld [vmem:[%s9189_s1 + $0xd0] sm:$0xff]  }
 0x172   :  { %1459 = vmatprep.subr.bf16.mxu0 %v6177_v36  ;;  %1500 = vmatprep.subr.bf16.mxu1 %v6180_v37  ;;  %v7530_v36 = vld [vmem:[%s9189_s1 + $0x98] sm:$0xff]   ;;  %v7536_v37 = vld [vmem:[%s9189_s1 + $0x50] sm:$0xff]  }
 0x173   :  { %1481 = vmatprep.mubr.bf16.mxu0 %v9215_v25  ;;  %1522 = vmatprep.mubr.bf16.mxu1 %v9215_v25  ;;  %9314 = vst [vmem:[#allocation8_spill] sm:$0xff] %v7536_v37  ;;  %v7628_v25 = vld [vmem:[%s9189_s1 + $0x138] sm:$0xff]  }
 0x175   :  { %1460 = vmatpush1.bf16.msra.mxu0 %v6175_v50  ;;  %1501 = vmatpush1.bf16.msra.mxu1 %v6178_v52  ;;  %v7546_v50 = vrot.slane %v1536_v33, %v6906_v35  ;;  %v7551_v52 = vld [vmem:[%s9189_s1 + $0x10] sm:$0xff]   ;;  %v7622_v33 = vld [vmem:[%s9189_s1 + $0x1f8] sm:$0xff]  }
 0x176   :  { %1461 = vmatprep.subr.bf16.mxu0 %v6183_v54  ;;  %1502 = vmatprep.subr.bf16.mxu1 %v6186_v55  ;;  %9315 = vst [vmem:[#allocation9_spill] sm:$0xff] %v7551_v52  ;;  %v7557_v54 = vld [vmem:[%s9189_s1 + $0x90] sm:$0xff]   ;;  %v7563_v55 = vld [vmem:[%s9189_s1 + $0x48] sm:$0xff]   ;;  %9322 = vst [vmem:[#allocation16_spill] sm:$0xff] %v7622_v33 }
 0x177   :  { %9316 = vst [vmem:[#allocation10_spill] sm:$0xff] %v7563_v55 }
 0x179   :  { %1462 = vmatpush1.bf16.msra.mxu0 %v6181_v58  ;;  %1503 = vmatpush1.bf16.msra.mxu1 %v6184_v59  ;;  %v7569_v58 = vld [vmem:[%s9189_s1 + $0xc8] sm:$0xff]   ;;  %v1552_v59 = vcombine.high %v7546_v50, %v7546_v50 }
 0x17a   :  { %1463 = vmatprep.subr.bf16.mxu0 %v6189_v60  ;;  %1504 = vmatprep.subr.bf16.mxu1 %v6192_v61  ;;  %9317 = vst [vmem:[#allocation11_spill] sm:$0xff] %v7569_v58  ;;  %v1559_v60 = vrot.slane %v7385_v57, %v6906_v35  ;;  %v7579_v61 = vld [vmem:[%s9189_s1 + $0x8] sm:$0xff]   ;;  %v7597_v57 = vld [vmem:[%s9189_s1 + $0xc0] sm:$0xff]  }
 0x17b   :  { %9320 = vst [vmem:[#allocation14_spill] sm:$0xff] %v7597_v57 }
 0x17c   :  { %v1581_v23 = vcombine.high %v1559_v60, %v1559_v60 }
 0x17d   :  { %1464 = vmatpush1.bf16.msra.mxu0 %v6187_v63  ;;  %1505 = vmatpush1.bf16.msra.mxu1 %v6190_v22  ;;  %v7591_v63 = vld [vmem:[%s9189_s1 + $0x40] sm:$0xff]   ;;  %v1580_v22 = vrot.slane %v1552_v59, %v6906_v35 }
 0x17e   :  { %5558 = vmatprep.subr.bf16.mxu0 %v7412_v49  ;;  %5580 = vmatprep.subr.bf16.mxu1 %v7418_v45  ;;  %9319 = vst [vmem:[#allocation13_spill] sm:$0xff] %v7591_v63 }
 0x17f   :  { %v1584_v59 = vcombine.high %v1580_v22, %v1580_v22 }
 0x180   :  { %5021 = vmatmul.mubr.msk.bf16.vlgmr.msra.gmra.mxu0 %vm1280_vm1, %v887_v38  ;;  %5022 = vmatmul.mubr.msk.bf16.vlgmr.msra.gmra.mxu1 %vm1280_vm1, %v887_v38  ;;  %v7610_v38 = vld [vmem:[%s9189_s1 + $0x80] sm:$0xff]  }
 0x181   :  { %5559 = vmatpush3.bf16.msra.mxu0 %v7426_v0  ;;  %5581 = vmatpush3.bf16.msra.mxu1 %v7432_v8  ;;  %9321 = vst [vmem:[#allocation15_spill] sm:$0xff] %v7610_v38 }
 0x182   :  { %5560 = vmatprep.subr.bf16.mxu0 %v7438_v12  ;;  %5582 = vmatprep.subr.bf16.mxu1 %v7444_v16 }
 0x183   :  { %1640 = vmatprep.mubr.bf16.mxu0 %v1573_v24  ;;  %1680 = vmatprep.mubr.bf16.mxu1 %v1583_v41  ;;  %v7604_v24 = vld [vmem:[%s9189_s1] sm:$0xff]   ;;  %v7616_v41 = vld [vmem:[%s9189_s1 + $0x178] sm:$0xff]  }
 0x185   :  { %5561 = vmatpush3.bf16.msra.mxu0 %v7450_v18  ;;  %5583 = vmatpush3.bf16.msra.mxu1 %v7456_v20 }
 0x186   :  { %5562 = vmatprep.subr.bf16.mxu0 %v7462_v27  ;;  %5584 = vmatprep.subr.bf16.mxu1 %v7468_v30 }
 0x189   :  { %5563 = vmatpush3.bf16.msra.mxu0 %v7474_v1  ;;  %5585 = vmatpush3.bf16.msra.mxu1 %v7480_v3 }
 0x18a   :  { %5564 = vmatprep.subr.bf16.mxu0 %v7486_v5  ;;  %5586 = vmatprep.subr.bf16.mxu1 %v7492_v7 }
 0x18d   :  { %5565 = vmatpush3.bf16.msra.mxu0 %v7498_v9  ;;  %5587 = vmatpush3.bf16.msra.mxu1 %v7504_v26 }
 0x18e   :  { %5566 = vmatprep.subr.bf16.mxu0 %v7510_v28  ;;  %5588 = vmatprep.subr.bf16.mxu1 %v7516_v32 }
 0x191   :  { %5567 = vmatpush3.bf16.msra.mxu0 %v7524_v34  ;;  %5589 = vmatpush3.bf16.msra.mxu1 %v7530_v36 }
 0x192   :  { %5568 = vmatprep.subr.bf16.mxu0 %v7536_v37  ;;  %5590 = vmatprep.subr.bf16.mxu1 %v7542_v47 }
 0x195   :  { %5569 = vmatpush3.bf16.msra.mxu0 %v7551_v52  ;;  %5591 = vmatpush3.bf16.msra.mxu1 %v7557_v54 }
 0x196   :  { %5570 = vmatprep.subr.bf16.mxu0 %v7563_v55  ;;  %5592 = vmatprep.subr.bf16.mxu1 %v7569_v58  ;;  %v7724_v58 = vld [vmem:[%s9189_s1 + $0x118] sm:$0xff]  }
 0x197   :  { %9331 = vst [vmem:[#allocation25_spill] sm:$0xff] %v7724_v58 }
 0x199   :  { %5571 = vmatpush3.bf16.msra.mxu0 %v7579_v61  ;;  %5593 = vmatpush3.bf16.msra.mxu1 %v7585_v62  ;;  %v7712_v62 = vld [vmem:[%s9189_s1 + $0x158] sm:$0xff]  }
 0x19a   :  { %5572 = vmatprep.subr.bf16.mxu0 %v7591_v63  ;;  %5594 = vmatprep.subr.bf16.mxu1 %v7597_v57  ;;  %v7700_v57 = vld [vmem:[%s9189_s1 + $0x120] sm:$0xff]  }
 0x19b   :  { %9329 = vst [vmem:[#allocation23_spill] sm:$0xff] %v7700_v57 }
 0x19d   :  { %5573 = vmatpush3.bf16.msra.mxu0 %v7604_v24  ;;  %5595 = vmatpush3.bf16.msra.mxu1 %v7610_v38  ;;  %v7688_v38 = vld [vmem:[%s9189_s1 + $0x160] sm:$0xff]  }
 0x19e   :  { %5602 = vmatprep.subr.bf16.mxu0 %v7616_v41  ;;  %5624 = vmatprep.subr.bf16.mxu1 %v7622_v33  ;;  %v7640_v33 = vld [vmem:[%s9189_s1 + $0x170] sm:$0xff]  }
 0x1a0   :  { %1641 = vmatmul.mubr.bf16.vlgmr.msra.gmra.mxu0 %v1559_v60  ;;  %1681 = vmatmul.mubr.bf16.vlgmr.msra.gmra.mxu1 %v1581_v23  ;;  %v7646_v60 = vld [vmem:[%s9189_s1 + $0x1f0] sm:$0xff]  }
 0x1a1   :  { %5603 = vmatpush3.bf16.msra.mxu0 %v7628_v25  ;;  %5625 = vmatpush3.bf16.msra.mxu1 %v7634_v29  ;;  %9324 = vst [vmem:[#allocation18_spill] sm:$0xff] %v7646_v60  ;;  %v7652_v23 = vld [vmem:[%s9189_s1 + $0x130] sm:$0xff]  }
 0x1a2   :  { %5604 = vmatprep.subr.bf16.mxu0 %v7640_v33  ;;  %5626 = vmatprep.subr.bf16.mxu1 %v7646_v60  ;;  %v7658_v29 = vld [vmem:[%s9189_s1 + $0x1b0] sm:$0xff]   ;;  %v7664_v60 = vld [vmem:[%s9189_s1 + $0x168] sm:$0xff]  }
 0x1a3   :  { %1720 = vmatprep.mubr.bf16.mxu0 %v1580_v22  ;;  %1760 = vmatprep.mubr.bf16.mxu1 %v1584_v59  ;;  %9325 = vst [vmem:[#allocation19_spill] sm:$0xff] %v7658_v29  ;;  %v7670_v22 = vld [vmem:[%s9189_s1 + $0x1e8] sm:$0xff]  }
 0x1a4   :  { %9326 = vst [vmem:[#allocation20_spill] sm:$0xff] %v7670_v22  ;;  %v7676_v59 = vld [vmem:[%s9189_s1 + $0x128] sm:$0xff]  }
 0x1a5   :  { %5605 = vmatpush3.bf16.msra.mxu0 %v7652_v23  ;;  %5627 = vmatpush3.bf16.msra.mxu1 %v7658_v29  ;;  %v7682_v29 = vld [vmem:[%s9189_s1 + $0x1a8] sm:$0xff]  }
 0x1a6   :  { %5606 = vmatprep.subr.bf16.mxu0 %v7664_v60  ;;  %5628 = vmatprep.subr.bf16.mxu1 %v7670_v22  ;;  %9327 = vst [vmem:[#allocation21_spill] sm:$0xff] %v7682_v29  ;;  %v7694_v22 = vld [vmem:[%s9189_s1 + $0x1e0] sm:$0xff]  }
 0x1a7   :  { %9328 = vst [vmem:[#allocation22_spill] sm:$0xff] %v7694_v22 }
 0x1a9   :  { %5607 = vmatpush3.bf16.msra.mxu0 %v7676_v59  ;;  %5629 = vmatpush3.bf16.msra.mxu1 %v7682_v29  ;;  %v7706_v29 = vld [vmem:[%s9189_s1 + $0x1a0] sm:$0xff]  }
 0x1aa   :  { %5608 = vmatprep.subr.bf16.mxu0 %v7688_v38  ;;  %5630 = vmatprep.subr.bf16.mxu1 %v7694_v22  ;;  %v7718_v22 = vld [vmem:[%s9189_s1 + $0x1d8] sm:$0xff]  }
 0x1ab   :  { %9330 = vst [vmem:[#allocation24_spill] sm:$0xff] %v7718_v22 }
 0x1ad   :  { %5609 = vmatpush3.bf16.msra.mxu0 %v7700_v57  ;;  %5631 = vmatpush3.bf16.msra.mxu1 %v7706_v29 }
 0x1ae   :  { %5610 = vmatprep.subr.bf16.mxu0 %v7712_v62  ;;  %5632 = vmatprep.subr.bf16.mxu1 %v7718_v22  ;;  %v1566_v22 = vrot.slane %v7546_v50, %v6906_v35 }
 0x1b1   :  { %5611 = vmatpush3.bf16.msra.mxu0 %v7724_v58  ;;  %5633 = vmatpush3.bf16.msra.mxu1 %v9302_v11 }
 0x1b2   :  { %5612 = vmatprep.subr.bf16.mxu0 %v7048_v39  ;;  %5634 = vmatprep.subr.bf16.mxu1 %v9303_v13  ;;  %v1582_v39 = vcombine.high %v1566_v22, %v1566_v22 }
 0x1b5   :  { %5613 = vmatpush3.bf16.msra.mxu0 %v7066_v44  ;;  %5635 = vmatpush3.bf16.msra.mxu1 %v9304_v15  ;;  %v9332_v44 = vmov 0.0   ;;  %v5060_v15 = vld [vmem:[%s9190_s0 + $0x1b] sm:$0xff] }
 0x1b6   :  { %5614 = vmatprep.subr.bf16.mxu0 %v7072_v46  ;;  %5636 = vmatprep.subr.bf16.mxu1 %v9305_v17  ;;  %v9333_v46 = vmov 0   ;;  %v2008_v17 = vrot.slane %v5060_v15, %v6906_v35 }
 0x1b9   :  { %5615 = vmatpush3.bf16.msra.mxu0 %v7090_v51  ;;  %5637 = vmatpush3.bf16.msra.mxu1 %v9306_v19  ;;  %v6194_v51 = vld [vmem:[%s9191_s3 + $0x160] ss:$16 sps:$4 sm:$0xff]  }
 0x1ba   :  { %5616 = vmatprep.subr.bf16.mxu0 %v7096_v53  ;;  %5638 = vmatprep.subr.bf16.mxu1 %v9307_v21  ;;  %v6196_v53 = vld [vmem:[%s9191_s3 + $0x164] ss:$16 sps:$4 sm:$0xff]  }
 0x1bd   :  { %5617 = vmatpush3.bf16.msra.mxu0 %v7114_v43  ;;  %5639 = vmatpush3.bf16.msra.mxu1 %v9308_v31  ;;  %v2016_v31 = vcombine.high %v2008_v17, %v2008_v17 }
 0x1be   :  { %5986 = vmatprep.subr.bf16.mxu0 %v9332_v44  ;;  %1918 = vmatprep.subr.bf16.mxu1 %v6196_v53 }
 0x1c0   :  { %1721 = vmatmul.mubr.bf16.vlgmr.msra.gmra.mxu0 %v1566_v22  ;;  %1761 = vmatmul.mubr.bf16.vlgmr.msra.gmra.mxu1 %v1582_v39  ;;  %v7814_v39 = vrot.slane %v2016_v31, %v6906_v35 }
 0x1c1   :  { %5987 = vmatpush3.bf16.msra.mxu0 %v7130_v40  ;;  %6002 = vmatprep.mubr.msk.bf16.mxu0 %vm6682_vm0, %v9332_v44  ;;  %v5025_v40 = vld.sshfl [vmem:[%s9190_s0 + $0x1a] sm:$0x1 pattern:$0x75316420] }
 0x1c2   :  { %5988 = vmatprep.subr.bf16.mxu0 %v9332_v44  ;;  %1942 = vmatprep.mubr.bf16.mxu1 %v9333_v46  ;;  %v1598_v43 = vrot.slane %v5025_v40, %v6906_v35 }
 0x1c3   :  { %1919 = vmatpush1.bf16.msra.mxu1 %v6194_v51  ;;  %v7817_v51 = vrot.slane %v2008_v17, %v6906_v35 }
 0x1c5   :  { %5989 = vmatpush3.bf16.msra.mxu0 %v7142_v56  ;;  %v6199_v56 = vld [vmem:[%s9191_s3 + $0x144] ss:$16 sps:$4 sm:$0xff]  }
 0x1c6   :  { %5990 = vmatprep.subr.bf16.mxu0 %v9332_v44  ;;  %1920 = vmatprep.subr.bf16.mxu1 %v6199_v56 }
 0x1c9   :  { %5991 = vmatpush3.bf16.msra.mxu0 %v7154_v48  ;;  %v6197_v48 = vld [vmem:[%s9191_s3 + $0x140] ss:$16 sps:$4 sm:$0xff]  }
 0x1ca   :  { %5992 = vmatprep.subr.bf16.mxu0 %v9332_v44  ;;  %1921 = vmatpush1.bf16.msra.mxu1 %v6197_v48 }
 0x1cd   :  { %5993 = vmatpush3.bf16.msra.mxu0 %v7164_v2  ;;  %v6202_v2 = vld [vmem:[%s9191_s3 + $0x124] ss:$16 sps:$4 sm:$0xff]  }
 0x1ce   :  { %5994 = vmatprep.subr.bf16.mxu0 %v9332_v44  ;;  %1922 = vmatprep.subr.bf16.mxu1 %v6202_v2 }
 0x1d1   :  { %5995 = vmatpush3.bf16.msra.mxu0 %v7173_v4  ;;  %v6200_v4 = vld [vmem:[%s9191_s3 + $0x120] ss:$16 sps:$4 sm:$0xff]  }
 0x1d2   :  { %5996 = vmatprep.subr.bf16.mxu0 %v9332_v44  ;;  %1923 = vmatpush1.bf16.msra.mxu1 %v6200_v4 }
 0x1d5   :  { %5997 = vmatpush3.bf16.msra.mxu0 %v7182_v6  ;;  %v6205_v6 = vld [vmem:[%s9191_s3 + $0x104] ss:$16 sps:$4 sm:$0xff]  }
 0x1d6   :  { %5998 = vmatprep.subr.bf16.mxu0 %v9332_v44  ;;  %1924 = vmatprep.subr.bf16.mxu1 %v6205_v6 }
 0x1d9   :  { %5999 = vmatpush3.bf16.msra.mxu0 %v7191_v10  ;;  %v6203_v10 = vld [vmem:[%s9191_s3 + $0x100] ss:$16 sps:$4 sm:$0xff]  }
 0x1da   :  { %6000 = vmatprep.subr.bf16.mxu0 %v9332_v44  ;;  %1925 = vmatpush1.bf16.msra.mxu1 %v6203_v10 }
 0x1dd   :  { %6001 = vmatpush3.bf16.msra.mxu0 %v7201_v14  ;;  %v6208_v14 = vld [vmem:[%s9191_s3 + $0x16c] ss:$16 sps:$4 sm:$0xff]  }
 0x1de   :  { %5655 = vmatprep.subr.bf16.mxu0 %v7412_v49  ;;  %1959 = vmatprep.subr.bf16.mxu1 %v6208_v14 }
 0x1e0   :  { %6003 = vmatmul.mubr.bf16.vlgmr.msra.gmra.mxu0 %v1598_v43 }
 0x1e1   :  { %5656 = vmatpush3.bf16.msra.mxu0 %v7426_v0  ;;  %2105 = vmatprep.mubr.bf16.mxu0 %v7814_v39 }
 0x1e2   :  { %5657 = vmatprep.subr.bf16.mxu0 %v7438_v12 }
 0x1e5   :  { %5658 = vmatpush3.bf16.msra.mxu0 %v7450_v18 }
 0x1e6   :  { %5659 = vmatprep.subr.bf16.mxu0 %v7462_v27 }
 0x1e9   :  { %5660 = vmatpush3.bf16.msra.mxu0 %v7474_v1 }
 0x1ea   :  { %5661 = vmatprep.subr.bf16.mxu0 %v7486_v5 }
 0x1ed   :  { %5662 = vmatpush3.bf16.msra.mxu0 %v7498_v9 }
 0x1ee   :  { %5663 = vmatprep.subr.bf16.mxu0 %v7510_v28 }
 0x1f1   :  { %5664 = vmatpush3.bf16.msra.mxu0 %v7524_v34 }
 0x1f2   :  { %5665 = vmatprep.subr.bf16.mxu0 %v7536_v37 }
 0x1f5   :  { %5666 = vmatpush3.bf16.msra.mxu0 %v7551_v52 }
 0x1f6   :  { %5667 = vmatprep.subr.bf16.mxu0 %v7563_v55 }
 0x1f9   :  { %5668 = vmatpush3.bf16.msra.mxu0 %v7579_v61 }
 0x1fa   :  { %5669 = vmatprep.subr.bf16.mxu0 %v7591_v63 }
 0x1fd   :  { %5670 = vmatpush3.bf16.msra.mxu0 %v7604_v24 }
 0x1fe   :  { %5699 = vmatprep.subr.bf16.mxu0 %v7616_v41 }
 0x200   :  { %2106 = vmatmul.mubr.bf16.vlgmr.msra.gmra.mxu0 %v7817_v51 }
 0x201   :  { %5700 = vmatpush3.bf16.msra.mxu0 %v7628_v25 }
 0x202   :  { %5701 = vmatprep.subr.bf16.mxu0 %v7640_v33 }
 0x205   :  { %5702 = vmatpush3.bf16.msra.mxu0 %v7652_v23 }
 0x206   :  { %5703 = vmatprep.subr.bf16.mxu0 %v7664_v60 }
 0x209   :  { %5704 = vmatpush3.bf16.msra.mxu0 %v7676_v59 }
 0x20a   :  { %5705 = vmatprep.subr.bf16.mxu0 %v7688_v38 }
 0x20d   :  { %5706 = vmatpush3.bf16.msra.mxu0 %v7700_v57 }
 0x20e   :  { %5707 = vmatprep.subr.bf16.mxu0 %v7712_v62 }
 0x211   :  { %5708 = vmatpush3.bf16.msra.mxu0 %v7724_v58 }
 0x230   :  { %v1318_v11 = vpop.f32.mrf.mxu0  ;;  %v1359_v13 = vpop.f32.mrf.mxu1 }
 0x232   :  { %v1320_v19 = vpop.f32.mrf.mxu0  ;;  %v1361_v21 = vpop.f32.mrf.mxu1 }
 0x234   :  { %v1322_v50 = vpop.f32.mrf.mxu0  ;;  %v1363_v22 = vpop.f32.mrf.mxu1 }
 0x236   :  { %v1323_v40 = vpop.f32.mrf.mxu0  ;;  %v1364_v43 = vpop.f32.mrf.mxu1 }
 0x237   :  { %v7859_v40 = vld [vmem:[%s9189_s1 + $0x108] sm:$0xff]  }
 0x238   :  { %9339 = vst [vmem:[#allocation31_spill] sm:$0xff] %v7859_v40 }
 0x240   :  { %v1483_v53 = vpop.f32.mrf.mxu0  ;;  %v1524_v56 = vpop.f32.mrf.mxu1 }
 0x241   :  { %v7825_v48 = vadd.f32 %v1483_v53, %v1318_v11  ;;  %v7827_v2 = vadd.f32 %v1524_v56, %v1359_v13  ;;  %v7841_v11 = vld [vmem:[%s9189_s1 + $0x150] sm:$0xff]   ;;  %v7866_v53 = vld [vmem:[%s9189_s1 + $0x140] sm:$0xff]  }
 0x242   :  { %v1485_v4 = vpop.f32.mrf.mxu0  ;;  %v1526_v6 = vpop.f32.mrf.mxu1  ;;  %9336 = vst [vmem:[#allocation28_spill] sm:$0xff] %v7841_v11  ;;  %5709 = vmatprep.subr.bf16.mxu0 %v7841_v11  ;;  %v7847_v13 = vld [vmem:[%s9189_s1 + $0x110] sm:$0xff]   ;;  %9340 = vst [vmem:[#allocation32_spill] sm:$0xff] %v7866_v53 }
 0x243   :  { %9334 = vst [vmem:[#allocation26_spill] sm:$0xff] %v7827_v2  ;;  %v7831_v10 = vadd.f32 %v1485_v4, %v1320_v19  ;;  %v7833_v14 = vadd.f32 %v1526_v6, %v1361_v21  ;;  %9337 = vst [vmem:[#allocation29_spill] sm:$0xff] %v7847_v13  ;;  %5710 = vmatpush3.bf16.msra.mxu0 %v7847_v13  ;;  %v7853_v19 = vld [vmem:[%s9189_s1 + $0x148] sm:$0xff]   ;;  %v2001_v21 = vcombine.high %v5060_v15, %v5060_v15  ;;  %v7872_v15 = vld [vmem:[%s9189_s1 + $0x100] sm:$0xff]  }
 0x244   :  { %v1487_v17 = vpop.f32.mrf.mxu0  ;;  %v1528_v31 = vpop.f32.mrf.mxu1  ;;  %9338 = vst [vmem:[#allocation30_spill] sm:$0xff] %v7853_v19  ;;  %5711 = vmatprep.subr.bf16.mxu0 %v7853_v19  ;;  %9341 = vst [vmem:[#allocation33_spill] sm:$0xff] %v7872_v15 }
 0x245   :  { %9335 = vst [vmem:[#allocation27_spill] sm:$0xff] %v7833_v14  ;;  %v2015_v43 = vrot.slane %v2001_v21, %v6906_v35  ;;  %v7887_v17 = vld [vmem:[%s9189_s1 + $0x238] sm:$0xff]   ;;  %v7896_v31 = vld [vmem:[%s9189_s1 + $0x230] sm:$0xff]   ;;  %v7903_v21 = vld [vmem:[%s9189_s1 + $0x228] sm:$0xff]  }
 0x246   :  { %v1488_v50 = vpop.f32.mrf.mxu0  ;;  %v1529_v22 = vpop.f32.mrf.mxu1  ;;  %9342 = vst [vmem:[#allocation34_spill] sm:$0xff] %v7887_v17  ;;  %9343 = vst [vmem:[#allocation35_spill] sm:$0xff] %v7896_v31 }
 0x247   :  { %5712 = vmatpush3.bf16.msra.mxu0 %v7859_v40  ;;  %v2017_v56 = vcombine.high %v2015_v43, %v2015_v43  ;;  %v7880_v6 = vrot.slane %v2015_v43, %v6906_v35  ;;  %9344 = vst [vmem:[#allocation36_spill] sm:$0xff] %v7903_v21 }
 0x248   :  { %5713 = vmatprep.subr.bf16.mxu0 %v7866_v53 }
 0x249   :  { %v7876_v4 = vrot.slane %v2017_v56, %v6906_v35 }
 0x24b   :  { %5714 = vmatpush3.bf16.msra.mxu0 %v7872_v15  ;;  %2185 = vmatprep.mubr.bf16.mxu0 %v7876_v4 }
 0x24c   :  { %6006 = vmatprep.subr.bf16.mxu0 %v9332_v44 }
 0x24e   :  { %2186 = vmatmul.mubr.bf16.vlgmr.msra.gmra.mxu0 %v7880_v6 }
 0x24f   :  { %6007 = vmatpush3.bf16.msra.mxu0 %v7887_v17  ;;  %6022 = vmatprep.mubr.msk.bf16.mxu0 %vm6682_vm0, %v9332_v44 }
 0x250   :  { %6008 = vmatprep.subr.bf16.mxu0 %v9332_v44 }
 0x253   :  { %6009 = vmatpush3.bf16.msra.mxu0 %v7896_v31  ;;  %v7910_v31 = vld [vmem:[%s9189_s1 + $0x220] sm:$0xff]  }
 0x254   :  { %6010 = vmatprep.subr.bf16.mxu0 %v9332_v44  ;;  %9345 = vst [vmem:[#allocation37_spill] sm:$0xff] %v7910_v31 }
 0x257   :  { %6011 = vmatpush3.bf16.msra.mxu0 %v7903_v21  ;;  %v7917_v21 = vld [vmem:[%s9189_s1 + $0x218] sm:$0xff]  }
 0x258   :  { %6012 = vmatprep.subr.bf16.mxu0 %v9332_v44  ;;  %9346 = vst [vmem:[#allocation38_spill] sm:$0xff] %v7917_v21 }
 0x25b   :  { %6013 = vmatpush3.bf16.msra.mxu0 %v7910_v31 }
 0x25c   :  { %6014 = vmatprep.subr.bf16.mxu0 %v9332_v44 }
 0x25f   :  { %6015 = vmatpush3.bf16.msra.mxu0 %v7917_v21 }
 0x260   :  { %v5574_v50 = vpop.f32.mrf.mxu0  ;;  %v5596_v22 = vpop.f32.mrf.mxu1  ;;  %6016 = vmatprep.subr.bf16.mxu0 %v9332_v44 }
 0x262   :  { %v5575_v43 = vpop.f32.mrf.mxu0  ;;  %v5597_v56 = vpop.f32.mrf.mxu1 }
 0x264   :  { %v5577_v14 = vpop.f32.mrf.mxu0  ;;  %v5599_v2 = vpop.f32.mrf.mxu1 }
 0x265   :  { %v7924_v2 = vld [vmem:[%s9189_s1 + $0x210] sm:$0xff]   ;;  %v7931_v14 = vld [vmem:[%s9189_s1 + $0x208] sm:$0xff]  }
 0x266   :  { %v5578_v17 = vpop.f32.mrf.mxu0  ;;  %v5600_v15 = vpop.f32.mrf.mxu1  ;;  %9347 = vst [vmem:[#allocation39_spill] sm:$0xff] %v7924_v2  ;;  %6017 = vmatpush3.bf16.msra.mxu0 %v7924_v2  ;;  %9348 = vst [vmem:[#allocation40_spill] sm:$0xff] %v7931_v14 }
 0x267   :  { %6018 = vmatprep.subr.bf16.mxu0 %v9332_v44  ;;  %v5062_v15 = vld.sshfl [vmem:[%s9190_s0 + $0x23] sm:$0x1 pattern:$0x75316420] }
 0x268   :  { %v7941_v17 = vld [vmem:[%s9189_s1 + $0x200] sm:$0xff]   ;;  %v2063_v2 = vrot.slane %v5062_v15, %v6906_v35 }
 0x269   :  { %9349 = vst [vmem:[#allocation41_spill] sm:$0xff] %v7941_v17 }
 0x26a   :  { %6019 = vmatpush3.bf16.msra.mxu0 %v7931_v14 }
 0x26b   :  { %6020 = vmatprep.subr.bf16.mxu0 %v9332_v44 }
 0x26e   :  { %6021 = vmatpush3.bf16.msra.mxu0 %v7941_v17 }
 0x26f   :  { %5752 = vmatprep.subr.bf16.mxu0 %v7412_v49 }
 0x271   :  { %6023 = vmatmul.mubr.bf16.vlgmr.msra.gmra.mxu0 %v2063_v2 }
 0x272   :  { %5753 = vmatpush3.bf16.msra.mxu0 %v7426_v0 }
 0x273   :  { %5754 = vmatprep.subr.bf16.mxu0 %v7438_v12 }
 0x276   :  { %5755 = vmatpush3.bf16.msra.mxu0 %v7450_v18 }
 0x277   :  { %5756 = vmatprep.subr.bf16.mxu0 %v7462_v27 }
 0x27a   :  { %5757 = vmatpush3.bf16.msra.mxu0 %v7474_v1  ;;  %v5576_v1 = vadd.f32 %v5575_v43, %v5574_v50 }
 0x27b   :  { %5758 = vmatprep.subr.bf16.mxu0 %v7486_v5 }
 0x27e   :  { %5759 = vmatpush3.bf16.msra.mxu0 %v7498_v9 }
 0x27f   :  { %5760 = vmatprep.subr.bf16.mxu0 %v7510_v28 }
 0x280   :  { %v5618_v14 = vpop.f32.mrf.mxu0  ;;  %v5640_v21 = vpop.f32.mrf.mxu1 }
 0x282   :  { %v5619_v31 = vpop.f32.mrf.mxu0  ;;  %v5641_v44 = vpop.f32.mrf.mxu1  ;;  %5761 = vmatpush3.bf16.msra.mxu0 %v7524_v34 }
 0x283   :  { %5762 = vmatprep.subr.bf16.mxu0 %v7536_v37  ;;  %v5642_v37 = vadd.f32 %v5641_v44, %v5640_v21  ;;  %v9351_v44 = vld [vmem:[#allocation12_spill] sm:$0xff]  ;;  %v9353_v21 = vld [vmem:[#allocation15_spill] sm:$0xff] }
 0x284   :  { %v5621_v15 = vpop.f32.mrf.mxu0  ;;  %v5643_v17 = vpop.f32.mrf.mxu1 }
 0x285   :  { %v1643_v17 = vadd.f32 %v5576_v1, %v7300_v42  ;;  %v5598_v15 = vadd.f32 %v5597_v56, %v5596_v22  ;;  %v6211_v1 = vld [vmem:[%s9191_s3 + $0x14c] ss:$16 sps:$4 sm:$0xff]   ;;  %v2049_v56 = vcombine.high %v7876_v4, %v7876_v4 }
 0x286   :  { %v5622_v2 = vpop.f32.mrf.mxu0  ;;  %v5644_v0 = vpop.f32.mrf.mxu1  ;;  %5763 = vmatpush3.bf16.msra.mxu0 %v7551_v52  ;;  %v8021_v4 = vld [vmem:[%s9189_s1 + $0x198] sm:$0xff]  }
 0x287   :  { %5764 = vmatprep.subr.bf16.mxu0 %v7563_v55  ;;  %v5620_v0 = vadd.f32 %v5619_v31, %v5618_v14  ;;  %v1683_v2 = vadd.f32 %v5598_v15, %v1643_v17  ;;  %v2046_v31 = vcombine.high %v7817_v51, %v7817_v51  ;;  %v9354_v14 = vld [vmem:[#allocation16_spill] sm:$0xff]  ;;  %v9355_v17 = vld [vmem:[#allocation17_spill] sm:$0xff]  ;;  %v9356_v15 = vld [vmem:[#allocation18_spill] sm:$0xff] }
 0x288   :  { %v9360_v51 = vld [vmem:[#allocation22_spill] sm:$0xff] }
 0x289   :  { %v1723_v34 = vadd.f32 %v5620_v0, %v1683_v2  ;;  %v9357_v0 = vld [vmem:[#allocation19_spill] sm:$0xff]  ;;  %v9358_v2 = vld [vmem:[#allocation20_spill] sm:$0xff] }
 0x28a   :  { %5765 = vmatpush3.bf16.msra.mxu0 %v7579_v61 }
 0x28b   :  { %5766 = vmatprep.subr.bf16.mxu0 %v7591_v63  ;;  %v1763_v28 = vadd.f32 %v5642_v37, %v1723_v34  ;;  %v6206_v63 = vld [vmem:[%s9191_s3 + $0x168] ss:$16 sps:$4 sm:$0xff]   ;;  %v6217_v37 = vld [vmem:[%s9191_s3 + $0x10c] ss:$16 sps:$4 sm:$0xff]  }
 0x28c   :  { %v6212_v34 = vld [vmem:[%s9191_s3 + $0x128] ss:$16 sps:$4 sm:$0xff]  }
 0x28e   :  { %5767 = vmatpush3.bf16.msra.mxu0 %v7604_v24 }
 0x28f   :  { %5796 = vmatprep.subr.bf16.mxu0 %v7616_v41 }
 0x2a0   :  { %v1802_v52 = vpop.f32.mrf.mxu0 }
 0x2a1   :  { %v1803_v9 = vadd.f32 %v1802_v52, %v1763_v28  ;;  %v6209_v28 = vld [vmem:[%s9191_s3 + $0x148] ss:$16 sps:$4 sm:$0xff]  }
 0x2a2   :  { %v6004_v55 = vpop.f32.mrf.mxu0  ;;  %v6215_v52 = vld [vmem:[%s9191_s3 + $0x108] ss:$16 sps:$4 sm:$0xff]  }
 0x2a3   :  { %v1808_v50 = vmax.f32 %v1803_v9, 0.0  ;;  %v6214_v9 = vld [vmem:[%s9191_s3 + $0x12c] ss:$16 sps:$4 sm:$0xff]   ;;  %v2048_v55 = vcombine.high %v7814_v39, %v7814_v39  ;;  %v9352_v39 = vld [vmem:[#allocation14_spill] sm:$0xff] }
 0x2a4   :  { %v1805_v43 = vpop.f32.mrf.mxu0 }
 0x2a5   :  { %v1809_v42 = vpack.c.bf16 %v1808_v50, %v1808_v50  ;;  %v9359_v50 = vld [vmem:[#allocation21_spill] sm:$0xff]  ;;  %v9361_v43 = vld [vmem:[#allocation24_spill] sm:$0xff] }
 0x2a6   :  { %v6005_v22 = vpop.f32.mrf.mxu0 }
 0x2a7   :  { %5058 = vmatmul.mubr.msk.bf16.vlgmr.msra.gmra.mxu1 %vm1280_vm1, %v1809_v42  ;;  %v8039_v22 = vld [vmem:[%s9189_s1 + $0x1c8] sm:$0xff]  }
 0x2a8   :  { %1960 = vmatpush1.bf16.msra.mxu1 %v6206_v63  ;;  %1983 = vmatprep.mubr.bf16.mxu1 %v9333_v46  ;;  %v9350_v63 = vld [vmem:[#allocation11_spill] sm:$0xff]  ;;  %9365 = vst [vmem:[#allocation15_spill] sm:$0xff] %v8039_v22 }
 0x2a9   :  { %1961 = vmatprep.subr.bf16.mxu1 %v6211_v1  ;;  %9362 = vst [vmem:[#allocation11_spill] sm:$0xff] %v8021_v4  ;;  %v8033_v1 = vld [vmem:[%s9189_s1 + $0x190] sm:$0xff]  }
 0x2aa   :  { %9364 = vst [vmem:[#allocation14_spill] sm:$0xff] %v8033_v1 }
 0x2ac   :  { %1962 = vmatpush1.bf16.msra.mxu1 %v6209_v28  ;;  %v8045_v28 = vld [vmem:[%s9189_s1 + $0x188] sm:$0xff]  }
 0x2ad   :  { %1963 = vmatprep.subr.bf16.mxu1 %v6214_v9  ;;  %9366 = vst [vmem:[#allocation16_spill] sm:$0xff] %v8045_v28  ;;  %v8051_v9 = vld [vmem:[%s9189_s1 + $0x1c0] sm:$0xff]  }
 0x2ae   :  { %9367 = vst [vmem:[#allocation17_spill] sm:$0xff] %v8051_v9 }
 0x2b0   :  { %1964 = vmatpush1.bf16.msra.mxu1 %v6212_v34  ;;  %v2047_v34 = vcombine.high %v7880_v6, %v7880_v6 }
 0x2b1   :  { %1965 = vmatprep.subr.bf16.mxu1 %v6217_v37  ;;  %v8059_v37 = vld [vmem:[%s9189_s1 + $0x180] sm:$0xff]  }
 0x2b4   :  { %1966 = vmatpush1.bf16.msra.mxu1 %v6215_v52 }
 0x2b5   :  { %5677 = vmatprep.subr.bf16.mxu1 %v7418_v45 }
 0x2b7   :  { %5059 = vmatmul.mubr.msk.bf16.vlgmr.msra.gmra.mxu1 %vm1280_vm1, %v1809_v42  ;;  %v8027_v42 = vld [vmem:[%s9189_s1 + $0x1d0] sm:$0xff]  }
 0x2b8   :  { %5678 = vmatpush3.bf16.msra.mxu1 %v7432_v8  ;;  %2145 = vmatprep.mubr.bf16.mxu1 %v2048_v55  ;;  %9363 = vst [vmem:[#allocation12_spill] sm:$0xff] %v8027_v42 }
 0x2b9   :  { %5679 = vmatprep.subr.bf16.mxu1 %v7444_v16 }
 0x2bc   :  { %5680 = vmatpush3.bf16.msra.mxu1 %v7456_v20 }
 0x2bd   :  { %5681 = vmatprep.subr.bf16.mxu1 %v7468_v30 }
 0x2c0   :  { %5682 = vmatpush3.bf16.msra.mxu1 %v7480_v3  ;;  %v5671_v52 = vpop.f32.mrf.mxu0 }
 0x2c1   :  { %5683 = vmatprep.subr.bf16.mxu1 %v7492_v7 }
 0x2c2   :  { %v5672_v55 = vpop.f32.mrf.mxu0 }
 0x2c4   :  { %5684 = vmatpush3.bf16.msra.mxu1 %v7504_v26 }
 0x2c5   :  { %5685 = vmatprep.subr.bf16.mxu1 %v7516_v32 }
 0x2c8   :  { %5686 = vmatpush3.bf16.msra.mxu1 %v7530_v36 }
 0x2c9   :  { %5687 = vmatprep.subr.bf16.mxu1 %v7542_v47 }
 0x2cc   :  { %5688 = vmatpush3.bf16.msra.mxu1 %v7557_v54 }
 0x2cd   :  { %5689 = vmatprep.subr.bf16.mxu1 %v9350_v63 }
 0x2d0   :  { %5690 = vmatpush3.bf16.msra.mxu1 %v9351_v44 }
 0x2d1   :  { %5691 = vmatprep.subr.bf16.mxu1 %v9352_v39 }
 0x2d4   :  { %5692 = vmatpush3.bf16.msra.mxu1 %v9353_v21 }
 0x2d5   :  { %5721 = vmatprep.subr.bf16.mxu1 %v9354_v14 }
 0x2d7   :  { %2146 = vmatmul.mubr.bf16.vlgmr.msra.gmra.mxu1 %v2046_v31  ;;  %v8063_v31 = vadd.f32 %v5672_v55, %v5671_v52 }
 0x2d8   :  { %5722 = vmatpush3.bf16.msra.mxu1 %v9355_v17  ;;  %2225 = vmatprep.mubr.bf16.mxu1 %v2049_v56  ;;  %v5674_v56 = vpop.f32.mrf.mxu0 }
 0x2d9   :  { %5723 = vmatprep.subr.bf16.mxu1 %v9356_v15  ;;  %v6230_v56 = vld [vmem:[%s9191_s3 + $0x184] ss:$16 sps:$4 sm:$0xff]  }
 0x2dc   :  { %5724 = vmatpush3.bf16.msra.mxu1 %v9357_v0 }
 0x2dd   :  { %5725 = vmatprep.subr.bf16.mxu1 %v9358_v2 }
 0x2e0   :  { %5726 = vmatpush3.bf16.msra.mxu1 %v9359_v50 }
 0x2e1   :  { %5727 = vmatprep.subr.bf16.mxu1 %v9360_v51 }
 0x2e4   :  { %5728 = vmatpush3.bf16.msra.mxu1 %v7706_v29 }
 0x2e5   :  { %5729 = vmatprep.subr.bf16.mxu1 %v9361_v43 }
 0x2e8   :  { %5730 = vmatpush3.bf16.msra.mxu1 %v8021_v4  ;;  %v6219_v4 = vld [vmem:[%s9191_s3 + $0x1e0] ss:$16 sps:$4 sm:$0xff]  }
 0x2e9   :  { %5731 = vmatprep.subr.bf16.mxu1 %v8027_v42 }
 0x2ec   :  { %5732 = vmatpush3.bf16.msra.mxu1 %v8033_v1 }
 0x2ed   :  { %5733 = vmatprep.subr.bf16.mxu1 %v8039_v22 }
 0x2f0   :  { %5734 = vmatpush3.bf16.msra.mxu1 %v8045_v28  ;;  %v5675_v28 = vpop.f32.mrf.mxu0 }
 0x2f1   :  { %5735 = vmatprep.subr.bf16.mxu1 %v8051_v9  ;;  %v6224_v28 = vld [vmem:[%s9191_s3 + $0x1c4] ss:$16 sps:$4 sm:$0xff]  }
 0x2f4   :  { %5736 = vmatpush3.bf16.msra.mxu1 %v8059_v37 }
 0x2f7   :  { %2226 = vmatmul.mubr.bf16.vlgmr.msra.gmra.mxu1 %v2047_v34  ;;  %v6221_v34 = vld [vmem:[%s9191_s3 + $0x1e4] ss:$16 sps:$4 sm:$0xff]  }
 0x2f8   :  { %2407 = vmatprep.mubr.bf16.mxu1 %v9333_v46  ;;  %2383 = vmatprep.subr.bf16.mxu1 %v6221_v34  ;;  %v6228_v34 = vld [vmem:[%s9191_s3 + $0x180] ss:$16 sps:$4 sm:$0xff]  }
 0x2f9   :  { %2384 = vmatpush1.bf16.msra.mxu1 %v6219_v4  ;;  %v6225_v4 = vld [vmem:[%s9191_s3 + $0x1a0] ss:$16 sps:$4 sm:$0xff]  }
 0x2fa   :  { %2385 = vmatprep.subr.bf16.mxu1 %v6224_v28  ;;  %v6233_v28 = vld [vmem:[%s9191_s3 + $0x1ec] ss:$16 sps:$4 sm:$0xff]  }
 0x30e   :  { %v5715_v9 = vpop.f32.mrf.mxu0 }
 0x310   :  { %v5716_v22 = vpop.f32.mrf.mxu0 }
 0x311   :  { %v8065_v1 = vadd.f32 %v5716_v22, %v5715_v9  ;;  %v6222_v22 = vld [vmem:[%s9191_s3 + $0x1c0] ss:$16 sps:$4 sm:$0xff]   ;;  %v6227_v9 = vld [vmem:[%s9191_s3 + $0x1a4] ss:$16 sps:$4 sm:$0xff]  }
 0x312   :  { %v5718_v6 = vpop.f32.mrf.mxu0  ;;  %2386 = vmatpush1.bf16.msra.mxu1 %v6222_v22  ;;  %v5097_v22 = vld [vmem:[%s9190_s0 + $0x24] sm:$0xff] }
 0x313   :  { %2387 = vmatprep.subr.bf16.mxu1 %v6227_v9  ;;  %v2473_v9 = vrot.slane %v5097_v22, %v6906_v35 }
 0x314   :  { %v5719_v42 = vpop.f32.mrf.mxu0 }
 0x316   :  { %2388 = vmatpush1.bf16.msra.mxu1 %v6225_v4 }
 0x317   :  { %2389 = vmatprep.subr.bf16.mxu1 %v6230_v56 }
 0x31a   :  { %2390 = vmatpush1.bf16.msra.mxu1 %v6228_v34 }
 0x31b   :  { %2424 = vmatprep.subr.bf16.mxu1 %v6233_v28 }
 0x331   :  { %v8079_v42 = vpop.f32.mrf.mxu0 }
 0x333   :  { %v6024_v52 = vpop.f32.mrf.mxu0 }
 0x334   :  { %v2481_v52 = vcombine.high %v2473_v9, %v2473_v9 }
 0x335   :  { %v2270_v55 = vpop.f32.mrf.mxu0 }
 0x336   :  { %v8101_v4 = vrot.slane %v2481_v52, %v6906_v35  ;;  %v8104_v55 = vrot.slane %v2473_v9, %v6906_v35  ;;  %v2466_v52 = vcombine.high %v5097_v22, %v5097_v22 }
 0x337   :  { %v6025_v6 = vpop.f32.mrf.mxu0 }
 0x338   :  { %2570 = vmatprep.mubr.bf16.mxu0 %v8101_v4 }
 0x339   :  { %2571 = vmatmul.mubr.bf16.vlgmr.msra.gmra.mxu0 %v8104_v55 }
 0x33a   :  { %5797 = vmatpush3.bf16.msra.mxu0 %v7628_v25 }
 0x33b   :  { %5798 = vmatprep.subr.bf16.mxu0 %v7640_v33 }
 0x33e   :  { %5799 = vmatpush3.bf16.msra.mxu0 %v7652_v23 }
 0x33f   :  { %5800 = vmatprep.subr.bf16.mxu0 %v7664_v60 }
 0x342   :  { %5801 = vmatpush3.bf16.msra.mxu0 %v7676_v59 }
 0x343   :  { %5802 = vmatprep.subr.bf16.mxu0 %v7688_v38 }
 0x346   :  { %5803 = vmatpush3.bf16.msra.mxu0 %v7700_v57 }
 0x347   :  { %5804 = vmatprep.subr.bf16.mxu0 %v7712_v62 }
 0x34a   :  { %5805 = vmatpush3.bf16.msra.mxu0 %v7724_v58  ;;  %v2480_v58 = vrot.slane %v2466_v52, %v6906_v35 }
 0x34b   :  { %5806 = vmatprep.subr.bf16.mxu0 %v7841_v11 }
 0x34c   :  { %v2482_v11 = vcombine.high %v2480_v58, %v2480_v58 }
 0x34e   :  { %5807 = vmatpush3.bf16.msra.mxu0 %v7847_v13  ;;  %v9377_v13 = vld [vmem:[#allocation37_spill] sm:$0xff] }
 0x34f   :  { %5808 = vmatprep.subr.bf16.mxu0 %v7853_v19 }
 0x352   :  { %5809 = vmatpush3.bf16.msra.mxu0 %v7859_v40 }
 0x353   :  { %5810 = vmatprep.subr.bf16.mxu0 %v7866_v53 }
 0x367   :  { %v1944_v56 = vpop.f32.mrf.mxu1 }
 0x368   :  { %v8119_v6 = vadd.f32 %v1944_v56, %v7825_v48  ;;  %v9368_v48 = vld [vmem:[#allocation33_spill] sm:$0xff]  ;;  %v8131_v56 = vrot.slane %v2482_v11, %v6906_v35 }
 0x369   :  { %v1946_v34 = vpop.f32.mrf.mxu1  ;;  %5811 = vmatpush3.bf16.msra.mxu0 %v9368_v48  ;;  %v9373_v48 = vld [vmem:[#allocation27_spill] sm:$0xff] }
 0x36a   :  { %v8122_v28 = vadd.f32 %v1946_v34, %v7831_v10  ;;  %v9369_v10 = vmov 0.0   ;;  %v8135_v34 = vrot.slane %v2480_v58, %v6906_v35  ;;  %2650 = vmatprep.mubr.bf16.mxu0 %v8131_v56  ;;  %v9375_v58 = vld [vmem:[#allocation35_spill] sm:$0xff] }
 0x36b   :  { %v1948_v9 = vpop.f32.mrf.mxu1  ;;  %6026 = vmatprep.subr.bf16.mxu0 %v9369_v10 }
 0x36c   :  { %2651 = vmatmul.mubr.bf16.vlgmr.msra.gmra.mxu0 %v8135_v34  ;;  %v9371_v9 = vld [vmem:[#allocation26_spill] sm:$0xff] }
 0x36d   :  { %v1949_v57 = vpop.f32.mrf.mxu1  ;;  %6042 = vmatprep.mubr.msk.bf16.mxu0 %vm6682_vm0, %v9369_v10 }
 0x36e   :  { %v9370_v57 = vld [vmem:[#allocation34_spill] sm:$0xff] }
 0x36f   :  { %6027 = vmatpush3.bf16.msra.mxu0 %v9370_v57  ;;  %v9376_v57 = vld [vmem:[#allocation36_spill] sm:$0xff] }
 0x370   :  { %6028 = vmatprep.subr.bf16.mxu0 %v9369_v10 }
 0x373   :  { %6029 = vmatpush3.bf16.msra.mxu0 %v9375_v58  ;;  %v9384_v58 = vld [vmem:[#allocation5_spill] sm:$0xff] }
 0x374   :  { %6030 = vmatprep.subr.bf16.mxu0 %v9369_v10 }
 0x377   :  { %v1985_v22 = vpop.f32.mrf.mxu1  ;;  %6031 = vmatpush3.bf16.msra.mxu0 %v9376_v57 }
 0x378   :  { %v8144_v11 = vadd.f32 %v1985_v22, %v9371_v9  ;;  %6032 = vmatprep.subr.bf16.mxu0 %v9369_v10  ;;  %v9378_v22 = vld [vmem:[#allocation38_spill] sm:$0xff]  ;;  %v9381_v9 = vld [vmem:[#allocation41_spill] sm:$0xff] }
 0x379   :  { %v1987_v52 = vpop.f32.mrf.mxu1 }
 0x37a   :  { %9372 = vst [vmem:[#allocation18_spill] sm:$0xff] %v8144_v11  ;;  %v8147_v53 = vadd.f32 %v1987_v52, %v9373_v48  ;;  %v9379_v48 = vld [vmem:[#allocation39_spill] sm:$0xff] }
 0x37b   :  { %v1989_v40 = vpop.f32.mrf.mxu1  ;;  %6033 = vmatpush3.bf16.msra.mxu0 %v9377_v13  ;;  %v9386_v11 = vld [vmem:[#allocation7_spill] sm:$0xff] }
 0x37c   :  { %9374 = vst [vmem:[#allocation19_spill] sm:$0xff] %v8147_v53  ;;  %6034 = vmatprep.subr.bf16.mxu0 %v9369_v10  ;;  %v9380_v40 = vld [vmem:[#allocation40_spill] sm:$0xff]  ;;  %v9385_v53 = vld [vmem:[#allocation6_spill] sm:$0xff] }
 0x37d   :  { %v1990_v19 = vpop.f32.mrf.mxu1 }
 0x37e   :  { %v5099_v19 = vld.sshfl [vmem:[%s9190_s0 + $0x2c] sm:$0x1 pattern:$0x75316420] }
 0x37f   :  { %6035 = vmatpush3.bf16.msra.mxu0 %v9378_v22  ;;  %v2528_v52 = vrot.slane %v5099_v19, %v6906_v35  ;;  %v9382_v22 = vld [vmem:[#allocation3_spill] sm:$0xff] }
 0x380   :  { %6036 = vmatprep.subr.bf16.mxu0 %v9369_v10 }
 0x383   :  { %6037 = vmatpush3.bf16.msra.mxu0 %v9379_v48 }
 0x384   :  { %6038 = vmatprep.subr.bf16.mxu0 %v9369_v10 }
 0x387   :  { %6039 = vmatpush3.bf16.msra.mxu0 %v9380_v40  ;;  %v8172_v40 = vld [vmem:[%s9192_s2] ss:$0 sm:$0xff] }
 0x388   :  { %6040 = vmatprep.subr.bf16.mxu0 %v9369_v10  ;;  %v2108_v57 = vadd.f32 %v8172_v40, %v8063_v31  ;;  %v9389_v31 = vld [vmem:[#allocation10_spill] sm:$0xff] }
 0x38b   :  { %6041 = vmatpush3.bf16.msra.mxu0 %v9381_v9 }
 0x38c   :  { %5849 = vmatprep.subr.bf16.mxu0 %v7412_v49 }
 0x38e   :  { %6043 = vmatmul.mubr.bf16.vlgmr.msra.gmra.mxu0 %v2528_v52 }
 0x38f   :  { %5850 = vmatpush3.bf16.msra.mxu0 %v9382_v22 }
 0x390   :  { %5851 = vmatprep.subr.bf16.mxu0 %v7438_v12  ;;  %v9383_v12 = vld [vmem:[#allocation4_spill] sm:$0xff] }
 0x393   :  { %5852 = vmatpush3.bf16.msra.mxu0 %v7450_v18  ;;  %v9388_v18 = vld [vmem:[#allocation9_spill] sm:$0xff] }
 0x394   :  { %5853 = vmatprep.subr.bf16.mxu0 %v7462_v27  ;;  %v9390_v27 = vld [vmem:[#allocation13_spill] sm:$0xff] }
 0x397   :  { %v5693_v48 = vpop.f32.mrf.mxu1  ;;  %5854 = vmatpush3.bf16.msra.mxu0 %v9383_v12  ;;  %v2513_v12 = vcombine.high %v8101_v4, %v8101_v4 }
 0x398   :  { %5855 = vmatprep.subr.bf16.mxu0 %v7486_v5 }
 0x399   :  { %v5694_v13 = vpop.f32.mrf.mxu1 }
 0x39a   :  { %v5695_v9 = vadd.f32 %v5694_v13, %v5693_v48  ;;  %v9387_v13 = vld [vmem:[#allocation8_spill] sm:$0xff] }
 0x39b   :  { %v5696_v19 = vpop.f32.mrf.mxu1  ;;  %5856 = vmatpush3.bf16.msra.mxu0 %v9384_v58 }
 0x39c   :  { %v2148_v49 = vadd.f32 %v5695_v9, %v2108_v57  ;;  %5857 = vmatprep.subr.bf16.mxu0 %v9385_v53  ;;  %v6231_v19 = vld [vmem:[%s9191_s3 + $0x1e8] ss:$16 sps:$4 sm:$0xff]  }
 0x39d   :  { %v5697_v22 = vpop.f32.mrf.mxu1 }
 0x39e   :  { %v2188_v52 = vadd.f32 %v8065_v1, %v2148_v49  ;;  %v6237_v49 = vld [vmem:[%s9191_s3 + $0x1a8] ss:$16 sps:$4 sm:$0xff]   ;;  %v6242_v22 = vld [vmem:[%s9191_s3 + $0x18c] ss:$16 sps:$4 sm:$0xff]  }
 0x39f   :  { %5858 = vmatpush3.bf16.msra.mxu0 %v9386_v11 }
 0x3a0   :  { %5859 = vmatprep.subr.bf16.mxu0 %v9387_v13 }
 0x3a3   :  { %5860 = vmatpush3.bf16.msra.mxu0 %v9388_v18  ;;  %v6253_v18 = vld [vmem:[%s9191_s3 + $0x200] ss:$16 sps:$4 sm:$0xff]  }
 0x3a4   :  { %5861 = vmatprep.subr.bf16.mxu0 %v9389_v31  ;;  %v6258_v31 = vld [vmem:[%s9191_s3 + $0x26c] ss:$16 sps:$4 sm:$0xff]  }
 0x3a7   :  { %5862 = vmatpush3.bf16.msra.mxu0 %v7579_v61 }
 0x3a8   :  { %5863 = vmatprep.subr.bf16.mxu0 %v9390_v27  ;;  %v5134_v27 = vld [vmem:[%s9190_s0 + $0x2d] sm:$0xff] }
 0x3ab   :  { %5864 = vmatpush3.bf16.msra.mxu0 %v7604_v24  ;;  %v6236_v24 = vld [vmem:[%s9191_s3 + $0x1cc] ss:$16 sps:$4 sm:$0xff]  }
 0x3ac   :  { %5893 = vmatprep.subr.bf16.mxu0 %v7616_v41  ;;  %v6234_v41 = vld [vmem:[%s9191_s3 + $0x1c8] ss:$16 sps:$4 sm:$0xff]  }
 0x3b7   :  { %v5737_v5 = vpop.f32.mrf.mxu1 }
 0x3b9   :  { %v5738_v1 = vpop.f32.mrf.mxu1 }
 0x3ba   :  { %v5739_v57 = vadd.f32 %v5738_v1, %v5737_v5  ;;  %v2938_v5 = vrot.slane %v5134_v27, %v6906_v35 }
 0x3bb   :  { %v5740_v53 = vpop.f32.mrf.mxu1 }
 0x3bc   :  { %v2228_v58 = vadd.f32 %v5739_v57, %v2188_v52  ;;  %v6240_v52 = vld [vmem:[%s9191_s3 + $0x188] ss:$16 sps:$4 sm:$0xff]   ;;  %v2946_v1 = vcombine.high %v2938_v5, %v2938_v5  ;;  %v8298_v53 = vrot.slane %v2938_v5, %v6906_v35 }
 0x3bd   :  { %v5741_v11 = vpop.f32.mrf.mxu1 }
 0x3be   :  { %v2268_v48 = vadd.f32 %v8079_v42, %v2228_v58  ;;  %v6239_v42 = vld [vmem:[%s9191_s3 + $0x1ac] ss:$16 sps:$4 sm:$0xff]   ;;  %v8295_v57 = vrot.slane %v2946_v1, %v6906_v35 }
 0x3bf   :  { %v9397_v58 = vld [vmem:[#allocation23_spill] sm:$0xff]  ;;  %v9398_v11 = vld [vmem:[#allocation25_spill] sm:$0xff] }
 0x3c0   :  { %v2273_v9 = vmax.f32 %v2268_v48, 0.0  ;;  %3035 = vmatprep.mubr.bf16.mxu0 %v8295_v57 }
 0x3c1   :  { %3036 = vmatmul.mubr.bf16.vlgmr.msra.gmra.mxu0 %v8298_v53 }
 0x3c2   :  { %v2274_v61 = vpack.c.bf16 %v2273_v9, %v2273_v9  ;;  %5894 = vmatpush3.bf16.msra.mxu0 %v7628_v25  ;;  %v9399_v9 = vld [vmem:[#allocation28_spill] sm:$0xff] }
 0x3c3   :  { %5895 = vmatprep.subr.bf16.mxu0 %v7640_v33 }
 0x3c4   :  { %5095 = vmatmul.mubr.msk.bf16.vlgmr.msra.gmra.mxu1 %vm1280_vm1, %v2274_v61 }
 0x3c5   :  { %2425 = vmatpush1.bf16.msra.mxu1 %v6231_v19  ;;  %2448 = vmatprep.mubr.bf16.mxu1 %v9333_v46  ;;  %v2931_v19 = vcombine.high %v5134_v27, %v5134_v27 }
 0x3c6   :  { %2426 = vmatprep.subr.bf16.mxu1 %v6236_v24  ;;  %5896 = vmatpush3.bf16.msra.mxu0 %v7652_v23 }
 0x3c7   :  { %5897 = vmatprep.subr.bf16.mxu0 %v7664_v60  ;;  %v9400_v60 = vld [vmem:[#allocation29_spill] sm:$0xff]  ;;  %v2945_v24 = vrot.slane %v2931_v19, %v6906_v35 }
 0x3c8   :  { %v6654_v19 = vld [vmem:[%s9189_s1 + $0xf8] sm:$0xff]  }
 0x3c9   :  { %2427 = vmatpush1.bf16.msra.mxu1 %v6234_v41  ;;  %v9403_v41 = vld [vmem:[#allocation32_spill] sm:$0xff] }
 0x3ca   :  { %2428 = vmatprep.subr.bf16.mxu1 %v6239_v42  ;;  %5898 = vmatpush3.bf16.msra.mxu0 %v7676_v59  ;;  %v2947_v42 = vcombine.high %v2945_v24, %v2945_v24 }
 0x3cb   :  { %5899 = vmatprep.subr.bf16.mxu0 %v7688_v38  ;;  %v9401_v38 = vld [vmem:[#allocation30_spill] sm:$0xff] }
 0x3cd   :  { %2429 = vmatpush1.bf16.msra.mxu1 %v6237_v49  ;;  %v8325_v49 = vrot.slane %v2947_v42, %v6906_v35  ;;  %v6660_v42 = vld [vmem:[%s9189_s1 + $0xe0] sm:$0xff]  }
 0x3ce   :  { %2430 = vmatprep.subr.bf16.mxu1 %v6242_v22  ;;  %5900 = vmatpush3.bf16.msra.mxu0 %v9397_v58  ;;  %v9405_v22 = vld [vmem:[#allocation34_spill] sm:$0xff] }
 0x3cf   :  { %5901 = vmatprep.subr.bf16.mxu0 %v7712_v62  ;;  %v9402_v62 = vld [vmem:[#allocation31_spill] sm:$0xff]  ;;  %3115 = vmatprep.mubr.bf16.mxu0 %v8325_v49 }
 0x3d1   :  { %2431 = vmatpush1.bf16.msra.mxu1 %v6240_v52 }
 0x3d2   :  { %5774 = vmatprep.subr.bf16.mxu1 %v7418_v45  ;;  %v2511_v45 = vcombine.high %v8104_v55, %v8104_v55  ;;  %v6250_v55 = vld [vmem:[%s9191_s3 + $0x220] ss:$16 sps:$4 sm:$0xff]   ;;  %5902 = vmatpush3.bf16.msra.mxu0 %v9398_v11 }
 0x3d3   :  { %5903 = vmatprep.subr.bf16.mxu0 %v9399_v9  ;;  %v6256_v9 = vld [vmem:[%s9191_s3 + $0x268] ss:$16 sps:$4 sm:$0xff]  }
 0x3d4   :  { %5096 = vmatmul.mubr.msk.bf16.vlgmr.msra.gmra.mxu1 %vm1280_vm1, %v2274_v61 }
 0x3d5   :  { %5775 = vmatpush3.bf16.msra.mxu1 %v7432_v8  ;;  %2610 = vmatprep.mubr.bf16.mxu1 %v2513_v12  ;;  %v2514_v8 = vcombine.high %v8131_v56, %v8131_v56  ;;  %v9406_v12 = vld [vmem:[#allocation18_spill] sm:$0xff] }
 0x3d6   :  { %5776 = vmatprep.subr.bf16.mxu1 %v7444_v16  ;;  %v9391_v16 = vld [vmem:[#allocation11_spill] sm:$0xff]  ;;  %5904 = vmatpush3.bf16.msra.mxu0 %v9400_v60 }
 0x3d7   :  { %5905 = vmatprep.subr.bf16.mxu0 %v9401_v38  ;;  %v6267_v60 = vld [vmem:[%s9191_s3 + $0x20c] ss:$16 sps:$4 sm:$0xff]   ;;  %v2978_v38 = vcombine.high %v8295_v57, %v8295_v57  ;;  %v6657_v57 = vld [vmem:[%s9189_s1 + $0xb0] sm:$0xff]  }
 0x3d9   :  { %5777 = vmatpush3.bf16.msra.mxu1 %v7456_v20  ;;  %v9392_v20 = vld [vmem:[#allocation12_spill] sm:$0xff] }
 0x3da   :  { %5778 = vmatprep.subr.bf16.mxu1 %v7468_v30  ;;  %v9393_v30 = vld [vmem:[#allocation14_spill] sm:$0xff]  ;;  %5906 = vmatpush3.bf16.msra.mxu0 %v9402_v62  ;;  %v6656_v62 = vld [vmem:[%s9189_s1 + $0xf0] sm:$0xff]  }
 0x3db   :  { %5907 = vmatprep.subr.bf16.mxu0 %v9403_v41  ;;  %v6659_v41 = vld [vmem:[%s9189_s1 + $0xa8] sm:$0xff]  }
 0x3dd   :  { %5779 = vmatpush3.bf16.msra.mxu1 %v7480_v3  ;;  %v9394_v3 = vld [vmem:[#allocation15_spill] sm:$0xff] }
 0x3de   :  { %5780 = vmatprep.subr.bf16.mxu1 %v7492_v7  ;;  %v9395_v7 = vld [vmem:[#allocation16_spill] sm:$0xff] }
 0x3e1   :  { %5781 = vmatpush3.bf16.msra.mxu1 %v7504_v26  ;;  %v9396_v26 = vld [vmem:[#allocation17_spill] sm:$0xff] }
 0x3e2   :  { %5782 = vmatprep.subr.bf16.mxu1 %v7516_v32  ;;  %v2512_v32 = vcombine.high %v8135_v34, %v8135_v34  ;;  %v6255_v34 = vld [vmem:[%s9191_s3 + $0x204] ss:$16 sps:$4 sm:$0xff]  }
 0x3e5   :  { %5783 = vmatpush3.bf16.msra.mxu1 %v7530_v36 }
 0x3e6   :  { %5784 = vmatprep.subr.bf16.mxu1 %v7542_v47 }
 0x3e9   :  { %5785 = vmatpush3.bf16.msra.mxu1 %v7557_v54 }
 0x3ea   :  { %5786 = vmatprep.subr.bf16.mxu1 %v9350_v63 }
 0x3ed   :  { %5787 = vmatpush3.bf16.msra.mxu1 %v9351_v44 }
 0x3ee   :  { %5788 = vmatprep.subr.bf16.mxu1 %v9352_v39 }
 0x3f1   :  { %5789 = vmatpush3.bf16.msra.mxu1 %v9353_v21 }
 0x3f2   :  { %5818 = vmatprep.subr.bf16.mxu1 %v9354_v14 }
 0x3f4   :  { %2611 = vmatmul.mubr.bf16.vlgmr.msra.gmra.mxu1 %v2511_v45 }
 0x3f5   :  { %5819 = vmatpush3.bf16.msra.mxu1 %v9355_v17  ;;  %2690 = vmatprep.mubr.bf16.mxu1 %v2514_v8 }
 0x3f6   :  { %5820 = vmatprep.subr.bf16.mxu1 %v9356_v15  ;;  %v6244_v15 = vld [vmem:[%s9191_s3 + $0x260] ss:$16 sps:$4 sm:$0xff]  }
 0x3f9   :  { %5821 = vmatpush3.bf16.msra.mxu1 %v9357_v0  ;;  %v6246_v0 = vld [vmem:[%s9191_s3 + $0x264] ss:$16 sps:$4 sm:$0xff]  }
 0x3fa   :  { %5822 = vmatprep.subr.bf16.mxu1 %v9358_v2  ;;  %v6249_v2 = vld [vmem:[%s9191_s3 + $0x244] ss:$16 sps:$4 sm:$0xff]  }
 0x3fd   :  { %5823 = vmatpush3.bf16.msra.mxu1 %v9359_v50  ;;  %v6247_v50 = vld [vmem:[%s9191_s3 + $0x240] ss:$16 sps:$4 sm:$0xff]  }
 0x3fe   :  { %5824 = vmatprep.subr.bf16.mxu1 %v9360_v51 }
 0x401   :  { %5825 = vmatpush3.bf16.msra.mxu1 %v7706_v29  ;;  %v5768_v29 = vpop.f32.mrf.mxu0 }
 0x402   :  { %5826 = vmatprep.subr.bf16.mxu1 %v9361_v43  ;;  %v6252_v43 = vld [vmem:[%s9191_s3 + $0x224] ss:$16 sps:$4 sm:$0xff]  }
 0x403   :  { %v5769_v36 = vpop.f32.mrf.mxu0 }
 0x404   :  { %v8257_v47 = vadd.f32 %v5769_v36, %v5768_v29  ;;  %v9408_v36 = vld [vmem:[#allocation35_spill] sm:$0xff] }
 0x405   :  { %5827 = vmatpush3.bf16.msra.mxu1 %v9391_v16  ;;  %v5771_v54 = vpop.f32.mrf.mxu0 }
 0x406   :  { %5828 = vmatprep.subr.bf16.mxu1 %v9392_v20 }
 0x407   :  { %v5772_v63 = vpop.f32.mrf.mxu0 }
 0x409   :  { %5829 = vmatpush3.bf16.msra.mxu1 %v9393_v30 }
 0x40a   :  { %5830 = vmatprep.subr.bf16.mxu1 %v9394_v3 }
 0x40d   :  { %5831 = vmatpush3.bf16.msra.mxu1 %v9395_v7 }
 0x40e   :  { %5832 = vmatprep.subr.bf16.mxu1 %v9396_v26 }
 0x411   :  { %5833 = vmatpush3.bf16.msra.mxu1 %v8059_v37 }
 0x412   :  { %2848 = vmatprep.subr.bf16.mxu1 %v6246_v0  ;;  %v5136_v0 = vld.sshfl [vmem:[%s9190_s0 + $0x35] sm:$0x1 pattern:$0x75316420] }
 0x414   :  { %2691 = vmatmul.mubr.bf16.vlgmr.msra.gmra.mxu1 %v2512_v32  ;;  %v9407_v32 = vld [vmem:[#allocation19_spill] sm:$0xff] }
 0x415   :  { %2872 = vmatprep.mubr.bf16.mxu1 %v9333_v46  ;;  %2849 = vmatpush1.bf16.msra.mxu1 %v6244_v15  ;;  %v9413_v15 = vld [vmem:[#allocation40_spill] sm:$0xff] }
 0x416   :  { %2850 = vmatprep.subr.bf16.mxu1 %v6249_v2  ;;  %v9414_v2 = vld [vmem:[#allocation41_spill] sm:$0xff] }
 0x419   :  { %2851 = vmatpush1.bf16.msra.mxu1 %v6247_v50  ;;  %v2993_v50 = vrot.slane %v5136_v0, %v6906_v35  ;;  %v6675_v0 = vld [vmem:[%s9189_s1 + $0x1a8] sm:$0xff]  }
 0x41a   :  { %2852 = vmatprep.subr.bf16.mxu1 %v6252_v43 }
 0x41d   :  { %2853 = vmatpush1.bf16.msra.mxu1 %v6250_v55  ;;  %v2573_v55 = vadd.f32 %v8172_v40, %v8257_v47  ;;  %v6261_v47 = vld [vmem:[%s9191_s3 + $0x24c] ss:$16 sps:$4 sm:$0xff]  }
 0x41e   :  { %2854 = vmatprep.subr.bf16.mxu1 %v6255_v34 }
 0x421   :  { %2855 = vmatpush1.bf16.msra.mxu1 %v6253_v18 }
 0x422   :  { %2889 = vmatprep.subr.bf16.mxu1 %v6258_v31 }
 0x42c   :  { %v5812_v44 = vpop.f32.mrf.mxu0 }
 0x42e   :  { %v5813_v39 = vpop.f32.mrf.mxu0 }
 0x42f   :  { %v8259_v21 = vadd.f32 %v5813_v39, %v5812_v44  ;;  %v9409_v44 = vld [vmem:[#allocation36_spill] sm:$0xff]  ;;  %v9410_v39 = vld [vmem:[#allocation37_spill] sm:$0xff] }
 0x430   :  { %v5815_v14 = vpop.f32.mrf.mxu0 }
 0x431   :  { %v9411_v14 = vld [vmem:[#allocation38_spill] sm:$0xff] }
 0x432   :  { %v5816_v17 = vpop.f32.mrf.mxu0 }
 0x433   :  { %v9412_v17 = vld [vmem:[#allocation39_spill] sm:$0xff] }
 0x44e   :  { %v8273_v51 = vpop.f32.mrf.mxu0 }
 0x450   :  { %v6044_v4 = vpop.f32.mrf.mxu0 }
 0x452   :  { %v2735_v56 = vpop.f32.mrf.mxu0 }
 0x454   :  { %v6045_v13 = vpop.f32.mrf.mxu0 }
 0x484   :  { %v2409_v48 = vpop.f32.mrf.mxu1 }
 0x485   :  { %v8313_v25 = vadd.f32 %v2409_v48, %v8119_v6  ;;  %v9404_v6 = vld [vmem:[#allocation33_spill] sm:$0xff] }
 0x486   :  { %v2411_v33 = vpop.f32.mrf.mxu1  ;;  %5908 = vmatpush3.bf16.msra.mxu0 %v9404_v6  ;;  %v6661_v6 = vld [vmem:[%s9189_s1 + $0xa0] sm:$0xff]  }
 0x487   :  { %v8316_v23 = vadd.f32 %v2411_v33, %v8122_v28  ;;  %6046 = vmatprep.subr.bf16.mxu0 %v9369_v10  ;;  %v8329_v28 = vrot.slane %v2945_v24, %v6906_v35  ;;  %v6262_v33 = vld [vmem:[%s9191_s3 + $0x228] ss:$16 sps:$4 sm:$0xff]  }
 0x488   :  { %v2413_v59 = vpop.f32.mrf.mxu1  ;;  %v6658_v24 = vld [vmem:[%s9189_s1 + $0xe8] sm:$0xff]  }
 0x489   :  { %3116 = vmatmul.mubr.bf16.vlgmr.msra.gmra.mxu0 %v8329_v28  ;;  %v6265_v59 = vld [vmem:[%s9191_s3 + $0x208] ss:$16 sps:$4 sm:$0xff]  }
 0x48a   :  { %v2414_v61 = vpop.f32.mrf.mxu1  ;;  %6047 = vmatpush3.bf16.msra.mxu0 %v9405_v22  ;;  %6062 = vmatprep.mubr.msk.bf16.mxu0 %vm6682_vm0, %v9369_v10  ;;  %v6662_v22 = vld [vmem:[%s9189_s1 + $0xd8] sm:$0xff]  }
 0x48b   :  { %6048 = vmatprep.subr.bf16.mxu0 %v9369_v10  ;;  %v6655_v61 = vld [vmem:[%s9189_s1 + $0xb8] sm:$0xff]  }
 0x48e   :  { %6049 = vmatpush3.bf16.msra.mxu0 %v9408_v36  ;;  %v6667_v36 = vld [vmem:[%s9189_s1 + $0x88] sm:$0xff]  }
 0x48f   :  { %6050 = vmatprep.subr.bf16.mxu0 %v9369_v10 }
 0x492   :  { %6051 = vmatpush3.bf16.msra.mxu0 %v9409_v44  ;;  %v6669_v44 = vld [vmem:[%s9189_s1 + $0x80] sm:$0xff]  }
 0x493   :  { %6052 = vmatprep.subr.bf16.mxu0 %v9369_v10 }
 0x494   :  { %v2450_v52 = vpop.f32.mrf.mxu1 }
 0x495   :  { %v8338_v45 = vadd.f32 %v2450_v52, %v9406_v12  ;;  %v6663_v52 = vld [vmem:[%s9189_s1 + $0x98] sm:$0xff]   ;;  %v6664_v12 = vld [vmem:[%s9189_s1 + $0xd0] sm:$0xff]  }
 0x496   :  { %v2452_v8 = vpop.f32.mrf.mxu1  ;;  %6053 = vmatpush3.bf16.msra.mxu0 %v9410_v39  ;;  %v2979_v39 = vcombine.high %v8325_v49, %v8325_v49  ;;  %v6673_v49 = vld [vmem:[%s9189_s1 + $0x1b0] sm:$0xff]  }
 0x497   :  { %v8341_v29 = vadd.f32 %v2452_v8, %v9407_v32  ;;  %6054 = vmatprep.subr.bf16.mxu0 %v9369_v10  ;;  %v6665_v8 = vld [vmem:[%s9189_s1 + $0x90] sm:$0xff]   ;;  %v6666_v32 = vld [vmem:[%s9189_s1 + $0xc8] sm:$0xff]  }
 0x498   :  { %v2454_v54 = vpop.f32.mrf.mxu1 }
 0x499   :  { %v6668_v54 = vld [vmem:[%s9189_s1 + $0xc0] sm:$0xff]  }
 0x49a   :  { %v2455_v63 = vpop.f32.mrf.mxu1  ;;  %6055 = vmatpush3.bf16.msra.mxu0 %v9411_v14  ;;  %v6670_v14 = vld [vmem:[%s9189_s1 + $0x1f8] sm:$0xff]  }
 0x49b   :  { %6056 = vmatprep.subr.bf16.mxu0 %v9369_v10  ;;  %v2976_v63 = vcombine.high %v8298_v53, %v8298_v53  ;;  %v6672_v53 = vld [vmem:[%s9189_s1 + $0x1f0] sm:$0xff]  }
 0x49e   :  { %6057 = vmatpush3.bf16.msra.mxu0 %v9412_v17  ;;  %v6671_v17 = vld [vmem:[%s9189_s1 + $0x1b8] sm:$0xff]  }
 0x49f   :  { %6058 = vmatprep.subr.bf16.mxu0 %v9369_v10 }
 0x4a2   :  { %6059 = vmatpush3.bf16.msra.mxu0 %v9413_v15  ;;  %v6674_v15 = vld [vmem:[%s9189_s1 + $0x1e8] sm:$0xff]  }
 0x4a3   :  { %6060 = vmatprep.subr.bf16.mxu0 %v9369_v10 }
 0x4a6   :  { %6061 = vmatpush3.bf16.msra.mxu0 %v9414_v2  ;;  %v6676_v2 = vld [vmem:[%s9189_s1 + $0x1e0] sm:$0xff]  }
 0x4a9   :  { %6063 = vmatmul.mubr.bf16.vlgmr.msra.gmra.mxu0 %v2993_v50  ;;  %v6677_v50 = vld [vmem:[%s9189_s1 + $0x1a0] sm:$0xff]  }
 0x4b4   :  { %v5790_v43 = vpop.f32.mrf.mxu1 }
 0x4b6   :  { %v5791_v4 = vpop.f32.mrf.mxu1 }
 0x4b7   :  { %v5792_v56 = vadd.f32 %v5791_v4, %v5790_v43  ;;  %v6678_v43 = vld [vmem:[%s9189_s1 + $0x1d8] sm:$0xff]   ;;  %v2977_v4 = vcombine.high %v8329_v28, %v8329_v28  ;;  %v6269_v28 = vld [vmem:[%s9191_s3 + $0x2e0] ss:$16 sps:$4 sm:$0xff]  }
 0x4b8   :  { %v5793_v34 = vpop.f32.mrf.mxu1 }
 0x4b9   :  { %v2613_v13 = vadd.f32 %v5792_v56, %v2573_v55  ;;  %v5865_v55 = vpop.f32.mrf.mxu0 }
 0x4ba   :  { %v5794_v18 = vpop.f32.mrf.mxu1 }
 0x4bb   :  { %v2653_v10 = vadd.f32 %v8259_v21, %v2613_v13  ;;  %v6259_v21 = vld [vmem:[%s9191_s3 + $0x248] ss:$16 sps:$4 sm:$0xff]   ;;  %v6274_v18 = vld [vmem:[%s9191_s3 + $0x2c4] ss:$16 sps:$4 sm:$0xff]  }
 0x4d4   :  { %v5834_v31 = vpop.f32.mrf.mxu1 }
 0x4d6   :  { %v5835_v27 = vpop.f32.mrf.mxu1 }
 0x4d7   :  { %v5836_v5 = vadd.f32 %v5835_v27, %v5834_v31  ;;  %v6277_v27 = vld [vmem:[%s9191_s3 + $0x2a4] ss:$16 sps:$4 sm:$0xff]  }
 0x4d8   :  { %v5837_v1 = vpop.f32.mrf.mxu1 }
 0x4d9   :  { %v2693_v58 = vadd.f32 %v5836_v5, %v2653_v10  ;;  %v6272_v10 = vld [vmem:[%s9191_s3 + $0x2c0] ss:$16 sps:$4 sm:$0xff]  }
 0x4da   :  { %v5838_v11 = vpop.f32.mrf.mxu1  ;;  %v6275_v1 = vld [vmem:[%s9191_s3 + $0x2a0] ss:$16 sps:$4 sm:$0xff]  }
 0x4db   :  { %v2733_v35 = vadd.f32 %v8273_v51, %v2693_v58  ;;  %v6264_v51 = vld [vmem:[%s9191_s3 + $0x22c] ss:$16 sps:$4 sm:$0xff]   ;;  %v6280_v11 = vld [vmem:[%s9191_s3 + $0x284] ss:$16 sps:$4 sm:$0xff]  }
 0x4dd   :  { %v2738_v48 = vmax.f32 %v2733_v35, 0.0 }
 0x4df   :  { %v2739_v40 = vpack.c.bf16 %v2738_v48, %v2738_v48  ;;  %v6278_v48 = vld [vmem:[%s9191_s3 + $0x280] ss:$16 sps:$4 sm:$0xff]  }
 0x4e1   :  { %5132 = vmatmul.mubr.msk.bf16.vlgmr.msra.gmra.mxu1 %vm1280_vm1, %v2739_v40 }
 0x4e2   :  { %2890 = vmatpush1.bf16.msra.mxu1 %v6256_v9  ;;  %2913 = vmatprep.mubr.bf16.mxu1 %v9333_v46  ;;  %v6283_v9 = vld [vmem:[%s9191_s3 + $0x2ec] ss:$16 sps:$4 sm:$0xff]  }
 0x4e3   :  { %2891 = vmatprep.subr.bf16.mxu1 %v6261_v47  ;;  %v6295_v47 = vld [vmem:[%s9193_s5 + $0x154] ss:$24 sps:$4 sm:$0xff]  }
 0x4e4   :  { %4609 = vmatprep.subr.bf16.mxu0 %v6295_v47  ;;  %v6307_v47 = vld [vmem:[%s9193_s5 + $0x454] ss:$24 sps:$4 sm:$0xff]  }
 0x4e6   :  { %2892 = vmatpush1.bf16.msra.mxu1 %v6259_v21  ;;  %v6298_v21 = vld [vmem:[%s9193_s5 + $0x124] ss:$24 sps:$4 sm:$0xff]  }
 0x4e7   :  { %2893 = vmatprep.subr.bf16.mxu1 %v6264_v51  ;;  %v6296_v51 = vld [vmem:[%s9193_s5 + $0x120] ss:$24 sps:$4 sm:$0xff]  }
 0x4ea   :  { %2894 = vmatpush1.bf16.msra.mxu1 %v6262_v33  ;;  %v6301_v33 = vld [vmem:[%s9193_s5 + $0xf4] ss:$24 sps:$4 sm:$0xff]  }
 0x4eb   :  { %2895 = vmatprep.subr.bf16.mxu1 %v6267_v60  ;;  %v6299_v60 = vld [vmem:[%s9193_s5 + $0xf0] ss:$24 sps:$4 sm:$0xff]  }
 0x4ee   :  { %2896 = vmatpush1.bf16.msra.mxu1 %v6265_v59  ;;  %v6304_v59 = vld [vmem:[%s9193_s5 + $0xc4] ss:$24 sps:$4 sm:$0xff]  }
 0x4ef   :  { %5871 = vmatprep.subr.bf16.mxu1 %v6654_v19  ;;  %v6310_v19 = vld [vmem:[%s9193_s5 + $0x94] ss:$24 sps:$4 sm:$0xff]  }
 0x4f1   :  { %5133 = vmatmul.mubr.msk.bf16.vlgmr.msra.gmra.mxu1 %vm1280_vm1, %v2739_v40  ;;  %v6293_v40 = vld [vmem:[%s9193_s5 + $0x150] ss:$24 sps:$4 sm:$0xff]  }
 0x4f2   :  { %5872 = vmatpush3.bf16.msra.mxu1 %v6655_v61  ;;  %3075 = vmatprep.mubr.bf16.mxu1 %v2978_v38  ;;  %v6302_v38 = vld [vmem:[%s9193_s5 + $0xc0] ss:$24 sps:$4 sm:$0xff]   ;;  %v6308_v61 = vld [vmem:[%s9193_s5 + $0x90] ss:$24 sps:$4 sm:$0xff]  }
 0x4f3   :  { %5873 = vmatprep.subr.bf16.mxu1 %v6656_v62  ;;  %4610 = vmatpush1.bf16.msra.mxu0 %v6293_v40  ;;  %v6316_v62 = vld [vmem:[%s9193_s5 + $0x64] ss:$24 sps:$4 sm:$0xff]  }
 0x4f4   :  { %4611 = vmatprep.subr.bf16.mxu0 %v6298_v21  ;;  %v6292_v40 = vld [vmem:[%s9191_s3 + $0x28c] ss:$16 sps:$4 sm:$0xff]   ;;  %v6305_v21 = vld [vmem:[%s9193_s5 + $0x450] ss:$24 sps:$4 sm:$0xff]  }
 0x4f6   :  { %5874 = vmatpush3.bf16.msra.mxu1 %v6657_v57 }
 0x4f7   :  { %5875 = vmatprep.subr.bf16.mxu1 %v6658_v24  ;;  %4612 = vmatpush1.bf16.msra.mxu0 %v6296_v51  ;;  %v6313_v51 = vld [vmem:[%s9193_s5 + $0x424] ss:$24 sps:$4 sm:$0xff]  }
 0x4f8   :  { %4613 = vmatprep.subr.bf16.mxu0 %v6301_v33  ;;  %v6311_v33 = vld [vmem:[%s9193_s5 + $0x420] ss:$24 sps:$4 sm:$0xff]  }
 0x4fa   :  { %5876 = vmatpush3.bf16.msra.mxu1 %v6659_v41 }
 0x4fb   :  { %5877 = vmatprep.subr.bf16.mxu1 %v6660_v42  ;;  %4614 = vmatpush1.bf16.msra.mxu0 %v6299_v60  ;;  %v6314_v42 = vld [vmem:[%s9193_s5 + $0x60] ss:$24 sps:$4 sm:$0xff]   ;;  %v6319_v60 = vld [vmem:[%s9193_s5 + $0x3f4] ss:$24 sps:$4 sm:$0xff]  }
 0x4fc   :  { %4615 = vmatprep.subr.bf16.mxu0 %v6304_v59  ;;  %v6317_v59 = vld [vmem:[%s9193_s5 + $0x3f0] ss:$24 sps:$4 sm:$0xff]  }
 0x4fe   :  { %5878 = vmatpush3.bf16.msra.mxu1 %v6661_v6 }
 0x4ff   :  { %5879 = vmatprep.subr.bf16.mxu1 %v6662_v22  ;;  %4616 = vmatpush1.bf16.msra.mxu0 %v6302_v38  ;;  %v6322_v22 = vld [vmem:[%s9193_s5 + $0x34] ss:$24 sps:$4 sm:$0xff]   ;;  %v6325_v38 = vld [vmem:[%s9193_s5 + $0x3c4] ss:$24 sps:$4 sm:$0xff]  }
 0x500   :  { %4617 = vmatprep.subr.bf16.mxu0 %v6310_v19  ;;  %v6323_v19 = vld [vmem:[%s9193_s5 + $0x3c0] ss:$24 sps:$4 sm:$0xff]  }
 0x502   :  { %5880 = vmatpush3.bf16.msra.mxu1 %v6663_v52 }
 0x503   :  { %5881 = vmatprep.subr.bf16.mxu1 %v6664_v12  ;;  %4618 = vmatpush1.bf16.msra.mxu0 %v6308_v61  ;;  %v6331_v61 = vld [vmem:[%s9193_s5 + $0x394] ss:$24 sps:$4 sm:$0xff]  }
 0x504   :  { %4619 = vmatprep.subr.bf16.mxu0 %v6316_v62  ;;  %v6329_v62 = vld [vmem:[%s9193_s5 + $0x390] ss:$24 sps:$4 sm:$0xff]  }
 0x506   :  { %5882 = vmatpush3.bf16.msra.mxu1 %v6665_v8  ;;  %v6328_v8 = vld [vmem:[%s9193_s5 + $0x4] ss:$24 sps:$4 sm:$0xff]  }
 0x507   :  { %5883 = vmatprep.subr.bf16.mxu1 %v6666_v32  ;;  %4620 = vmatpush1.bf16.msra.mxu0 %v6314_v42  ;;  %v6334_v32 = vld [vmem:[%s9193_s5 + $0x2d4] ss:$24 sps:$4 sm:$0xff]  }
 0x508   :  { %4621 = vmatprep.subr.bf16.mxu0 %v6322_v22  ;;  %v6343_v42 = vld [vmem:[%s9193_s5 + $0x334] ss:$24 sps:$4 sm:$0xff]   ;;  %v6341_v22 = vld [vmem:[%s9193_s5 + $0x330] ss:$24 sps:$4 sm:$0xff]  }
 0x50a   :  { %5884 = vmatpush3.bf16.msra.mxu1 %v6667_v36  ;;  %v6332_v36 = vld [vmem:[%s9193_s5 + $0x2d0] ss:$24 sps:$4 sm:$0xff]  }
 0x50b   :  { %5885 = vmatprep.subr.bf16.mxu1 %v6668_v54  ;;  %v6340_v54 = vld [vmem:[%s9193_s5 + $0x2a4] ss:$24 sps:$4 sm:$0xff]  }
 0x50e   :  { %5886 = vmatpush3.bf16.msra.mxu1 %v6669_v44  ;;  %v6338_v44 = vld [vmem:[%s9193_s5 + $0x2a0] ss:$24 sps:$4 sm:$0xff]  }
 0x50f   :  { %5915 = vmatprep.subr.bf16.mxu1 %v6670_v14  ;;  %v6346_v14 = vld [vmem:[%s9193_s5 + $0x274] ss:$24 sps:$4 sm:$0xff]  }
 0x511   :  { %3076 = vmatmul.mubr.bf16.vlgmr.msra.gmra.mxu1 %v2976_v63 }
 0x512   :  { %5916 = vmatpush3.bf16.msra.mxu1 %v6671_v17  ;;  %3155 = vmatprep.mubr.bf16.mxu1 %v2979_v39 }
 0x513   :  { %5917 = vmatprep.subr.bf16.mxu1 %v6672_v53 }
 0x516   :  { %5918 = vmatpush3.bf16.msra.mxu1 %v6673_v49 }
 0x517   :  { %5919 = vmatprep.subr.bf16.mxu1 %v6674_v15  ;;  %v6344_v15 = vld [vmem:[%s9193_s5 + $0x270] ss:$24 sps:$4 sm:$0xff]  }
 0x51a   :  { %5920 = vmatpush3.bf16.msra.mxu1 %v6675_v0 }
 0x51b   :  { %5921 = vmatprep.subr.bf16.mxu1 %v6676_v2  ;;  %v6350_v2 = vld [vmem:[%s9193_s5 + $0x240] ss:$24 sps:$4 sm:$0xff]  }
 0x51e   :  { %5922 = vmatpush3.bf16.msra.mxu1 %v6677_v50  ;;  %v6356_v50 = vld [vmem:[%s9193_s5 + $0x210] ss:$24 sps:$4 sm:$0xff]  }
 0x51f   :  { %5923 = vmatprep.subr.bf16.mxu1 %v6678_v43  ;;  %v6364_v43 = vld [vmem:[%s9193_s5 + $0x1e4] ss:$24 sps:$4 sm:$0xff]  }
 0x522   :  { %5924 = vmatpush3.bf16.msra.mxu1 %v9391_v16  ;;  %v5866_v16 = vpop.f32.mrf.mxu0 }
 0x523   :  { %5925 = vmatprep.subr.bf16.mxu1 %v9392_v20  ;;  %v8479_v56 = vadd.f32 %v5866_v16, %v5865_v55 }
 0x524   :  { %v5868_v20 = vpop.f32.mrf.mxu0 }
 0x525   :  { %v6679_v20 = vld [vmem:[%s9192_s2] ss:$0 sm:$0xff] }
 0x526   :  { %5926 = vmatpush3.bf16.msra.mxu1 %v9393_v30  ;;  %v5869_v30 = vpop.f32.mrf.mxu0 }
 0x527   :  { %5927 = vmatprep.subr.bf16.mxu1 %v9394_v3  ;;  %v3038_v30 = vadd.f32 %v6679_v20, %v8479_v56  ;;  %v6403_v20 = vld [vmem:[%s9193_s5 + $0x45c] ss:$24 sps:$4 sm:$0xff]  }
 0x52a   :  { %5928 = vmatpush3.bf16.msra.mxu1 %v9395_v7 }
 0x52b   :  { %5929 = vmatprep.subr.bf16.mxu1 %v9396_v26 }
 0x52e   :  { %5930 = vmatpush3.bf16.msra.mxu1 %v8059_v37  ;;  %v6271_v37 = vld [vmem:[%s9191_s3 + $0x2e4] ss:$16 sps:$4 sm:$0xff]  }
 0x52f   :  { %3313 = vmatprep.subr.bf16.mxu1 %v6271_v37 }
 0x531   :  { %3156 = vmatmul.mubr.bf16.vlgmr.msra.gmra.mxu1 %v2977_v4  ;;  %v6362_v4 = vld [vmem:[%s9193_s5 + $0x1e0] ss:$24 sps:$4 sm:$0xff]  }
 0x532   :  { %3337 = vmatprep.mubr.bf16.mxu1 %v9333_v46  ;;  %3314 = vmatpush1.bf16.msra.mxu1 %v6269_v28 }
 0x533   :  { %3315 = vmatprep.subr.bf16.mxu1 %v6274_v18 }
 0x536   :  { %3316 = vmatpush1.bf16.msra.mxu1 %v6272_v10 }
 0x537   :  { %3317 = vmatprep.subr.bf16.mxu1 %v6277_v27 }
 0x53a   :  { %3318 = vmatpush1.bf16.msra.mxu1 %v6275_v1 }
 0x53b   :  { %3319 = vmatprep.subr.bf16.mxu1 %v6280_v11 }
 0x53e   :  { %3320 = vmatpush1.bf16.msra.mxu1 %v6278_v48  ;;  %v6286_v48 = vld [vmem:[%s9191_s3 + $0x2cc] ss:$16 sps:$4 sm:$0xff]  }
 0x53f   :  { %3354 = vmatprep.subr.bf16.mxu1 %v6283_v9  ;;  %v6287_v9 = vld [vmem:[%s9191_s3 + $0x2a8] ss:$16 sps:$4 sm:$0xff]  }
 0x549   :  { %v5909_v34 = vpop.f32.mrf.mxu0 }
 0x54b   :  { %v5910_v3 = vpop.f32.mrf.mxu0 }
 0x54c   :  { %v8481_v13 = vadd.f32 %v5910_v3, %v5909_v34 }
 0x54d   :  { %v5912_v7 = vpop.f32.mrf.mxu0 }
 0x54f   :  { %v5913_v26 = vpop.f32.mrf.mxu0 }
 0x569   :  { %v8495_v31 = vpop.f32.mrf.mxu0 }
 0x56b   :  { %v6064_v5 = vpop.f32.mrf.mxu0 }
 0x56d   :  { %v3200_v58 = vpop.f32.mrf.mxu0 }
 0x56f   :  { %v6065_v35 = vpop.f32.mrf.mxu0 }
 0x570   :  { %v6281_v35 = vld [vmem:[%s9191_s3 + $0x2e8] ss:$16 sps:$4 sm:$0xff]  }
 0x5a1   :  { %v2874_v57 = vpop.f32.mrf.mxu1 }
 0x5a2   :  { %v8546_v24 = vadd.f32 %v2874_v57, %v8313_v25  ;;  %v6320_v25 = vld [vmem:[%s9193_s5 + $0x30] ss:$24 sps:$4 sm:$0xff]   ;;  %v6337_v57 = vld [vmem:[%s9193_s5 + $0x364] ss:$24 sps:$4 sm:$0xff]  }
 0x5a3   :  { %v2876_v41 = vpop.f32.mrf.mxu1  ;;  %4622 = vmatpush1.bf16.msra.mxu0 %v6320_v25  ;;  %v6355_v25 = vld [vmem:[%s9193_s5 + $0x5d4] ss:$24 sps:$4 sm:$0xff]  }
 0x5a4   :  { %v8552_v6 = vadd.f32 %v2876_v41, %v8316_v23  ;;  %v6326_v23 = vld [vmem:[%s9193_s5] ss:$24 sps:$4 sm:$0xff]   ;;  %4623 = vmatprep.subr.bf16.mxu0 %v6328_v8  ;;  %v6353_v8 = vld [vmem:[%s9193_s5 + $0x5d0] ss:$24 sps:$4 sm:$0xff]  }
 0x5a5   :  { %v2878_v52 = vpop.f32.mrf.mxu1  ;;  %v6335_v41 = vld [vmem:[%s9193_s5 + $0x360] ss:$24 sps:$4 sm:$0xff]  }
 0x5a6   :  { %v6349_v52 = vld [vmem:[%s9193_s5 + $0x304] ss:$24 sps:$4 sm:$0xff]  }
 0x5a7   :  { %v2879_v12 = vpop.f32.mrf.mxu1  ;;  %4624 = vmatpush1.bf16.msra.mxu0 %v6326_v23  ;;  %v6361_v23 = vld [vmem:[%s9193_s5 + $0x5a4] ss:$24 sps:$4 sm:$0xff]  }
 0x5a8   :  { %4625 = vmatprep.subr.bf16.mxu0 %v6334_v32  ;;  %v6347_v12 = vld [vmem:[%s9193_s5 + $0x300] ss:$24 sps:$4 sm:$0xff]  }
 0x5a9   :  { %v6359_v32 = vld [vmem:[%s9193_s5 + $0x5a0] ss:$24 sps:$4 sm:$0xff]  }
 0x5ab   :  { %4626 = vmatpush2.bf16.msra.mxu0 %v6332_v36  ;;  %v6367_v36 = vld [vmem:[%s9193_s5 + $0x574] ss:$24 sps:$4 sm:$0xff]  }
 0x5ac   :  { %4627 = vmatprep.subr.bf16.mxu0 %v6340_v54  ;;  %v6365_v54 = vld [vmem:[%s9193_s5 + $0x570] ss:$24 sps:$4 sm:$0xff]  }
 0x5af   :  { %4628 = vmatpush2.bf16.msra.mxu0 %v6338_v44  ;;  %v6368_v44 = vld [vmem:[%s9193_s5 + $0x1b0] ss:$24 sps:$4 sm:$0xff]  }
 0x5b0   :  { %4629 = vmatprep.subr.bf16.mxu0 %v6346_v14  ;;  %v6373_v14 = vld [vmem:[%s9193_s5 + $0x544] ss:$24 sps:$4 sm:$0xff]  }
 0x5b1   :  { %v2915_v63 = vpop.f32.mrf.mxu1 }
 0x5b2   :  { %v8579_v39 = vadd.f32 %v2915_v63, %v8338_v45  ;;  %v6352_v45 = vld [vmem:[%s9193_s5 + $0x244] ss:$24 sps:$4 sm:$0xff]   ;;  %v6370_v63 = vld [vmem:[%s9193_s5 + $0x1b4] ss:$24 sps:$4 sm:$0xff]  }
 0x5b3   :  { %v2917_v17 = vpop.f32.mrf.mxu1  ;;  %4630 = vmatpush2.bf16.msra.mxu0 %v6344_v15  ;;  %v6374_v15 = vld [vmem:[%s9193_s5 + $0x180] ss:$24 sps:$4 sm:$0xff]  }
 0x5b4   :  { %v8585_v53 = vadd.f32 %v2917_v17, %v8341_v29  ;;  %v6358_v29 = vld [vmem:[%s9193_s5 + $0x214] ss:$24 sps:$4 sm:$0xff]   ;;  %4631 = vmatprep.subr.bf16.mxu0 %v6352_v45  ;;  %v6371_v17 = vld [vmem:[%s9193_s5 + $0x540] ss:$24 sps:$4 sm:$0xff]   ;;  %v6377_v45 = vld [vmem:[%s9193_s5 + $0x510] ss:$24 sps:$4 sm:$0xff]  }
 0x5b5   :  { %v2919_v49 = vpop.f32.mrf.mxu1 }
 0x5b6   :  { %v6376_v49 = vld [vmem:[%s9193_s5 + $0x184] ss:$24 sps:$4 sm:$0xff]  }
 0x5b7   :  { %v2920_v0 = vpop.f32.mrf.mxu1  ;;  %4632 = vmatpush2.bf16.msra.mxu0 %v6350_v2  ;;  %v6382_v2 = vld [vmem:[%s9193_s5 + $0x15c] ss:$24 sps:$4 sm:$0xff]  }
 0x5b8   :  { %4633 = vmatprep.subr.bf16.mxu0 %v6358_v29  ;;  %v6379_v0 = vld [vmem:[%s9193_s5 + $0x514] ss:$24 sps:$4 sm:$0xff]   ;;  %v6383_v29 = vld [vmem:[%s9193_s5 + $0x4e0] ss:$24 sps:$4 sm:$0xff]  }
 0x5bb   :  { %4634 = vmatpush2.bf16.msra.mxu0 %v6356_v50  ;;  %v6385_v50 = vld [vmem:[%s9193_s5 + $0x4e4] ss:$24 sps:$4 sm:$0xff]  }
 0x5bc   :  { %4635 = vmatprep.subr.bf16.mxu0 %v6364_v43  ;;  %v6391_v43 = vld [vmem:[%s9193_s5 + $0x4b4] ss:$24 sps:$4 sm:$0xff]  }
 0x5bf   :  { %4636 = vmatpush2.bf16.msra.mxu0 %v6362_v4  ;;  %v6389_v4 = vld [vmem:[%s9193_s5 + $0x4b0] ss:$24 sps:$4 sm:$0xff]  }
 0x5c0   :  { %4637 = vmatprep.subr.bf16.mxu0 %v6370_v63  ;;  %v6415_v63 = vld [vmem:[%s9193_s5 + $0x3fc] ss:$24 sps:$4 sm:$0xff]  }
 0x5c3   :  { %4638 = vmatpush2.bf16.msra.mxu0 %v6368_v44  ;;  %v6418_v44 = vld [vmem:[%s9193_s5 + $0x3c] ss:$24 sps:$4 sm:$0xff]  }
 0x5c4   :  { %4639 = vmatprep.subr.bf16.mxu0 %v6376_v49  ;;  %v6421_v49 = vld [vmem:[%s9193_s5 + $0x3cc] ss:$24 sps:$4 sm:$0xff]  }
 0x5c7   :  { %4640 = vmatpush2.bf16.msra.mxu0 %v6374_v15  ;;  %v6424_v15 = vld [vmem:[%s9193_s5 + $0xc] ss:$24 sps:$4 sm:$0xff]  }
 0x5c8   :  { %4691 = vmatprep.subr.bf16.mxu0 %v6382_v2  ;;  %v6427_v2 = vld [vmem:[%s9193_s5 + $0x39c] ss:$24 sps:$4 sm:$0xff]  }
 0x5d1   :  { %v5887_v55 = vpop.f32.mrf.mxu1 }
 0x5d3   :  { %v5888_v16 = vpop.f32.mrf.mxu1 }
 0x5d4   :  { %v5889_v34 = vadd.f32 %v5888_v16, %v5887_v55  ;;  %v6397_v55 = vld [vmem:[%s9193_s5 + $0x484] ss:$24 sps:$4 sm:$0xff]   ;;  %v6395_v16 = vld [vmem:[%s9193_s5 + $0x480] ss:$24 sps:$4 sm:$0xff]  }
 0x5d5   :  { %v5890_v3 = vpop.f32.mrf.mxu1 }
 0x5d6   :  { %v3078_v7 = vadd.f32 %v5889_v34, %v3038_v30  ;;  %v9415_v30 = vld [vmem:[#allocation2_spill] sm:$0xff] }
 0x5d7   :  { %v5891_v26 = vpop.f32.mrf.mxu1  ;;  %v3395_v34 = vsub.s32 0, %v9415_v30  ;;  %v3391_v3 = vld [vmem:[%s9194_s4] sm:$0xf] }
 0x5d8   :  { %v3118_v28 = vadd.f32 %v8481_v13, %v3078_v7  ;;  %v6284_v13 = vld [vmem:[%s9191_s3 + $0x2c8] ss:$16 sps:$4 sm:$0xff]   ;;  %v3399_v7 = vsub.s32 1, %v9415_v30 }
 0x5d9   :  { %v3396_v26 = vrot.slane %v3391_v3, %v3395_v34 }
 0x5f1   :  { %v5931_v37 = vpop.f32.mrf.mxu1 }
 0x5f3   :  { %v5932_v18 = vpop.f32.mrf.mxu1 }
 0x5f4   :  { %v5933_v10 = vadd.f32 %v5932_v18, %v5931_v37  ;;  %v3400_v18 = vrot.slane %v3391_v3, %v3399_v7 }
 0x5f5   :  { %v5934_v27 = vpop.f32.mrf.mxu1 }
 0x5f6   :  { %v3158_v5 = vadd.f32 %v5933_v10, %v3118_v28 }
 0x5f7   :  { %v5935_v1 = vpop.f32.mrf.mxu1 }
 0x5f8   :  { %v3198_v58 = vadd.f32 %v8495_v31, %v3158_v5  ;;  %v6289_v31 = vld [vmem:[%s9191_s3 + $0x2ac] ss:$16 sps:$4 sm:$0xff]  }
 0x5fa   :  { %v3203_v11 = vmax.f32 %v3198_v58, 0.0 }
 0x5fc   :  { %v3204_v56 = vpack.c.bf16 %v3203_v11, %v3203_v11 }
 0x5fe   :  { %5169 = vmatmul.mubr.msk.bf16.vlgmr.msra.gmra.mxu1 %vm1280_vm1, %v3204_v56 }
 0x5ff   :  { %3355 = vmatpush1.bf16.msra.mxu1 %v6281_v35  ;;  %3378 = vmatprep.mubr.bf16.mxu1 %v9333_v46  ;;  %v6290_v46 = vld [vmem:[%s9191_s3 + $0x288] ss:$16 sps:$4 sm:$0xff]  }
 0x600   :  { %3356 = vmatprep.subr.bf16.mxu1 %v6286_v48 }
 0x603   :  { %3357 = vmatpush1.bf16.msra.mxu1 %v6284_v13  ;;  %v6380_v13 = vld [vmem:[%s9193_s5 + $0x158] ss:$24 sps:$4 sm:$0xff]  }
 0x604   :  { %3358 = vmatprep.subr.bf16.mxu1 %v6289_v31 }
 0x607   :  { %3359 = vmatpush1.bf16.msra.mxu1 %v6287_v9  ;;  %v6386_v9 = vld [vmem:[%s9193_s5 + $0x128] ss:$24 sps:$4 sm:$0xff]  }
 0x608   :  { %3360 = vmatprep.subr.bf16.mxu1 %v6292_v40  ;;  %v3407_v40 = vsub.s32 3, %v9415_v30 }
 0x60b   :  { %3361 = vmatpush1.bf16.msra.mxu1 %v6290_v46  ;;  %v6394_v46 = vld [vmem:[%s9193_s5 + $0xfc] ss:$24 sps:$4 sm:$0xff]  }
 0x60c   :  { %4650 = vmatprep.subr.bf16.mxu1 %v6307_v47 }
 0x60e   :  { %5170 = vmatmul.mubr.msk.bf16.vlgmr.msra.gmra.mxu1 %vm1280_vm1, %v3204_v56 }
 0x60f   :  { %4651 = vmatpush1.bf16.msra.mxu1 %v6305_v21 }
 0x610   :  { %4652 = vmatprep.subr.bf16.mxu1 %v6313_v51 }
 0x613   :  { %4653 = vmatpush1.bf16.msra.mxu1 %v6311_v33  ;;  %v3408_v33 = vrot.slane %v3391_v3, %v3407_v40 }
 0x614   :  { %4654 = vmatprep.subr.bf16.mxu1 %v6319_v60  ;;  %v6392_v60 = vld [vmem:[%s9193_s5 + $0xf8] ss:$24 sps:$4 sm:$0xff]  }
 0x617   :  { %4655 = vmatpush1.bf16.msra.mxu1 %v6317_v59 }
 0x618   :  { %4656 = vmatprep.subr.bf16.mxu1 %v6325_v38  ;;  %v6400_v38 = vld [vmem:[%s9193_s5 + $0xcc] ss:$24 sps:$4 sm:$0xff]  }
 0x61b   :  { %4657 = vmatpush1.bf16.msra.mxu1 %v6323_v19 }
 0x61c   :  { %4658 = vmatprep.subr.bf16.mxu1 %v6331_v61 }
 0x61f   :  { %4659 = vmatpush1.bf16.msra.mxu1 %v6329_v62 }
 0x620   :  { %4660 = vmatprep.subr.bf16.mxu1 %v6337_v57 }
 0x623   :  { %4661 = vmatpush1.bf16.msra.mxu1 %v6335_v41 }
 0x624   :  { %4662 = vmatprep.subr.bf16.mxu1 %v6343_v42 }
 0x627   :  { %4663 = vmatpush1.bf16.msra.mxu1 %v6341_v22  ;;  %v6406_v22 = vld [vmem:[%s9193_s5 + $0x9c] ss:$24 sps:$4 sm:$0xff]  }
 0x628   :  { %4664 = vmatprep.subr.bf16.mxu1 %v6349_v52 }
 0x62b   :  { %4665 = vmatpush1.bf16.msra.mxu1 %v6347_v12 }
 0x62c   :  { %4666 = vmatprep.subr.bf16.mxu1 %v6355_v25  ;;  %v6404_v25 = vld [vmem:[%s9193_s5 + $0x98] ss:$24 sps:$4 sm:$0xff]  }
 0x62f   :  { %4667 = vmatpush2.bf16.msra.mxu1 %v6353_v8 }
 0x630   :  { %4668 = vmatprep.subr.bf16.mxu1 %v6361_v23  ;;  %v6409_v23 = vld [vmem:[%s9193_s5 + $0x42c] ss:$24 sps:$4 sm:$0xff]  }
 0x633   :  { %4669 = vmatpush2.bf16.msra.mxu1 %v6359_v32  ;;  %v6412_v32 = vld [vmem:[%s9193_s5 + $0x6c] ss:$24 sps:$4 sm:$0xff]  }
 0x634   :  { %4670 = vmatprep.subr.bf16.mxu1 %v6367_v36  ;;  %v6407_v36 = vld [vmem:[%s9193_s5 + $0x428] ss:$24 sps:$4 sm:$0xff]  }
 0x637   :  { %4671 = vmatpush2.bf16.msra.mxu1 %v6365_v54  ;;  %v6410_v54 = vld [vmem:[%s9193_s5 + $0x68] ss:$24 sps:$4 sm:$0xff]  }
 0x638   :  { %4672 = vmatprep.subr.bf16.mxu1 %v6373_v14  ;;  %v6413_v14 = vld [vmem:[%s9193_s5 + $0x3f8] ss:$24 sps:$4 sm:$0xff]  }
 0x63b   :  { %4673 = vmatpush2.bf16.msra.mxu1 %v6371_v17  ;;  %v6416_v17 = vld [vmem:[%s9193_s5 + $0x38] ss:$24 sps:$4 sm:$0xff]  }
 0x63c   :  { %4674 = vmatprep.subr.bf16.mxu1 %v6379_v0  ;;  %v6422_v0 = vld [vmem:[%s9193_s5 + $0x8] ss:$24 sps:$4 sm:$0xff]  }
 0x63f   :  { %4675 = vmatpush2.bf16.msra.mxu1 %v6377_v45  ;;  %v6419_v45 = vld [vmem:[%s9193_s5 + $0x3c8] ss:$24 sps:$4 sm:$0xff]  }
 0x640   :  { %4676 = vmatprep.subr.bf16.mxu1 %v6385_v50  ;;  %v6425_v50 = vld [vmem:[%s9193_s5 + $0x398] ss:$24 sps:$4 sm:$0xff]  }
 0x643   :  { %4677 = vmatpush2.bf16.msra.mxu1 %v6383_v29  ;;  %v6430_v29 = vld [vmem:[%s9193_s5 + $0x2dc] ss:$24 sps:$4 sm:$0xff]  }
 0x644   :  { %4678 = vmatprep.subr.bf16.mxu1 %v6391_v43  ;;  %v6428_v43 = vld [vmem:[%s9193_s5 + $0x2d8] ss:$24 sps:$4 sm:$0xff]  }
 0x647   :  { %4679 = vmatpush2.bf16.msra.mxu1 %v6389_v4  ;;  %v6433_v4 = vld [vmem:[%s9193_s5 + $0x36c] ss:$24 sps:$4 sm:$0xff]  }
 0x648   :  { %4680 = vmatprep.subr.bf16.mxu1 %v6397_v55  ;;  %v6436_v55 = vld [vmem:[%s9193_s5 + $0x2ac] ss:$24 sps:$4 sm:$0xff]  }
 0x64b   :  { %4681 = vmatpush2.bf16.msra.mxu1 %v6395_v16  ;;  %v6431_v16 = vld [vmem:[%s9193_s5 + $0x368] ss:$24 sps:$4 sm:$0xff]  }
 0x64c   :  { %4732 = vmatprep.subr.bf16.mxu1 %v6403_v20  ;;  %v6434_v20 = vld [vmem:[%s9193_s5 + $0x2a8] ss:$24 sps:$4 sm:$0xff]  }
 0x6be   :  { %v3339_v28 = vpop.f32.mrf.mxu1 }
 0x6bf   :  { %v3387_v37 = vadd.f32 %v3339_v28, %v8546_v24  ;;  %v6388_v24 = vld [vmem:[%s9193_s5 + $0x12c] ss:$24 sps:$4 sm:$0xff]   ;;  %v6437_v28 = vld [vmem:[%s9193_s5 + $0x338] ss:$24 sps:$4 sm:$0xff]  }
 0x6c0   :  { %v3341_v10 = vpop.f32.mrf.mxu1 }
 0x6c1   :  { %v3413_v27 = vadd.f32 %v3396_v26, %v3387_v37  ;;  %v3388_v5 = vadd.f32 %v3341_v10, %v8552_v6  ;;  %v3403_v6 = vsub.s32 2, %v9415_v30  ;;  %v6442_v26 = vld [vmem:[%s9193_s5 + $0x27c] ss:$24 sps:$4 sm:$0xff]   ;;  %v6440_v37 = vld [vmem:[%s9193_s5 + $0x278] ss:$24 sps:$4 sm:$0xff]  }
 0x6c2   :  { %v3343_v1 = vpop.f32.mrf.mxu1  ;;  %v6448_v10 = vld [vmem:[%s9193_s5 + $0x24c] ss:$24 sps:$4 sm:$0xff]  }
 0x6c3   :  { %v3414_v58 = vadd.f32 %v3400_v18, %v3388_v5  ;;  %v3417_v11 = vmax.f32 %v3413_v27, 0.0  ;;  %v3404_v47 = vrot.slane %v3391_v3, %v3403_v6  ;;  %v6439_v3 = vld [vmem:[%s9193_s5 + $0x33c] ss:$24 sps:$4 sm:$0xff]   ;;  %v6445_v18 = vld [vmem:[%s9193_s5 + $0x30c] ss:$24 sps:$4 sm:$0xff]  }
 0x6c4   :  { %v3344_v35 = vpop.f32.mrf.mxu1  ;;  %v6443_v27 = vld [vmem:[%s9193_s5 + $0x308] ss:$24 sps:$4 sm:$0xff]   ;;  %v6451_v1 = vld [vmem:[%s9193_s5 + $0x5dc] ss:$24 sps:$4 sm:$0xff]  }
 0x6c5   :  { %v3418_v56 = vmax.f32 %v3414_v58, 0.0  ;;  %v8768_v31 = vpack.c.bf16 %v3417_v11, %v3417_v11  ;;  %v6446_v5 = vld [vmem:[%s9193_s5 + $0x248] ss:$24 sps:$4 sm:$0xff]   ;;  %v6454_v58 = vld [vmem:[%s9193_s5 + $0x21c] ss:$24 sps:$4 sm:$0xff]  }
 0x6c6   :  { %v6449_v11 = vld [vmem:[%s9193_s5 + $0x5d8] ss:$24 sps:$4 sm:$0xff]  }
 0x6c7   :  { %v8763_v48 = vpack.c.bf16 %v3418_v56, %v3418_v56  ;;  %v6452_v35 = vld [vmem:[%s9193_s5 + $0x218] ss:$24 sps:$4 sm:$0xff]   ;;  %v6457_v56 = vld [vmem:[%s9193_s5 + $0x5ac] ss:$24 sps:$4 sm:$0xff]  }
 0x6c9   :  { %4641 = vmatprep.mubr.bf16.mxu0 %v8763_v48 }
 0x6ca   :  { %4642 = vmatmul.mubr.bf16.vlgmr.msra.gmra.mxu0 %v8768_v31 }
 0x6cb   :  { %4692 = vmatpush1.bf16.msra.mxu0 %v6380_v13  ;;  %4723 = vmatprep.mubr.bf16.mxu0 %v8763_v48  ;;  %v6460_v13 = vld [vmem:[%s9193_s5 + $0x1ec] ss:$24 sps:$4 sm:$0xff]  }
 0x6cc   :  { %4693 = vmatprep.subr.bf16.mxu0 %v6388_v24  ;;  %v6455_v24 = vld [vmem:[%s9193_s5 + $0x5a8] ss:$24 sps:$4 sm:$0xff]  }
 0x6ce   :  { %v3380_v21 = vpop.f32.mrf.mxu1 }
 0x6cf   :  { %v3389_v51 = vadd.f32 %v3380_v21, %v8579_v39  ;;  %4694 = vmatpush1.bf16.msra.mxu0 %v6386_v9  ;;  %v6398_v39 = vld [vmem:[%s9193_s5 + $0xc8] ss:$24 sps:$4 sm:$0xff]   ;;  %v6461_v21 = vld [vmem:[%s9193_s5 + $0x578] ss:$24 sps:$4 sm:$0xff]  }
 0x6d0   :  { %v3382_v59 = vpop.f32.mrf.mxu1  ;;  %4695 = vmatprep.subr.bf16.mxu0 %v6394_v46  ;;  %v6458_v9 = vld [vmem:[%s9193_s5 + $0x1e8] ss:$24 sps:$4 sm:$0xff]   ;;  %v6463_v46 = vld [vmem:[%s9193_s5 + $0x57c] ss:$24 sps:$4 sm:$0xff]  }
 0x6d1   :  { %v3415_v19 = vadd.f32 %v3404_v47, %v3389_v51  ;;  %v3390_v61 = vadd.f32 %v3382_v59, %v8585_v53  ;;  %v6401_v53 = vld [vmem:[%s9193_s5 + $0x458] ss:$24 sps:$4 sm:$0xff]   ;;  %v6466_v47 = vld [vmem:[%s9193_s5 + $0x1bc] ss:$24 sps:$4 sm:$0xff]   ;;  %v6467_v59 = vld [vmem:[%s9193_s5 + $0x548] ss:$24 sps:$4 sm:$0xff]  }
 0x6d2   :  { %v3384_v62 = vpop.f32.mrf.mxu1  ;;  %v6464_v51 = vld [vmem:[%s9193_s5 + $0x1b8] ss:$24 sps:$4 sm:$0xff]  }
 0x6d3   :  { %v3416_v57 = vadd.f32 %v3408_v33, %v3390_v61  ;;  %4696 = vmatpush1.bf16.msra.mxu0 %v6392_v60  ;;  %v3419_v41 = vmax.f32 %v3415_v19, 0.0  ;;  %v6469_v33 = vld [vmem:[%s9193_s5 + $0x54c] ss:$24 sps:$4 sm:$0xff]   ;;  %v6475_v19 = vld [vmem:[%s9193_s5 + $0x51c] ss:$24 sps:$4 sm:$0xff]  }
 0x6d4   :  { %v3385_v42 = vpop.f32.mrf.mxu1  ;;  %4697 = vmatprep.subr.bf16.mxu0 %v6400_v38  ;;  %v6472_v60 = vld [vmem:[%s9193_s5 + $0x18c] ss:$24 sps:$4 sm:$0xff]   ;;  %v6470_v38 = vld [vmem:[%s9193_s5 + $0x188] ss:$24 sps:$4 sm:$0xff]   ;;  %v6473_v62 = vld [vmem:[%s9193_s5 + $0x518] ss:$24 sps:$4 sm:$0xff]  }
 0x6d5   :  { %v3420_v52 = vmax.f32 %v3416_v57, 0.0  ;;  %v8810_v8 = vpack.c.bf16 %v3419_v41, %v3419_v41  ;;  %v6478_v61 = vld [vmem:[%s9193_s5 + $0x164] ss:$24 sps:$4 sm:$0xff]   ;;  %v6476_v57 = vld [vmem:[%s9193_s5 + $0x160] ss:$24 sps:$4 sm:$0xff]  }
 0x6d6   :  { %v6484_v41 = vld [vmem:[%s9193_s5 + $0x134] ss:$24 sps:$4 sm:$0xff]   ;;  %v6479_v42 = vld [vmem:[%s9193_s5 + $0x4e8] ss:$24 sps:$4 sm:$0xff]  }
 0x6d7   :  { %v8802_v12 = vpack.c.bf16 %v3420_v52, %v3420_v52  ;;  %4698 = vmatpush1.bf16.msra.mxu0 %v6398_v39  ;;  %v6481_v39 = vld [vmem:[%s9193_s5 + $0x4ec] ss:$24 sps:$4 sm:$0xff]   ;;  %v6487_v52 = vld [vmem:[%s9193_s5 + $0x4bc] ss:$24 sps:$4 sm:$0xff]  }
 0x6d8   :  { %4699 = vmatprep.subr.bf16.mxu0 %v6406_v22  ;;  %v6482_v22 = vld [vmem:[%s9193_s5 + $0x130] ss:$24 sps:$4 sm:$0xff]  }
 0x6d9   :  { %4682 = vmatprep.mubr.bf16.mxu1 %v8802_v12 }
 0x6da   :  { %4683 = vmatmul.mubr.bf16.vlgmr.msra.gmra.mxu1 %v8810_v8 }
 0x6db   :  { %4733 = vmatpush1.bf16.msra.mxu1 %v6401_v53  ;;  %4700 = vmatpush1.bf16.msra.mxu0 %v6404_v25  ;;  %v6490_v53 = vld [vmem:[%s9193_s5 + $0x104] ss:$24 sps:$4 sm:$0xff]   ;;  %v6485_v25 = vld [vmem:[%s9193_s5 + $0x4b8] ss:$24 sps:$4 sm:$0xff]  }
 0x6dc   :  { %4764 = vmatprep.mubr.bf16.mxu1 %v8802_v12  ;;  %4734 = vmatprep.subr.bf16.mxu1 %v6409_v23  ;;  %v6493_v23 = vld [vmem:[%s9193_s5 + $0x48c] ss:$24 sps:$4 sm:$0xff]  }
 0x6dd   :  { %4701 = vmatprep.subr.bf16.mxu0 %v6412_v32  ;;  %v6496_v32 = vld [vmem:[%s9193_s5 + $0xd4] ss:$24 sps:$4 sm:$0xff]  }
 0x6df   :  { %4735 = vmatpush1.bf16.msra.mxu1 %v6407_v36  ;;  %4702 = vmatpush1.bf16.msra.mxu0 %v6410_v54  ;;  %v6491_v36 = vld [vmem:[%s9193_s5 + $0x488] ss:$24 sps:$4 sm:$0xff]  }
 0x6e0   :  { %4736 = vmatprep.subr.bf16.mxu1 %v6415_v63  ;;  %4703 = vmatprep.subr.bf16.mxu0 %v6418_v44  ;;  %v6494_v54 = vld [vmem:[%s9193_s5 + $0xd0] ss:$24 sps:$4 sm:$0xff]   ;;  %v6499_v63 = vld [vmem:[%s9193_s5 + $0x464] ss:$24 sps:$4 sm:$0xff]  }
 0x6e1   :  { %v6502_v44 = vld [vmem:[%s9193_s5 + $0xa4] ss:$24 sps:$4 sm:$0xff]  }
 0x6e3   :  { %4737 = vmatpush1.bf16.msra.mxu1 %v6413_v14  ;;  %4704 = vmatpush1.bf16.msra.mxu0 %v6416_v17  ;;  %v6497_v14 = vld [vmem:[%s9193_s5 + $0x460] ss:$24 sps:$4 sm:$0xff]  }
 0x6e4   :  { %4738 = vmatprep.subr.bf16.mxu1 %v6421_v49  ;;  %4705 = vmatprep.subr.bf16.mxu0 %v6424_v15  ;;  %v6500_v17 = vld [vmem:[%s9193_s5 + $0xa0] ss:$24 sps:$4 sm:$0xff]   ;;  %v6505_v49 = vld [vmem:[%s9193_s5 + $0x434] ss:$24 sps:$4 sm:$0xff]  }
 0x6e5   :  { %v6508_v15 = vld [vmem:[%s9193_s5 + $0x74] ss:$24 sps:$4 sm:$0xff]  }
 0x6e7   :  { %4739 = vmatpush1.bf16.msra.mxu1 %v6419_v45  ;;  %4706 = vmatpush1.bf16.msra.mxu0 %v6422_v0  ;;  %v6503_v45 = vld [vmem:[%s9193_s5 + $0x430] ss:$24 sps:$4 sm:$0xff]  }
 0x6e8   :  { %4740 = vmatprep.subr.bf16.mxu1 %v6427_v2  ;;  %4707 = vmatprep.subr.bf16.mxu0 %v6430_v29  ;;  %v6506_v0 = vld [vmem:[%s9193_s5 + $0x70] ss:$24 sps:$4 sm:$0xff]   ;;  %v6511_v2 = vld [vmem:[%s9193_s5 + $0x404] ss:$24 sps:$4 sm:$0xff]  }
 0x6e9   :  { %v6514_v29 = vld [vmem:[%s9193_s5 + $0x44] ss:$24 sps:$4 sm:$0xff]  }
 0x6eb   :  { %4741 = vmatpush1.bf16.msra.mxu1 %v6425_v50  ;;  %4708 = vmatpush2.bf16.msra.mxu0 %v6428_v43  ;;  %v6512_v50 = vld [vmem:[%s9193_s5 + $0x40] ss:$24 sps:$4 sm:$0xff]   ;;  %v6517_v43 = vld [vmem:[%s9193_s5 + $0x3d4] ss:$24 sps:$4 sm:$0xff]  }
 0x6ec   :  { %4742 = vmatprep.subr.bf16.mxu1 %v6433_v4  ;;  %4709 = vmatprep.subr.bf16.mxu0 %v6436_v55  ;;  %v6520_v4 = vld [vmem:[%s9193_s5 + $0x14] ss:$24 sps:$4 sm:$0xff]   ;;  %v6515_v55 = vld [vmem:[%s9193_s5 + $0x3d0] ss:$24 sps:$4 sm:$0xff]  }
 0x6ef   :  { %4743 = vmatpush1.bf16.msra.mxu1 %v6431_v16  ;;  %4710 = vmatpush2.bf16.msra.mxu0 %v6434_v20  ;;  %v6518_v16 = vld [vmem:[%s9193_s5 + $0x10] ss:$24 sps:$4 sm:$0xff]   ;;  %v6523_v20 = vld [vmem:[%s9193_s5 + $0x3a4] ss:$24 sps:$4 sm:$0xff]  }
 0x6f0   :  { %4744 = vmatprep.subr.bf16.mxu1 %v6439_v3  ;;  %4711 = vmatprep.subr.bf16.mxu0 %v6442_v26  ;;  %v6526_v3 = vld [vmem:[%s9193_s5 + $0x2e4] ss:$24 sps:$4 sm:$0xff]   ;;  %v6521_v26 = vld [vmem:[%s9193_s5 + $0x3a0] ss:$24 sps:$4 sm:$0xff]  }
 0x6f3   :  { %4745 = vmatpush1.bf16.msra.mxu1 %v6437_v28  ;;  %4712 = vmatpush2.bf16.msra.mxu0 %v6440_v37  ;;  %v6524_v28 = vld [vmem:[%s9193_s5 + $0x2e0] ss:$24 sps:$4 sm:$0xff]   ;;  %v6529_v37 = vld [vmem:[%s9193_s5 + $0x374] ss:$24 sps:$4 sm:$0xff]  }
 0x6f4   :  { %4746 = vmatprep.subr.bf16.mxu1 %v6445_v18  ;;  %4713 = vmatprep.subr.bf16.mxu0 %v6448_v10  ;;  %v6532_v18 = vld [vmem:[%s9193_s5 + $0x2b4] ss:$24 sps:$4 sm:$0xff]   ;;  %v6527_v10 = vld [vmem:[%s9193_s5 + $0x370] ss:$24 sps:$4 sm:$0xff]  }
 0x6f7   :  { %4747 = vmatpush1.bf16.msra.mxu1 %v6443_v27  ;;  %4714 = vmatpush2.bf16.msra.mxu0 %v6446_v5  ;;  %v6530_v27 = vld [vmem:[%s9193_s5 + $0x2b0] ss:$24 sps:$4 sm:$0xff]   ;;  %v6535_v5 = vld [vmem:[%s9193_s5 + $0x344] ss:$24 sps:$4 sm:$0xff]  }
 0x6f8   :  { %4748 = vmatprep.subr.bf16.mxu1 %v6451_v1  ;;  %4715 = vmatprep.subr.bf16.mxu0 %v6454_v58  ;;  %v6538_v1 = vld [vmem:[%s9193_s5 + $0x284] ss:$24 sps:$4 sm:$0xff]   ;;  %v6533_v58 = vld [vmem:[%s9193_s5 + $0x340] ss:$24 sps:$4 sm:$0xff]  }
 0x6fb   :  { %4749 = vmatpush2.bf16.msra.mxu1 %v6449_v11  ;;  %4716 = vmatpush2.bf16.msra.mxu0 %v6452_v35  ;;  %v6536_v11 = vld [vmem:[%s9193_s5 + $0x280] ss:$24 sps:$4 sm:$0xff]   ;;  %v6541_v35 = vld [vmem:[%s9193_s5 + $0x314] ss:$24 sps:$4 sm:$0xff]  }
 0x6fc   :  { %4750 = vmatprep.subr.bf16.mxu1 %v6457_v56  ;;  %4717 = vmatprep.subr.bf16.mxu0 %v6460_v13  ;;  %v6544_v56 = vld [vmem:[%s9193_s5 + $0x254] ss:$24 sps:$4 sm:$0xff]   ;;  %v6539_v13 = vld [vmem:[%s9193_s5 + $0x310] ss:$24 sps:$4 sm:$0xff]  }
 0x6ff   :  { %4751 = vmatpush2.bf16.msra.mxu1 %v6455_v24  ;;  %4718 = vmatpush2.bf16.msra.mxu0 %v6458_v9  ;;  %v6542_v24 = vld [vmem:[%s9193_s5 + $0x250] ss:$24 sps:$4 sm:$0xff]   ;;  %v6547_v9 = vld [vmem:[%s9193_s5 + $0x5e4] ss:$24 sps:$4 sm:$0xff]  }
 0x700   :  { %4752 = vmatprep.subr.bf16.mxu1 %v6463_v46  ;;  %4719 = vmatprep.subr.bf16.mxu0 %v6466_v47  ;;  %v6550_v46 = vld [vmem:[%s9193_s5 + $0x224] ss:$24 sps:$4 sm:$0xff]   ;;  %v6545_v47 = vld [vmem:[%s9193_s5 + $0x5e0] ss:$24 sps:$4 sm:$0xff]  }
 0x703   :  { %4753 = vmatpush2.bf16.msra.mxu1 %v6461_v21  ;;  %4720 = vmatpush2.bf16.msra.mxu0 %v6464_v51  ;;  %v6548_v21 = vld [vmem:[%s9193_s5 + $0x220] ss:$24 sps:$4 sm:$0xff]   ;;  %v6553_v51 = vld [vmem:[%s9193_s5 + $0x5b4] ss:$24 sps:$4 sm:$0xff]  }
 0x704   :  { %4754 = vmatprep.subr.bf16.mxu1 %v6469_v33  ;;  %4721 = vmatprep.subr.bf16.mxu0 %v6472_v60  ;;  %v6556_v33 = vld [vmem:[%s9193_s5 + $0x1f4] ss:$24 sps:$4 sm:$0xff]   ;;  %v6551_v60 = vld [vmem:[%s9193_s5 + $0x5b0] ss:$24 sps:$4 sm:$0xff]  }
 0x707   :  { %4755 = vmatpush2.bf16.msra.mxu1 %v6467_v59  ;;  %4722 = vmatpush2.bf16.msra.mxu0 %v6470_v38  ;;  %v6554_v59 = vld [vmem:[%s9193_s5 + $0x1f0] ss:$24 sps:$4 sm:$0xff]   ;;  %v6559_v38 = vld [vmem:[%s9193_s5 + $0x584] ss:$24 sps:$4 sm:$0xff]  }
 0x708   :  { %4756 = vmatprep.subr.bf16.mxu1 %v6475_v19  ;;  %4773 = vmatprep.subr.bf16.mxu0 %v6478_v61  ;;  %v6562_v19 = vld [vmem:[%s9193_s5 + $0x1c4] ss:$24 sps:$4 sm:$0xff]   ;;  %v6557_v61 = vld [vmem:[%s9193_s5 + $0x580] ss:$24 sps:$4 sm:$0xff]  }
 0x70a   :  { %4724 = vmatmul.mubr.bf16.vlgmr.msra.gmra.mxu0 %v8768_v31 }
 0x70b   :  { %4757 = vmatpush2.bf16.msra.mxu1 %v6473_v62  ;;  %4774 = vmatpush1.bf16.msra.mxu0 %v6476_v57  ;;  %v6560_v62 = vld [vmem:[%s9193_s5 + $0x1c0] ss:$24 sps:$4 sm:$0xff]   ;;  %v6565_v57 = vld [vmem:[%s9193_s5 + $0x554] ss:$24 sps:$4 sm:$0xff]  }
 0x70c   :  { %4805 = vmatprep.mubr.bf16.mxu0 %v8763_v48  ;;  %4758 = vmatprep.subr.bf16.mxu1 %v6481_v39  ;;  %v6488_v48 = vld [vmem:[%s9193_s5 + $0x100] ss:$24 sps:$4 sm:$0xff]   ;;  %v6568_v39 = vld [vmem:[%s9193_s5 + $0x194] ss:$24 sps:$4 sm:$0xff]  }
 0x70d   :  { %4775 = vmatprep.subr.bf16.mxu0 %v6484_v41  ;;  %v6563_v41 = vld [vmem:[%s9193_s5 + $0x550] ss:$24 sps:$4 sm:$0xff]  }
 0x70f   :  { %4759 = vmatpush2.bf16.msra.mxu1 %v6479_v42  ;;  %4776 = vmatpush1.bf16.msra.mxu0 %v6482_v22  ;;  %v6566_v42 = vld [vmem:[%s9193_s5 + $0x190] ss:$24 sps:$4 sm:$0xff]   ;;  %v6571_v22 = vld [vmem:[%s9193_s5 + $0x524] ss:$24 sps:$4 sm:$0xff]  }
 0x710   :  { %4760 = vmatprep.subr.bf16.mxu1 %v6487_v52  ;;  %4777 = vmatprep.subr.bf16.mxu0 %v6490_v53  ;;  %v6569_v52 = vld [vmem:[%s9193_s5 + $0x520] ss:$24 sps:$4 sm:$0xff]   ;;  %v6574_v53 = vld [vmem:[%s9193_s5 + $0x4f4] ss:$24 sps:$4 sm:$0xff]  }
 0x713   :  { %4761 = vmatpush2.bf16.msra.mxu1 %v6485_v25  ;;  %4778 = vmatpush1.bf16.msra.mxu0 %v6488_v48  ;;  %v6572_v25 = vld [vmem:[%s9193_s5 + $0x4f0] ss:$24 sps:$4 sm:$0xff]   ;;  %v6577_v48 = vld [vmem:[%s9193_s5 + $0x4c4] ss:$24 sps:$4 sm:$0xff]  }
 0x714   :  { %4762 = vmatprep.subr.bf16.mxu1 %v6493_v23  ;;  %4779 = vmatprep.subr.bf16.mxu0 %v6496_v32  ;;  %v6575_v23 = vld [vmem:[%s9193_s5 + $0x4c0] ss:$24 sps:$4 sm:$0xff]   ;;  %v6578_v32 = vld [vmem:[%s9193_s5 + $0x490] ss:$24 sps:$4 sm:$0xff]  }
 0x717   :  { %4763 = vmatpush2.bf16.msra.mxu1 %v6491_v36  ;;  %4780 = vmatpush1.bf16.msra.mxu0 %v6494_v54 }
 0x718   :  { %4814 = vmatprep.subr.bf16.mxu1 %v6499_v63  ;;  %4781 = vmatprep.subr.bf16.mxu0 %v6502_v44 }
 0x71a   :  { %4765 = vmatmul.mubr.bf16.vlgmr.msra.gmra.mxu1 %v8810_v8 }
 0x71b   :  { %4815 = vmatpush1.bf16.msra.mxu1 %v6497_v14  ;;  %4846 = vmatprep.mubr.bf16.mxu1 %v8802_v12  ;;  %v6509_v12 = vld [vmem:[%s9193_s5 + $0x400] ss:$24 sps:$4 sm:$0xff]  }
 0x71c   :  { %4782 = vmatpush1.bf16.msra.mxu0 %v6500_v17  ;;  %4816 = vmatprep.subr.bf16.mxu1 %v6505_v49  ;;  %v3617_v14 = vld [vmem:[%s9195_s6] sm:$0x3f] }
 0x71d   :  { %4783 = vmatprep.subr.bf16.mxu0 %v6508_v15  ;;  %v3622_v17 = vrot.slane %v3617_v14, %v3395_v34  ;;  %v3626_v49 = vrot.slane %v3617_v14, %v3399_v7  ;;  %v3630_v34 = vrot.slane %v3617_v14, %v3403_v6  ;;  %v3634_v7 = vrot.slane %v3617_v14, %v3407_v40 }
 0x71f   :  { %4817 = vmatpush1.bf16.msra.mxu1 %v6503_v45 }
 0x720   :  { %4784 = vmatpush1.bf16.msra.mxu0 %v6506_v0  ;;  %4818 = vmatprep.subr.bf16.mxu1 %v6511_v2 }
 0x721   :  { %4785 = vmatprep.subr.bf16.mxu0 %v6514_v29 }
 0x723   :  { %4819 = vmatpush1.bf16.msra.mxu1 %v6509_v12 }
 0x724   :  { %4786 = vmatpush1.bf16.msra.mxu0 %v6512_v50  ;;  %4820 = vmatprep.subr.bf16.mxu1 %v6517_v43 }
 0x725   :  { %4787 = vmatprep.subr.bf16.mxu0 %v6520_v4 }
 0x727   :  { %4821 = vmatpush1.bf16.msra.mxu1 %v6515_v55 }
 0x728   :  { %4788 = vmatpush1.bf16.msra.mxu0 %v6518_v16  ;;  %4822 = vmatprep.subr.bf16.mxu1 %v6523_v20 }
 0x729   :  { %4789 = vmatprep.subr.bf16.mxu0 %v6526_v3  ;;  %v6684_v3 = vmov 1983009808  }
 0x72b   :  { %4823 = vmatpush1.bf16.msra.mxu1 %v6521_v26  ;;  %v4864_v26 = vunpack.c.l.s4 %v6684_v3 }
 0x72c   :  { %4790 = vmatpush2.bf16.msra.mxu0 %v6524_v28  ;;  %4824 = vmatprep.subr.bf16.mxu1 %v6529_v37 }
 0x72d   :  { %4791 = vmatprep.subr.bf16.mxu0 %v6532_v18  ;;  %v4865_v28 = vunpack.c.0.s8 %v4864_v26 }
 0x72f   :  { %4825 = vmatpush1.bf16.msra.mxu1 %v6527_v10 }
 0x730   :  { %4792 = vmatpush2.bf16.msra.mxu0 %v6530_v27  ;;  %4826 = vmatprep.subr.bf16.mxu1 %v6535_v5  ;;  %v4868_v5 = vsub.s32 %v4865_v28, %v9415_v30 }
 0x731   :  { %4793 = vmatprep.subr.bf16.mxu0 %v6538_v1 }
 0x733   :  { %4827 = vmatpush1.bf16.msra.mxu1 %v6533_v58 }
 0x734   :  { %4794 = vmatpush2.bf16.msra.mxu0 %v6536_v11  ;;  %4828 = vmatprep.subr.bf16.mxu1 %v6541_v35 }
 0x735   :  { %4795 = vmatprep.subr.bf16.mxu0 %v6544_v56 }
 0x737   :  { %4829 = vmatpush1.bf16.msra.mxu1 %v6539_v13 }
 0x738   :  { %4796 = vmatpush2.bf16.msra.mxu0 %v6542_v24  ;;  %4830 = vmatprep.subr.bf16.mxu1 %v6547_v9 }
 0x739   :  { %4797 = vmatprep.subr.bf16.mxu0 %v6550_v46 }
 0x73b   :  { %4831 = vmatpush2.bf16.msra.mxu1 %v6545_v47 }
 0x73c   :  { %4798 = vmatpush2.bf16.msra.mxu0 %v6548_v21  ;;  %4832 = vmatprep.subr.bf16.mxu1 %v6553_v51  ;;  %v3637_v21 = vsub.s32 4, %v9415_v30  ;;  %v3641_v51 = vsub.s32 5, %v9415_v30 }
 0x73d   :  { %4799 = vmatprep.subr.bf16.mxu0 %v6556_v33 }
 0x73e   :  { %v3638_v33 = vrot.slane %v3617_v14, %v3637_v21 }
 0x73f   :  { %4833 = vmatpush2.bf16.msra.mxu1 %v6551_v60  ;;  %v3642_v60 = vrot.slane %v3617_v14, %v3641_v51 }
 0x740   :  { %4800 = vmatpush2.bf16.msra.mxu0 %v6554_v59  ;;  %4834 = vmatprep.subr.bf16.mxu1 %v6559_v38 }
 0x741   :  { %4801 = vmatprep.subr.bf16.mxu0 %v6562_v19 }
 0x743   :  { %4835 = vmatpush2.bf16.msra.mxu1 %v6557_v61 }
 0x744   :  { %4802 = vmatpush2.bf16.msra.mxu0 %v6560_v62  ;;  %4836 = vmatprep.subr.bf16.mxu1 %v6565_v57 }
 0x745   :  { %4803 = vmatprep.subr.bf16.mxu0 %v6568_v39 }
 0x747   :  { %4837 = vmatpush2.bf16.msra.mxu1 %v6563_v41 }
 0x748   :  { %4804 = vmatpush2.bf16.msra.mxu0 %v6566_v42  ;;  %4838 = vmatprep.subr.bf16.mxu1 %v6571_v22 }
 0x74b   :  { %4806 = vmatmul.mubr.bf16.vlgmr.msra.gmra.mxu0 %v8768_v31  ;;  %4839 = vmatpush2.bf16.msra.mxu1 %v6569_v52  ;;  %v6580_v31 = vld [vmem:[%s9193_s5 + $0x494] ss:$24 sps:$4 sm:$0xff]  }
 0x74c   :  { %4840 = vmatprep.subr.bf16.mxu1 %v6574_v53 }
 0x74f   :  { %4841 = vmatpush2.bf16.msra.mxu1 %v6572_v25 }
 0x750   :  { %4842 = vmatprep.subr.bf16.mxu1 %v6577_v48 }
 0x753   :  { %4843 = vmatpush2.bf16.msra.mxu1 %v6575_v23 }
 0x754   :  { %4844 = vmatprep.subr.bf16.mxu1 %v6580_v31 }
 0x757   :  { %4845 = vmatpush2.bf16.msra.mxu1 %v6578_v32 }
 0x75a   :  { %4847 = vmatmul.mubr.bf16.vlgmr.msra.gmra.mxu1 %v8810_v8 }
 0x78a   :  { %v4643_v36 = vpop.f32.mrf.mxu0 }
 0x78b   :  { %v4644_v15 = vadd.f32 %v4643_v36, %v3622_v17 }
 0x78c   :  { %v4645_v54 = vpop.f32.mrf.mxu0 }
 0x78d   :  { %v4646_v0 = vadd.f32 %v4645_v54, %v3626_v49 }
 0x78e   :  { %v4647_v63 = vpop.f32.mrf.mxu0 }
 0x790   :  { %v4648_v44 = vpop.f32.mrf.mxu0 }
 0x79a   :  { %v4684_v45 = vpop.f32.mrf.mxu1 }
 0x79b   :  { %v4685_v2 = vadd.f32 %v4684_v45, %v4644_v15 }
 0x79c   :  { %v4686_v29 = vpop.f32.mrf.mxu1 }
 0x79d   :  { %v4687_v8 = vadd.f32 %v4686_v29, %v4646_v0 }
 0x79e   :  { %v4688_v12 = vpop.f32.mrf.mxu1 }
 0x79f   :  { %v4861_v50 = vcombine.low %v4685_v2, %v4687_v8 }
 0x7a0   :  { %v4689_v43 = vpop.f32.mrf.mxu1 }
 0x7a1   :  { %v4869_v13 = vrot.slane %v4861_v50, %v4868_v5 }
 0x7ca   :  { %v4725_v4 = vpop.f32.mrf.mxu0 }
 0x7cb   :  { %v4726_v18 = vadd.f32 %v4725_v4, %v3630_v34 }
 0x7cc   :  { %v4727_v55 = vpop.f32.mrf.mxu0 }
 0x7cd   :  { %v4728_v10 = vadd.f32 %v4727_v55, %v3634_v7 }
 0x7ce   :  { %v4729_v16 = vpop.f32.mrf.mxu0 }
 0x7d0   :  { %v4730_v20 = vpop.f32.mrf.mxu0 }
 0x7da   :  { %v4766_v37 = vpop.f32.mrf.mxu1 }
 0x7db   :  { %v4767_v1 = vadd.f32 %v4766_v37, %v4726_v18 }
 0x7dc   :  { %v4768_v27 = vpop.f32.mrf.mxu1 }
 0x7dd   :  { %v4769_v58 = vadd.f32 %v4768_v27, %v4728_v10 }
 0x7de   :  { %v4770_v11 = vpop.f32.mrf.mxu1 }
 0x7df   :  { %v4862_v35 = vcombine.low %v4767_v1, %v4769_v58 }
 0x7e0   :  { %v4771_v56 = vpop.f32.mrf.mxu1 }
 0x7e1   :  { %v4876_v24 = vrot.slane %v4862_v35, %v4868_v5 }
 0x7e3   :  { %v4877_v9 = vcombine.low %v4869_v13, %v4876_v24 }
 0x7e5   :  { %4888 = vst [vmem:[%s9196_s7] sm:$0xff] %v4877_v9 }
 0x80b   :  { %v4807_v6 = vpop.f32.mrf.mxu0 }
 0x80c   :  { %v4808_v38 = vadd.f32 %v4807_v6, %v3638_v33 }
 0x80d   :  { %v4809_v40 = vpop.f32.mrf.mxu0 }
 0x80e   :  { %v4810_v19 = vadd.f32 %v4809_v40, %v3642_v60 }
 0x80f   :  { %v4811_v46 = vpop.f32.mrf.mxu0 }
 0x811   :  { %v4812_v47 = vpop.f32.mrf.mxu0 }
 0x81a   :  { %v4848_v59 = vpop.f32.mrf.mxu1 }
 0x81b   :  { %v4849_v62 = vadd.f32 %v4848_v59, %v4808_v38 }
 0x81c   :  { %v4850_v61 = vpop.f32.mrf.mxu1 }
 0x81d   :  { %v4851_v57 = vadd.f32 %v4850_v61, %v4810_v19 }
 0x81e   :  { %v4852_v39 = vpop.f32.mrf.mxu1 }
 0x81f   :  { %v4878_v41 = vcombine.low %v4849_v62, %v4851_v57 }
 0x820   :  { %v4853_v42 = vpop.f32.mrf.mxu1 }
 0x821   :  { %5363 = vst.sshfl [vmem:[%s9196_s7 + $0x8] sm:$0x33 pattern:$0x76325410] %v4878_v41 }

</bundles_post_ra>
